<compile_context>
chip_gen: v5e
topology: v5e:2x2
jax: 0.10.0
libtpu: 0.0.40
codegen_flags: <defaults>
</compile_context>

<pallas_src>
import functools
import math

import jax
import jax.numpy as jnp
from jax import lax
from jax.experimental import pallas as pl
from jax.experimental.pallas import tpu as pltpu

LN_EPS = 1e-5  # PyTorch nn.LayerNorm default


# ----------------------------- in-kernel helpers -----------------------------

def _layernorm(x, g, b):
    mu = jnp.mean(x, axis=-1, keepdims=True)
    xc = x - mu
    var = jnp.mean(xc * xc, axis=-1, keepdims=True)
    return xc * lax.rsqrt(var + LN_EPS) * g + b


def _mha(xn, wqkv, bqkv, wout, bout, *, n_heads, scale, mask=None):
    """(to_qkv ∘ in_proj) -> per-head softmax attention -> (out_proj ∘ to_out)."""
    t, d = xn.shape
    dh = d // n_heads
    # Fused QKV projection (in_proj folded into to_qkv at prep time), bf16 MXU.
    qkv = jnp.dot(xn.astype(jnp.bfloat16), wqkv,
                  preferred_element_type=jnp.float32) + bqkv          # (T, 3d) f32
    # d-aligned slices for Q/K/V.
    q = qkv[:, :d] * scale
    k = qkv[:, d:2 * d]
    v = qkv[:, 2 * d:]

    heads = []
    for h in range(n_heads):           # static unroll over heads (dh=8 is inherent)
        sl = slice(h * dh, (h + 1) * dh)
        s = lax.dot_general(q[:, sl].astype(jnp.bfloat16),
                            k[:, sl].astype(jnp.bfloat16),
                            (((1,), (1,)), ((), ())),
                            preferred_element_type=jnp.float32)        # (T, T)
        if mask is not None:
            s = s + mask               # additive float attn_mask (PyTorch semantics)
        s = s - jnp.max(s, axis=-1, keepdims=True)
        p = jnp.exp(s)
        p = p * pl.reciprocal(jnp.sum(p, axis=-1, keepdims=True), approx=True)
        heads.append(jnp.dot(p.astype(jnp.bfloat16),
                             v[:, sl].astype(jnp.bfloat16),
                             preferred_element_type=jnp.float32))       # (T, dh)

    # Concatenate heads, then ONE dense output projection (out_proj ∘ to_out).
    o = jnp.concatenate(heads, axis=-1)                                 # (T, d)
    return jnp.dot(o.astype(jnp.bfloat16), wout,
                   preferred_element_type=jnp.float32) + bout


def _ffn(xn, w1, b1, w2, b2):
    h = jnp.dot(xn.astype(jnp.bfloat16), w1,
                preferred_element_type=jnp.float32) + b1
    h = jnp.maximum(h, 0.0)
    return jnp.dot(h.astype(jnp.bfloat16), w2,
                   preferred_element_type=jnp.float32) + b2


# ----------------------------- stack kernels ---------------------------------

def _encoder_stack_kernel(src_ref, ln1g, ln1b, wqkv, bqkv, wout, bout,
                          ln2g, ln2b, w1, b1, w2, b2,
                          out_ref, x_scr, *, n_heads, scale):
    """Whole encoder stack: grid axis = layer (sequential / 'arbitrary')."""
    @pl.when(pl.program_id(0) == 0)
    def _():
        x_scr[...] = src_ref[...].astype(jnp.float32)

    x = x_scr[...]

    # Sublayer 1: x + MHA(LN1(x))
    xn = _layernorm(x, ln1g[0], ln1b[0])
    x = x + _mha(xn, wqkv[0], bqkv[0], wout[0], bout[0],
                 n_heads=n_heads, scale=scale)

    # Sublayer 2: x + FFN(LN2(x))
    xn = _layernorm(x, ln2g[0], ln2b[0])
    x = x + _ffn(xn, w1[0], b1[0], w2[0], b2[0])

    x_scr[...] = x                     # carry activation in VMEM; no HBM round-trip

    @pl.when(pl.program_id(0) == pl.num_programs(0) - 1)
    def _():
        out_ref[...] = x.astype(out_ref.dtype)


def _decoder_stack_kernel(tgt_ref, enc_ref,
                          ln1g, ln1b, wqkv1, bqkv1, wout1, bout1,
                          ln2g, ln2b, wqkv2, bqkv2, wout2, bout2,
                          ln3g, ln3b, w1, b1, w2, b2,
                          out_ref, x_scr, *, n_heads, scale):
    """Whole decoder stack: grid axis = layer (sequential / 'arbitrary')."""
    @pl.when(pl.program_id(0) == 0)
    def _():
        x_scr[...] = tgt_ref[...].astype(jnp.float32)

    x = x_scr[...]
    enc = enc_ref[...].astype(jnp.float32)

    # Sublayer 1: x + MHA(LN1(x))
    xn = _layernorm(x, ln1g[0], ln1b[0])
    x = x + _mha(xn, wqkv1[0], bqkv1[0], wout1[0], bout1[0],
                 n_heads=n_heads, scale=scale)

    # Sublayer 2: faithful to the reference — enc_out is used as an ADDITIVE
    # attention mask on the target self-attention scores.
    xn = _layernorm(x, ln2g[0], ln2b[0])
    x = x + _mha(xn, wqkv2[0], bqkv2[0], wout2[0], bout2[0],
                 n_heads=n_heads, scale=scale, mask=enc)

    # Sublayer 3: x + FFN(LN3(x))
    xn = _layernorm(x, ln3g[0], ln3b[0])
    x = x + _ffn(xn, w1[0], b1[0], w2[0], b2[0])

    x_scr[...] = x

    @pl.when(pl.program_id(0) == pl.num_programs(0) - 1)
    def _():
        out_ref[...] = x.astype(out_ref.dtype)


# ------------------------------ kernel wrappers -------------------------------

_ENC_KEYS = ("ln1_g", "ln1_b", "wqkv", "bqkv", "wout", "bout",
             "ln2_g", "ln2_b", "w1", "b1", "w2", "b2")
_DEC_KEYS = ("ln1_g", "ln1_b", "wqkv1", "bqkv1", "wout1", "bout1",
             "ln2_g", "ln2_b", "wqkv2", "bqkv2", "wout2", "bout2",
             "ln3_g", "ln3_b", "w1", "b1", "w2", "b2")


def _act_spec(t, d):
    # Constant block index -> VMEM-resident across all layer iterations.
    return pl.BlockSpec((t, d), lambda l: (0, 0))


def _layer_spec(arr):
    tail = arr.shape[1:]
    return pl.BlockSpec((1,) + tail, lambda l: (l,) + (0,) * len(tail))


def encoder_stack(src, ep, *, n_heads):
    t, d = src.shape
    n_layers = ep["wqkv"].shape[0]
    scale = 1.0 / math.sqrt(d // n_heads)
    weights = [ep[k] for k in _ENC_KEYS]
    return pl.pallas_call(
        functools.partial(_encoder_stack_kernel, n_heads=n_heads, scale=scale),
        grid=(n_layers,),
        in_specs=[_act_spec(t, d)] + [_layer_spec(w) for w in weights],
        out_specs=_act_spec(t, d),
        out_shape=jax.ShapeDtypeStruct((t, d), src.dtype),
        scratch_shapes=[pltpu.VMEM((t, d), jnp.float32)],
        compiler_params=pltpu.CompilerParams(dimension_semantics=("arbitrary",)),
    )(src, *weights)


def decoder_stack(tgt, enc_out, dp, *, n_heads):
    t, d = tgt.shape
    n_layers = dp["wqkv1"].shape[0]
    scale = 1.0 / math.sqrt(d // n_heads)
    weights = [dp[k] for k in _DEC_KEYS]
    return pl.pallas_call(
        functools.partial(_decoder_stack_kernel, n_heads=n_heads, scale=scale),
        grid=(n_layers,),
        in_specs=[_act_spec(t, d), _act_spec(t, d)] + [_layer_spec(w) for w in weights],
        out_specs=_act_spec(t, d),
        out_shape=jax.ShapeDtypeStruct((t, d), tgt.dtype),
        scratch_shapes=[pltpu.VMEM((t, d), jnp.float32)],
        compiler_params=pltpu.CompilerParams(dimension_semantics=("arbitrary",)),
    )(tgt, enc_out, *weights)


def transformer_forward(src, tgt, params, *, n_heads):
    enc_out = encoder_stack(src, params["encoder"], n_heads=n_heads)
    return decoder_stack(tgt, enc_out, params["decoder"], n_heads=n_heads)


# ---------------- one-time parameter preparation (weight folding) -------------

def _prepare_mha(raw, ln_g, ln_b):
    """Compose (to_qkv ∘ in_proj) and (out_proj ∘ to_out); transpose + bf16 once."""
    d = raw["out_proj_w"].shape[0]
    wt, bt = raw["to_qkv_w"], raw["to_qkv_b"]                 # (3d, d), (3d,)
    wq, wk, wv = raw["in_proj_w"][:d], raw["in_proj_w"][d:2 * d], raw["in_proj_w"][2 * d:]
    bq, bk, bv = raw["in_proj_b"][:d], raw["in_proj_b"][d:2 * d], raw["in_proj_b"][2 * d:]

    wq_f, bq_f = wq @ wt[:d], wq @ bt[:d] + bq
    wk_f, bk_f = wk @ wt[d:2 * d], wk @ bt[d:2 * d] + bk
    wv_f, bv_f = wv @ wt[2 * d:], wv @ bt[2 * d:] + bv
    wqkv = jnp.concatenate([wq_f, wk_f, wv_f], axis=0)        # (3d, d)
    bqkv = jnp.concatenate([bq_f, bk_f, bv_f], axis=0)        # (3d,)

    wout = raw["to_out_w"] @ raw["out_proj_w"]                # (d, d)
    bout = raw["to_out_w"] @ raw["out_proj_b"] + raw["to_out_b"]

    return {
        "ln_g": ln_g.reshape(1, d), "ln_b": ln_b.reshape(1, d),
        "wqkv_t": wqkv.T.astype(jnp.bfloat16), "bqkv": bqkv.reshape(1, 3 * d),
        "wout_t": wout.T.astype(jnp.bfloat16), "bout": bout.reshape(1, d),
    }


def _prepare_ff(raw, ln_g, ln_b):
    d_ff, d = raw["w1"].shape
    return {
        "ln_g": ln_g.reshape(1, d), "ln_b": ln_b.reshape(1, d),
        "w1_t": raw["w1"].T.astype(jnp.bfloat16), "b1": raw["b1"].reshape(1, d_ff),
        "w2_t": raw["w2"].T.astype(jnp.bfloat16), "b2": raw["b2"].reshape(1, d),
    }


def _stack(dicts, key):
    return jnp.stack([d[key] for d in dicts], axis=0)


def prepare_params(raw):
    enc_attn = [_prepare_mha(p["attn"], p["ln1_g"], p["ln1_b"]) for p in raw["encoder"]]
    enc_ff = [_prepare_ff(p["ff"], p["ln2_g"], p["ln2_b"]) for p in raw["encoder"]]
    enc = {
        "ln1_g": _stack(enc_attn, "ln_g"), "ln1_b": _stack(enc_attn, "ln_b"),
        "wqkv": _stack(enc_attn, "wqkv_t"), "bqkv": _stack(enc_attn, "bqkv"),
        "wout": _stack(enc_attn, "wout_t"), "bout": _stack(enc_attn, "bout"),
        "ln2_g": _stack(enc_ff, "ln_g"), "ln2_b": _stack(enc_ff, "ln_b"),
        "w1": _stack(enc_ff, "w1_t"), "b1": _stack(enc_ff, "b1"),
        "w2": _stack(enc_ff, "w2_t"), "b2": _stack(enc_ff, "b2"),
    }
    dec_a1 = [_prepare_mha(p["attn1"], p["ln1_g"], p["ln1_b"]) for p in raw["decoder"]]
    dec_a2 = [_prepare_mha(p["attn2"], p["ln2_g"], p["ln2_b"]) for p in raw["decoder"]]
    dec_ff = [_prepare_ff(p["ff"], p["ln3_g"], p["ln3_b"]) for p in raw["decoder"]]
    dec = {
        "ln1_g": _stack(dec_a1, "ln_g"), "ln1_b": _stack(dec_a1, "ln_b"),
        "wqkv1": _stack(dec_a1, "wqkv_t"), "bqkv1": _stack(dec_a1, "bqkv"),
        "wout1": _stack(dec_a1, "wout_t"), "bout1": _stack(dec_a1, "bout"),
        "ln2_g": _stack(dec_a2, "ln_g"), "ln2_b": _stack(dec_a2, "ln_b"),
        "wqkv2": _stack(dec_a2, "wqkv_t"), "bqkv2": _stack(dec_a2, "bqkv"),
        "wout2": _stack(dec_a2, "wout_t"), "bout2": _stack(dec_a2, "bout"),
        "ln3_g": _stack(dec_ff, "ln_g"), "ln3_b": _stack(dec_ff, "ln_b"),
        "w1": _stack(dec_ff, "w1_t"), "b1": _stack(dec_ff, "b1"),
        "w2": _stack(dec_ff, "w2_t"), "b2": _stack(dec_ff, "b2"),
    }
    return {"encoder": enc, "decoder": dec}


# ------------------------- deterministic parameter init -----------------------

def _dense_init(key, out_dim, in_dim):
    kw, kb = jax.random.split(key)
    lim = 1.0 / math.sqrt(in_dim)
    w = jax.random.uniform(kw, (out_dim, in_dim), jnp.float32, -lim, lim)
    b = jax.random.uniform(kb, (out_dim,), jnp.float32, -lim, lim)
    return w, b


def _mha_init(key, d_model):
    k1, k2, k3, k4 = jax.random.split(key, 4)
    p = {}
    p["to_qkv_w"], p["to_qkv_b"] = _dense_init(k1, 3 * d_model, d_model)
    p["to_out_w"], p["to_out_b"] = _dense_init(k2, d_model, d_model)
    p["in_proj_w"], p["in_proj_b"] = _dense_init(k3, 3 * d_model, d_model)
    p["out_proj_w"], p["out_proj_b"] = _dense_init(k4, d_model, d_model)
    return p


def _ff_init(key, d_model, d_ff):
    k1, k2 = jax.random.split(key)
    p = {}
    p["w1"], p["b1"] = _dense_init(k1, d_ff, d_model)
    p["w2"], p["b2"] = _dense_init(k2, d_model, d_ff)
    return p


def _ln_init(d_model):
    return jnp.ones((d_model,), jnp.float32), jnp.zeros((d_model,), jnp.float32)


def _encoder_layer_init(key, d_model, d_ff):
    k1, k2 = jax.random.split(key)
    p = {"attn": _mha_init(k1, d_model), "ff": _ff_init(k2, d_model, d_ff)}
    p["ln1_g"], p["ln1_b"] = _ln_init(d_model)
    p["ln2_g"], p["ln2_b"] = _ln_init(d_model)
    return p


def _decoder_layer_init(key, d_model, d_ff):
    k1, k2, k3 = jax.random.split(key, 3)
    p = {"attn1": _mha_init(k1, d_model),
         "attn2": _mha_init(k2, d_model),
         "ff": _ff_init(k3, d_model, d_ff)}
    p["ln1_g"], p["ln1_b"] = _ln_init(d_model)
    p["ln2_g"], p["ln2_b"] = _ln_init(d_model)
    p["ln3_g"], p["ln3_b"] = _ln_init(d_model)
    return p


def init_transformer_params(key, n_layers, d_model, d_ff):
    keys = jax.random.split(key, 2 * n_layers)
    enc = [_encoder_layer_init(keys[i], d_model, d_ff) for i in range(n_layers)]
    dec = [_decoder_layer_init(keys[n_layers + i], d_model, d_ff)
           for i in range(n_layers)]
    return {"encoder": enc, "decoder": dec}


# ------------------------------------ main ------------------------------------

if __name__ == "__main__":
    n_layers, d_model, n_heads, d_ff = 2, 32, 4, 64
    # The reference code requires src_len == tgt_len == d_model (enc_out is
    # consumed as a (T, T) additive attention mask in the decoder).
    seq_len = d_model

    root = jax.random.PRNGKey(0)
    k_params, k_src, k_tgt = jax.random.split(root, 3)
    raw_params = init_transformer_params(k_params, n_layers, d_model, d_ff)
    params = prepare_params(raw_params)      # one-time folding / transpose / bf16 cast
    src = jax.random.normal(k_src, (seq_len, d_model), jnp.float32)
    tgt = jax.random.normal(k_tgt, (seq_len, d_model), jnp.float32)

    fwd = jax.jit(functools.partial(transformer_forward, n_heads=n_heads))
    out = fwd(src, tgt, params)
    jax.block_until_ready(out)
    assert out.shape == (seq_len, d_model) and out.dtype == jnp.float32
    assert bool(jnp.isfinite(out).all())
    print("KERNEL_OK")
</pallas_src>

<mosaic_0001>
module attributes {stable_mosaic.version = 11 : i64} {
  func.func @_encoder_stack_kernel(%arg0: i32, %arg1: memref<32x32xf32, #tpu.memory_space<vmem>>, %arg2: memref<1x1x32xf32, #tpu.memory_space<vmem>>, %arg3: memref<1x1x32xf32, #tpu.memory_space<vmem>>, %arg4: memref<1x32x96xbf16, #tpu.memory_space<vmem>>, %arg5: memref<1x1x96xf32, #tpu.memory_space<vmem>>, %arg6: memref<1x32x32xbf16, #tpu.memory_space<vmem>>, %arg7: memref<1x1x32xf32, #tpu.memory_space<vmem>>, %arg8: memref<1x1x32xf32, #tpu.memory_space<vmem>>, %arg9: memref<1x1x32xf32, #tpu.memory_space<vmem>>, %arg10: memref<1x32x64xbf16, #tpu.memory_space<vmem>>, %arg11: memref<1x1x64xf32, #tpu.memory_space<vmem>>, %arg12: memref<1x64x32xbf16, #tpu.memory_space<vmem>>, %arg13: memref<1x1x32xf32, #tpu.memory_space<vmem>>, %arg14: memref<32x32xf32, #tpu.memory_space<vmem>>, %arg15: memref<32x32xf32, #tpu.memory_space<vmem>>) attributes {dimension_semantics = [#tpu.dimension_semantics<arbitrary>], iteration_bounds = array<i64: 2>, scalar_prefetch = 0 : i64, scratch_operands = 1 : i64, tpu.core_type = #tpu.core_type<tc>, window_params = [{pipeline_mode = #tpu.pipeline_mode<synchronous>, transform_indices = @transform_0, window_bounds = array<i64: 32, 32>}, {transform_indices = @transform_1, window_bounds = array<i64: 1, 1, 32>}, {transform_indices = @transform_2, window_bounds = array<i64: 1, 1, 32>}, {transform_indices = @transform_3, window_bounds = array<i64: 1, 32, 96>}, {transform_indices = @transform_4, window_bounds = array<i64: 1, 1, 96>}, {transform_indices = @transform_5, window_bounds = array<i64: 1, 32, 32>}, {transform_indices = @transform_6, window_bounds = array<i64: 1, 1, 32>}, {transform_indices = @transform_7, window_bounds = array<i64: 1, 1, 32>}, {transform_indices = @transform_8, window_bounds = array<i64: 1, 1, 32>}, {transform_indices = @transform_9, window_bounds = array<i64: 1, 32, 64>}, {transform_indices = @transform_10, window_bounds = array<i64: 1, 1, 64>}, {transform_indices = @transform_11, window_bounds = array<i64: 1, 64, 32>}, {transform_indices = @transform_12, window_bounds = array<i64: 1, 1, 32>}, {pipeline_mode = #tpu.pipeline_mode<synchronous>, transform_indices = @transform_13, window_bounds = array<i64: 32, 32>}]} {
    %c0_i32 = arith.constant 0 : i32
    %0 = arith.cmpi eq, %arg0, %c0_i32 : i32
    %1 = arith.extui %0 : i1 to i32
    %c0_i32_0 = arith.constant 0 : i32
    %2 = arith.cmpi ne, %1, %c0_i32_0 : i32
    scf.if %2 {
      %c0_72 = arith.constant 0 : index
      %c0_73 = arith.constant 0 : index
      %174 = vector.load %arg1[%c0_72, %c0_73] : memref<32x32xf32, #tpu.memory_space<vmem>>, vector<32x32xf32>
      %c0_74 = arith.constant 0 : index
      %c0_75 = arith.constant 0 : index
      %175 = vector.load %arg15[%c0_74, %c0_75] : memref<32x32xf32, #tpu.memory_space<vmem>>, vector<32x32xf32>
      tpu.vector_store %arg15[%c0_74, %c0_75], %174 {strides = array<i32>} : memref<32x32xf32, #tpu.memory_space<vmem>>, vector<32x32xf32>,
    } else {
    }
    %c0 = arith.constant 0 : index
    %c0_1 = arith.constant 0 : index
    %3 = vector.load %arg15[%c0, %c0_1] : memref<32x32xf32, #tpu.memory_space<vmem>>, vector<32x32xf32>
    %c0_2 = arith.constant 0 : index
    %c0_3 = arith.constant 0 : index
    %c0_4 = arith.constant 0 : index
    %4 = vector.load %arg2[%c0_2, %c0_3, %c0_4] : memref<1x1x32xf32, #tpu.memory_space<vmem>>, vector<1x1x32xf32>
    %5 = vector.shape_cast %4 : vector<1x1x32xf32> to vector<1x32xf32>
    %c0_5 = arith.constant 0 : index
    %c0_6 = arith.constant 0 : index
    %c0_7 = arith.constant 0 : index
    %6 = vector.load %arg3[%c0_5, %c0_6, %c0_7] : memref<1x1x32xf32, #tpu.memory_space<vmem>>, vector<1x1x32xf32>
    %7 = vector.shape_cast %6 : vector<1x1x32xf32> to vector<1x32xf32>
    %cst = arith.constant dense<0.000000e+00> : vector<32xf32>
    %8 = vector.multi_reduction <add>, %3, %cst [1] : vector<32x32xf32> to vector<32xf32>
    %9 = vector.shape_cast %8 : vector<32xf32> to vector<32x1xf32>
    %cst_8 = arith.constant 3.200000e+01 : f32
    %10 = vector.broadcast %cst_8 : f32 to vector<32x1xf32>
    %11 = arith.divf %9, %10 : vector<32x1xf32>
    %12 = vector.broadcast %11 : vector<32x1xf32> to vector<32x32xf32>
    %13 = arith.subf %3, %12 : vector<32x32xf32>
    %14 = arith.mulf %13, %13 : vector<32x32xf32>
    %cst_9 = arith.constant dense<0.000000e+00> : vector<32xf32>
    %15 = vector.multi_reduction <add>, %14, %cst_9 [1] : vector<32x32xf32> to vector<32xf32>
    %16 = vector.shape_cast %15 : vector<32xf32> to vector<32x1xf32>
    %cst_10 = arith.constant 3.200000e+01 : f32
    %17 = vector.broadcast %cst_10 : f32 to vector<32x1xf32>
    %18 = arith.divf %16, %17 : vector<32x1xf32>
    %cst_11 = arith.constant 9.99999974E-6 : f32
    %19 = vector.broadcast %cst_11 : f32 to vector<32x1xf32>
    %20 = arith.addf %18, %19 : vector<32x1xf32>
    %21 = math.rsqrt %20 : vector<32x1xf32>
    %22 = vector.broadcast %21 : vector<32x1xf32> to vector<32x32xf32>
    %23 = arith.mulf %13, %22 : vector<32x32xf32>
    %24 = vector.broadcast %5 : vector<1x32xf32> to vector<32x32xf32>
    %25 = arith.mulf %23, %24 : vector<32x32xf32>
    %26 = vector.broadcast %7 : vector<1x32xf32> to vector<32x32xf32>
    %27 = arith.addf %25, %26 : vector<32x32xf32>
    %c0_12 = arith.constant 0 : index
    %c0_13 = arith.constant 0 : index
    %c0_14 = arith.constant 0 : index
    %28 = vector.load %arg4[%c0_12, %c0_13, %c0_14] : memref<1x32x96xbf16, #tpu.memory_space<vmem>>, vector<1x32x96xbf16>
    %29 = vector.shape_cast %28 : vector<1x32x96xbf16> to vector<32x96xbf16>
    %c0_15 = arith.constant 0 : index
    %c0_16 = arith.constant 0 : index
    %c0_17 = arith.constant 0 : index
    %30 = vector.load %arg5[%c0_15, %c0_16, %c0_17] : memref<1x1x96xf32, #tpu.memory_space<vmem>>, vector<1x1x96xf32>
    %31 = vector.shape_cast %30 : vector<1x1x96xf32> to vector<1x96xf32>
    %c0_18 = arith.constant 0 : index
    %c0_19 = arith.constant 0 : index
    %c0_20 = arith.constant 0 : index
    %32 = vector.load %arg6[%c0_18, %c0_19, %c0_20] : memref<1x32x32xbf16, #tpu.memory_space<vmem>>, vector<1x32x32xbf16>
    %33 = vector.shape_cast %32 : vector<1x32x32xbf16> to vector<32x32xbf16>
    %c0_21 = arith.constant 0 : index
    %c0_22 = arith.constant 0 : index
    %c0_23 = arith.constant 0 : index
    %34 = vector.load %arg7[%c0_21, %c0_22, %c0_23] : memref<1x1x32xf32, #tpu.memory_space<vmem>>, vector<1x1x32xf32>
    %35 = vector.shape_cast %34 : vector<1x1x32xf32> to vector<1x32xf32>
    %36 = arith.truncf %27 : vector<32x32xf32> to vector<32x32xbf16>
    %cst_24 = arith.constant dense<0.000000e+00> : vector<32x96xf32>
    %37 = tpu.matmul %36, %29, %cst_24 {dimension_numbers = #tpu.dot_dimension_numbers<[1], [0], [0], [1], [0, 0, 1, 1], [], []>} : vector<32x32xbf16>, vector<32x96xbf16>, vector<32x96xf32> -> vector<32x96xf32>
    %38 = vector.broadcast %31 : vector<1x96xf32> to vector<32x96xf32>
    %39 = arith.addf %37, %38 : vector<32x96xf32>
    %40 = vector.extract_strided_slice %39 {offsets = [0, 0], sizes = [32, 32], strides = [1, 1]} : vector<32x96xf32> to vector<32x32xf32>
    %cst_25 = arith.constant 0.353553385 : f32
    %41 = vector.broadcast %cst_25 : f32 to vector<32x32xf32>
    %42 = arith.mulf %40, %41 : vector<32x32xf32>
    %43 = vector.extract_strided_slice %39 {offsets = [0, 32], sizes = [32, 32], strides = [1, 1]} : vector<32x96xf32> to vector<32x32xf32>
    %44 = vector.extract_strided_slice %39 {offsets = [0, 64], sizes = [32, 32], strides = [1, 1]} : vector<32x96xf32> to vector<32x32xf32>
    %45 = vector.extract_strided_slice %42 {offsets = [0, 0], sizes = [32, 8], strides = [1, 1]} : vector<32x32xf32> to vector<32x8xf32>
    %46 = arith.truncf %45 : vector<32x8xf32> to vector<32x8xbf16>
    %47 = vector.extract_strided_slice %43 {offsets = [0, 0], sizes = [32, 8], strides = [1, 1]} : vector<32x32xf32> to vector<32x8xf32>
    %48 = arith.truncf %47 : vector<32x8xf32> to vector<32x8xbf16>
    %cst_26 = arith.constant dense<0.000000e+00> : vector<32x32xf32>
    %49 = tpu.matmul %46, %48, %cst_26 {dimension_numbers = #tpu.dot_dimension_numbers<[1], [1], [0], [0], [0, 0, 1, 0], [], []>} : vector<32x8xbf16>, vector<32x8xbf16>, vector<32x32xf32> -> vector<32x32xf32>
    %cst_27 = arith.constant dense<0xFF800000> : vector<32xf32>
    %50 = vector.multi_reduction <maximumf>, %49, %cst_27 [1] : vector<32x32xf32> to vector<32xf32>
    %51 = vector.shape_cast %50 : vector<32xf32> to vector<32x1xf32>
    %52 = vector.broadcast %51 : vector<32x1xf32> to vector<32x32xf32>
    %53 = arith.subf %49, %52 : vector<32x32xf32>
    %54 = math.exp %53 : vector<32x32xf32>
    %cst_28 = arith.constant dense<0.000000e+00> : vector<32xf32>
    %55 = vector.multi_reduction <add>, %54, %cst_28 [1] : vector<32x32xf32> to vector<32xf32>
    %56 = vector.shape_cast %55 : vector<32xf32> to vector<32x1xf32>
    %57 = tpu.reciprocal %56 {approx = true} : vector<32x1xf32> -> vector<32x1xf32>
    %58 = vector.broadcast %57 : vector<32x1xf32> to vector<32x32xf32>
    %59 = arith.mulf %54, %58 : vector<32x32xf32>
    %60 = arith.truncf %59 : vector<32x32xf32> to vector<32x32xbf16>
    %61 = vector.extract_strided_slice %44 {offsets = [0, 0], sizes = [32, 8], strides = [1, 1]} : vector<32x32xf32> to vector<32x8xf32>
    %62 = arith.truncf %61 : vector<32x8xf32> to vector<32x8xbf16>
    %cst_29 = arith.constant dense<0.000000e+00> : vector<32x8xf32>
    %63 = tpu.matmul %60, %62, %cst_29 {dimension_numbers = #tpu.dot_dimension_numbers<[1], [0], [0], [1], [0, 0, 1, 1], [], []>} : vector<32x32xbf16>, vector<32x8xbf16>, vector<32x8xf32> -> vector<32x8xf32>
    %64 = vector.extract_strided_slice %42 {offsets = [0, 8], sizes = [32, 8], strides = [1, 1]} : vector<32x32xf32> to vector<32x8xf32>
    %65 = arith.truncf %64 : vector<32x8xf32> to vector<32x8xbf16>
    %66 = vector.extract_strided_slice %43 {offsets = [0, 8], sizes = [32, 8], strides = [1, 1]} : vector<32x32xf32> to vector<32x8xf32>
    %67 = arith.truncf %66 : vector<32x8xf32> to vector<32x8xbf16>
    %cst_30 = arith.constant dense<0.000000e+00> : vector<32x32xf32>
    %68 = tpu.matmul %65, %67, %cst_30 {dimension_numbers = #tpu.dot_dimension_numbers<[1], [1], [0], [0], [0, 0, 1, 0], [], []>} : vector<32x8xbf16>, vector<32x8xbf16>, vector<32x32xf32> -> vector<32x32xf32>
    %cst_31 = arith.constant dense<0xFF800000> : vector<32xf32>
    %69 = vector.multi_reduction <maximumf>, %68, %cst_31 [1] : vector<32x32xf32> to vector<32xf32>
    %70 = vector.shape_cast %69 : vector<32xf32> to vector<32x1xf32>
    %71 = vector.broadcast %70 : vector<32x1xf32> to vector<32x32xf32>
    %72 = arith.subf %68, %71 : vector<32x32xf32>
    %73 = math.exp %72 : vector<32x32xf32>
    %cst_32 = arith.constant dense<0.000000e+00> : vector<32xf32>
    %74 = vector.multi_reduction <add>, %73, %cst_32 [1] : vector<32x32xf32> to vector<32xf32>
    %75 = vector.shape_cast %74 : vector<32xf32> to vector<32x1xf32>
    %76 = tpu.reciprocal %75 {approx = true} : vector<32x1xf32> -> vector<32x1xf32>
    %77 = vector.broadcast %76 : vector<32x1xf32> to vector<32x32xf32>
    %78 = arith.mulf %73, %77 : vector<32x32xf32>
    %79 = arith.truncf %78 : vector<32x32xf32> to vector<32x32xbf16>
    %80 = vector.extract_strided_slice %44 {offsets = [0, 8], sizes = [32, 8], strides = [1, 1]} : vector<32x32xf32> to vector<32x8xf32>
    %81 = arith.truncf %80 : vector<32x8xf32> to vector<32x8xbf16>
    %cst_33 = arith.constant dense<0.000000e+00> : vector<32x8xf32>
    %82 = tpu.matmul %79, %81, %cst_33 {dimension_numbers = #tpu.dot_dimension_numbers<[1], [0], [0], [1], [0, 0, 1, 1], [], []>} : vector<32x32xbf16>, vector<32x8xbf16>, vector<32x8xf32> -> vector<32x8xf32>
    %83 = vector.extract_strided_slice %42 {offsets = [0, 16], sizes = [32, 8], strides = [1, 1]} : vector<32x32xf32> to vector<32x8xf32>
    %84 = arith.truncf %83 : vector<32x8xf32> to vector<32x8xbf16>
    %85 = vector.extract_strided_slice %43 {offsets = [0, 16], sizes = [32, 8], strides = [1, 1]} : vector<32x32xf32> to vector<32x8xf32>
    %86 = arith.truncf %85 : vector<32x8xf32> to vector<32x8xbf16>
    %cst_34 = arith.constant dense<0.000000e+00> : vector<32x32xf32>
    %87 = tpu.matmul %84, %86, %cst_34 {dimension_numbers = #tpu.dot_dimension_numbers<[1], [1], [0], [0], [0, 0, 1, 0], [], []>} : vector<32x8xbf16>, vector<32x8xbf16>, vector<32x32xf32> -> vector<32x32xf32>
    %cst_35 = arith.constant dense<0xFF800000> : vector<32xf32>
    %88 = vector.multi_reduction <maximumf>, %87, %cst_35 [1] : vector<32x32xf32> to vector<32xf32>
    %89 = vector.shape_cast %88 : vector<32xf32> to vector<32x1xf32>
    %90 = vector.broadcast %89 : vector<32x1xf32> to vector<32x32xf32>
    %91 = arith.subf %87, %90 : vector<32x32xf32>
    %92 = math.exp %91 : vector<32x32xf32>
    %cst_36 = arith.constant dense<0.000000e+00> : vector<32xf32>
    %93 = vector.multi_reduction <add>, %92, %cst_36 [1] : vector<32x32xf32> to vector<32xf32>
    %94 = vector.shape_cast %93 : vector<32xf32> to vector<32x1xf32>
    %95 = tpu.reciprocal %94 {approx = true} : vector<32x1xf32> -> vector<32x1xf32>
    %96 = vector.broadcast %95 : vector<32x1xf32> to vector<32x32xf32>
    %97 = arith.mulf %92, %96 : vector<32x32xf32>
    %98 = arith.truncf %97 : vector<32x32xf32> to vector<32x32xbf16>
    %99 = vector.extract_strided_slice %44 {offsets = [0, 16], sizes = [32, 8], strides = [1, 1]} : vector<32x32xf32> to vector<32x8xf32>
    %100 = arith.truncf %99 : vector<32x8xf32> to vector<32x8xbf16>
    %cst_37 = arith.constant dense<0.000000e+00> : vector<32x8xf32>
    %101 = tpu.matmul %98, %100, %cst_37 {dimension_numbers = #tpu.dot_dimension_numbers<[1], [0], [0], [1], [0, 0, 1, 1], [], []>} : vector<32x32xbf16>, vector<32x8xbf16>, vector<32x8xf32> -> vector<32x8xf32>
    %102 = vector.extract_strided_slice %42 {offsets = [0, 24], sizes = [32, 8], strides = [1, 1]} : vector<32x32xf32> to vector<32x8xf32>
    %103 = arith.truncf %102 : vector<32x8xf32> to vector<32x8xbf16>
    %104 = vector.extract_strided_slice %43 {offsets = [0, 24], sizes = [32, 8], strides = [1, 1]} : vector<32x32xf32> to vector<32x8xf32>
    %105 = arith.truncf %104 : vector<32x8xf32> to vector<32x8xbf16>
    %cst_38 = arith.constant dense<0.000000e+00> : vector<32x32xf32>
    %106 = tpu.matmul %103, %105, %cst_38 {dimension_numbers = #tpu.dot_dimension_numbers<[1], [1], [0], [0], [0, 0, 1, 0], [], []>} : vector<32x8xbf16>, vector<32x8xbf16>, vector<32x32xf32> -> vector<32x32xf32>
    %cst_39 = arith.constant dense<0xFF800000> : vector<32xf32>
    %107 = vector.multi_reduction <maximumf>, %106, %cst_39 [1] : vector<32x32xf32> to vector<32xf32>
    %108 = vector.shape_cast %107 : vector<32xf32> to vector<32x1xf32>
    %109 = vector.broadcast %108 : vector<32x1xf32> to vector<32x32xf32>
    %110 = arith.subf %106, %109 : vector<32x32xf32>
    %111 = math.exp %110 : vector<32x32xf32>
    %cst_40 = arith.constant dense<0.000000e+00> : vector<32xf32>
    %112 = vector.multi_reduction <add>, %111, %cst_40 [1] : vector<32x32xf32> to vector<32xf32>
    %113 = vector.shape_cast %112 : vector<32xf32> to vector<32x1xf32>
    %114 = tpu.reciprocal %113 {approx = true} : vector<32x1xf32> -> vector<32x1xf32>
    %115 = vector.broadcast %114 : vector<32x1xf32> to vector<32x32xf32>
    %116 = arith.mulf %111, %115 : vector<32x32xf32>
    %117 = arith.truncf %116 : vector<32x32xf32> to vector<32x32xbf16>
    %118 = vector.extract_strided_slice %44 {offsets = [0, 24], sizes = [32, 8], strides = [1, 1]} : vector<32x32xf32> to vector<32x8xf32>
    %119 = arith.truncf %118 : vector<32x8xf32> to vector<32x8xbf16>
    %cst_41 = arith.constant dense<0.000000e+00> : vector<32x8xf32>
    %120 = tpu.matmul %117, %119, %cst_41 {dimension_numbers = #tpu.dot_dimension_numbers<[1], [0], [0], [1], [0, 0, 1, 1], [], []>} : vector<32x32xbf16>, vector<32x8xbf16>, vector<32x8xf32> -> vector<32x8xf32>
    %121 = tpu.concatenate %63, %82, %101, %120 in 1 : vector<32x8xf32>, vector<32x8xf32>, vector<32x8xf32>, vector<32x8xf32> -> vector<32x32xf32>
    %122 = arith.truncf %121 : vector<32x32xf32> to vector<32x32xbf16>
    %cst_42 = arith.constant dense<0.000000e+00> : vector<32x32xf32>
    %123 = tpu.matmul %122, %33, %cst_42 {dimension_numbers = #tpu.dot_dimension_numbers<[1], [0], [0], [1], [0, 0, 1, 1], [], []>} : vector<32x32xbf16>, vector<32x32xbf16>, vector<32x32xf32> -> vector<32x32xf32>
    %124 = vector.broadcast %35 : vector<1x32xf32> to vector<32x32xf32>
    %125 = arith.addf %123, %124 : vector<32x32xf32>
    %126 = arith.addf %3, %125 : vector<32x32xf32>
    %c0_43 = arith.constant 0 : index
    %c0_44 = arith.constant 0 : index
    %c0_45 = arith.constant 0 : index
    %127 = vector.load %arg8[%c0_43, %c0_44, %c0_45] : memref<1x1x32xf32, #tpu.memory_space<vmem>>, vector<1x1x32xf32>
    %128 = vector.shape_cast %127 : vector<1x1x32xf32> to vector<1x32xf32>
    %c0_46 = arith.constant 0 : index
    %c0_47 = arith.constant 0 : index
    %c0_48 = arith.constant 0 : index
    %129 = vector.load %arg9[%c0_46, %c0_47, %c0_48] : memref<1x1x32xf32, #tpu.memory_space<vmem>>, vector<1x1x32xf32>
    %130 = vector.shape_cast %129 : vector<1x1x32xf32> to vector<1x32xf32>
    %cst_49 = arith.constant dense<0.000000e+00> : vector<32xf32>
    %131 = vector.multi_reduction <add>, %126, %cst_49 [1] : vector<32x32xf32> to vector<32xf32>
    %132 = vector.shape_cast %131 : vector<32xf32> to vector<32x1xf32>
    %cst_50 = arith.constant 3.200000e+01 : f32
    %133 = vector.broadcast %cst_50 : f32 to vector<32x1xf32>
    %134 = arith.divf %132, %133 : vector<32x1xf32>
    %135 = vector.broadcast %134 : vector<32x1xf32> to vector<32x32xf32>
    %136 = arith.subf %126, %135 : vector<32x32xf32>
    %137 = arith.mulf %136, %136 : vector<32x32xf32>
    %cst_51 = arith.constant dense<0.000000e+00> : vector<32xf32>
    %138 = vector.multi_reduction <add>, %137, %cst_51 [1] : vector<32x32xf32> to vector<32xf32>
    %139 = vector.shape_cast %138 : vector<32xf32> to vector<32x1xf32>
    %cst_52 = arith.constant 3.200000e+01 : f32
    %140 = vector.broadcast %cst_52 : f32 to vector<32x1xf32>
    %141 = arith.divf %139, %140 : vector<32x1xf32>
    %cst_53 = arith.constant 9.99999974E-6 : f32
    %142 = vector.broadcast %cst_53 : f32 to vector<32x1xf32>
    %143 = arith.addf %141, %142 : vector<32x1xf32>
    %144 = math.rsqrt %143 : vector<32x1xf32>
    %145 = vector.broadcast %144 : vector<32x1xf32> to vector<32x32xf32>
    %146 = arith.mulf %136, %145 : vector<32x32xf32>
    %147 = vector.broadcast %128 : vector<1x32xf32> to vector<32x32xf32>
    %148 = arith.mulf %146, %147 : vector<32x32xf32>
    %149 = vector.broadcast %130 : vector<1x32xf32> to vector<32x32xf32>
    %150 = arith.addf %148, %149 : vector<32x32xf32>
    %c0_54 = arith.constant 0 : index
    %c0_55 = arith.constant 0 : index
    %c0_56 = arith.constant 0 : index
    %151 = vector.load %arg10[%c0_54, %c0_55, %c0_56] : memref<1x32x64xbf16, #tpu.memory_space<vmem>>, vector<1x32x64xbf16>
    %152 = vector.shape_cast %151 : vector<1x32x64xbf16> to vector<32x64xbf16>
    %c0_57 = arith.constant 0 : index
    %c0_58 = arith.constant 0 : index
    %c0_59 = arith.constant 0 : index
    %153 = vector.load %arg11[%c0_57, %c0_58, %c0_59] : memref<1x1x64xf32, #tpu.memory_space<vmem>>, vector<1x1x64xf32>
    %154 = vector.shape_cast %153 : vector<1x1x64xf32> to vector<1x64xf32>
    %c0_60 = arith.constant 0 : index
    %c0_61 = arith.constant 0 : index
    %c0_62 = arith.constant 0 : index
    %155 = vector.load %arg12[%c0_60, %c0_61, %c0_62] : memref<1x64x32xbf16, #tpu.memory_space<vmem>>, vector<1x64x32xbf16>
    %156 = vector.shape_cast %155 : vector<1x64x32xbf16> to vector<64x32xbf16>
    %c0_63 = arith.constant 0 : index
    %c0_64 = arith.constant 0 : index
    %c0_65 = arith.constant 0 : index
    %157 = vector.load %arg13[%c0_63, %c0_64, %c0_65] : memref<1x1x32xf32, #tpu.memory_space<vmem>>, vector<1x1x32xf32>
    %158 = vector.shape_cast %157 : vector<1x1x32xf32> to vector<1x32xf32>
    %159 = arith.truncf %150 : vector<32x32xf32> to vector<32x32xbf16>
    %cst_66 = arith.constant dense<0.000000e+00> : vector<32x64xf32>
    %160 = tpu.matmul %159, %152, %cst_66 {dimension_numbers = #tpu.dot_dimension_numbers<[1], [0], [0], [1], [0, 0, 1, 1], [], []>} : vector<32x32xbf16>, vector<32x64xbf16>, vector<32x64xf32> -> vector<32x64xf32>
    %161 = vector.broadcast %154 : vector<1x64xf32> to vector<32x64xf32>
    %162 = arith.addf %160, %161 : vector<32x64xf32>
    %cst_67 = arith.constant 0.000000e+00 : f32
    %163 = vector.broadcast %cst_67 : f32 to vector<32x64xf32>
    %164 = arith.maximumf %162, %163 : vector<32x64xf32>
    %165 = arith.truncf %164 : vector<32x64xf32> to vector<32x64xbf16>
    %cst_68 = arith.constant dense<0.000000e+00> : vector<32x32xf32>
    %166 = tpu.matmul %165, %156, %cst_68 {dimension_numbers = #tpu.dot_dimension_numbers<[1], [0], [0], [1], [0, 0, 1, 1], [], []>} : vector<32x64xbf16>, vector<64x32xbf16>, vector<32x32xf32> -> vector<32x32xf32>
    %167 = vector.broadcast %158 : vector<1x32xf32> to vector<32x32xf32>
    %168 = arith.addf %166, %167 : vector<32x32xf32>
    %169 = arith.addf %126, %168 : vector<32x32xf32>
    %c0_69 = arith.constant 0 : index
    %c0_70 = arith.constant 0 : index
    %170 = vector.load %arg15[%c0_69, %c0_70] : memref<32x32xf32, #tpu.memory_space<vmem>>, vector<32x32xf32>
    tpu.vector_store %arg15[%c0_69, %c0_70], %169 {strides = array<i32>} : memref<32x32xf32, #tpu.memory_space<vmem>>, vector<32x32xf32>,
    %c1_i32 = arith.constant 1 : i32
    %171 = arith.cmpi eq, %arg0, %c1_i32 : i32
    %172 = arith.extui %171 : i1 to i32
    %c0_i32_71 = arith.constant 0 : i32
    %173 = arith.cmpi ne, %172, %c0_i32_71 : i32
    scf.if %173 {
      %c0_72 = arith.constant 0 : index
      %c0_73 = arith.constant 0 : index
      %174 = vector.load %arg14[%c0_72, %c0_73] : memref<32x32xf32, #tpu.memory_space<vmem>>, vector<32x32xf32>
      tpu.vector_store %arg14[%c0_72, %c0_73], %169 {strides = array<i32>} : memref<32x32xf32, #tpu.memory_space<vmem>>, vector<32x32xf32>,
    } else {
    }
    return
  }
  func.func @transform_0(%arg0: i32) -> (i32, i32) {
    %c0_i32 = arith.constant 0 : i32
    %c0_i32_0 = arith.constant 0 : i32
    %c0_i32_1 = arith.constant 0 : i32
    return %c0_i32, %c0_i32_0 : i32, i32
  }
  func.func @transform_1(%arg0: i32) -> (i32, i32, i32) {
    %c0_i32 = arith.constant 0 : i32
    %c0_i32_0 = arith.constant 0 : i32
    %c0_i32_1 = arith.constant 0 : i32
    return %arg0, %c0_i32, %c0_i32_0 : i32, i32, i32
  }
  func.func @transform_2(%arg0: i32) -> (i32, i32, i32) {
    %c0_i32 = arith.constant 0 : i32
    %c0_i32_0 = arith.constant 0 : i32
    %c0_i32_1 = arith.constant 0 : i32
    return %arg0, %c0_i32, %c0_i32_0 : i32, i32, i32
  }
  func.func @transform_3(%arg0: i32) -> (i32, i32, i32) {
    %c0_i32 = arith.constant 0 : i32
    %c0_i32_0 = arith.constant 0 : i32
    %c0_i32_1 = arith.constant 0 : i32
    return %arg0, %c0_i32, %c0_i32_0 : i32, i32, i32
  }
  func.func @transform_4(%arg0: i32) -> (i32, i32, i32) {
    %c0_i32 = arith.constant 0 : i32
    %c0_i32_0 = arith.constant 0 : i32
    %c0_i32_1 = arith.constant 0 : i32
    return %arg0, %c0_i32, %c0_i32_0 : i32, i32, i32
  }
  func.func @transform_5(%arg0: i32) -> (i32, i32, i32) {
    %c0_i32 = arith.constant 0 : i32
    %c0_i32_0 = arith.constant 0 : i32
    %c0_i32_1 = arith.constant 0 : i32
    return %arg0, %c0_i32, %c0_i32_0 : i32, i32, i32
  }
  func.func @transform_6(%arg0: i32) -> (i32, i32, i32) {
    %c0_i32 = arith.constant 0 : i32
    %c0_i32_0 = arith.constant 0 : i32
    %c0_i32_1 = arith.constant 0 : i32
    return %arg0, %c0_i32, %c0_i32_0 : i32, i32, i32
  }
  func.func @transform_7(%arg0: i32) -> (i32, i32, i32) {
    %c0_i32 = arith.constant 0 : i32
    %c0_i32_0 = arith.constant 0 : i32
    %c0_i32_1 = arith.constant 0 : i32
    return %arg0, %c0_i32, %c0_i32_0 : i32, i32, i32
  }
  func.func @transform_8(%arg0: i32) -> (i32, i32, i32) {
    %c0_i32 = arith.constant 0 : i32
    %c0_i32_0 = arith.constant 0 : i32
    %c0_i32_1 = arith.constant 0 : i32
    return %arg0, %c0_i32, %c0_i32_0 : i32, i32, i32
  }
  func.func @transform_9(%arg0: i32) -> (i32, i32, i32) {
    %c0_i32 = arith.constant 0 : i32
    %c0_i32_0 = arith.constant 0 : i32
    %c0_i32_1 = arith.constant 0 : i32
    return %arg0, %c0_i32, %c0_i32_0 : i32, i32, i32
  }
  func.func @transform_10(%arg0: i32) -> (i32, i32, i32) {
    %c0_i32 = arith.constant 0 : i32
    %c0_i32_0 = arith.constant 0 : i32
    %c0_i32_1 = arith.constant 0 : i32
    return %arg0, %c0_i32, %c0_i32_0 : i32, i32, i32
  }
  func.func @transform_11(%arg0: i32) -> (i32, i32, i32) {
    %c0_i32 = arith.constant 0 : i32
    %c0_i32_0 = arith.constant 0 : i32
    %c0_i32_1 = arith.constant 0 : i32
    return %arg0, %c0_i32, %c0_i32_0 : i32, i32, i32
  }
  func.func @transform_12(%arg0: i32) -> (i32, i32, i32) {
    %c0_i32 = arith.constant 0 : i32
    %c0_i32_0 = arith.constant 0 : i32
    %c0_i32_1 = arith.constant 0 : i32
    return %arg0, %c0_i32, %c0_i32_0 : i32, i32, i32
  }
  func.func @transform_13(%arg0: i32) -> (i32, i32) {
    %c0_i32 = arith.constant 0 : i32
    %c0_i32_0 = arith.constant 0 : i32
    %c0_i32_1 = arith.constant 0 : i32
    return %c0_i32, %c0_i32_0 : i32, i32
  }
}

module attributes {stable_mosaic.version = 11 : i64} {
  func.func @_decoder_stack_kernel(%arg0: i32, %arg1: memref<32x32xf32, #tpu.memory_space<vmem>>, %arg2: memref<32x32xf32, #tpu.memory_space<vmem>>, %arg3: memref<1x1x32xf32, #tpu.memory_space<vmem>>, %arg4: memref<1x1x32xf32, #tpu.memory_space<vmem>>, %arg5: memref<1x32x96xbf16, #tpu.memory_space<vmem>>, %arg6: memref<1x1x96xf32, #tpu.memory_space<vmem>>, %arg7: memref<1x32x32xbf16, #tpu.memory_space<vmem>>, %arg8: memref<1x1x32xf32, #tpu.memory_space<vmem>>, %arg9: memref<1x1x32xf32, #tpu.memory_space<vmem>>, %arg10: memref<1x1x32xf32, #tpu.memory_space<vmem>>, %arg11: memref<1x32x96xbf16, #tpu.memory_space<vmem>>, %arg12: memref<1x1x96xf32, #tpu.memory_space<vmem>>, %arg13: memref<1x32x32xbf16, #tpu.memory_space<vmem>>, %arg14: memref<1x1x32xf32, #tpu.memory_space<vmem>>, %arg15: memref<1x1x32xf32, #tpu.memory_space<vmem>>, %arg16: memref<1x1x32xf32, #tpu.memory_space<vmem>>, %arg17: memref<1x32x64xbf16, #tpu.memory_space<vmem>>, %arg18: memref<1x1x64xf32, #tpu.memory_space<vmem>>, %arg19: memref<1x64x32xbf16, #tpu.memory_space<vmem>>, %arg20: memref<1x1x32xf32, #tpu.memory_space<vmem>>, %arg21: memref<32x32xf32, #tpu.memory_space<vmem>>, %arg22: memref<32x32xf32, #tpu.memory_space<vmem>>) attributes {dimension_semantics = [#tpu.dimension_semantics<arbitrary>], iteration_bounds = array<i64: 2>, scalar_prefetch = 0 : i64, scratch_operands = 1 : i64, tpu.core_type = #tpu.core_type<tc>, window_params = [{pipeline_mode = #tpu.pipeline_mode<synchronous>, transform_indices = @transform_0, window_bounds = array<i64: 32, 32>}, {pipeline_mode = #tpu.pipeline_mode<synchronous>, transform_indices = @transform_1, window_bounds = array<i64: 32, 32>}, {transform_indices = @transform_2, window_bounds = array<i64: 1, 1, 32>}, {transform_indices = @transform_3, window_bounds = array<i64: 1, 1, 32>}, {transform_indices = @transform_4, window_bounds = array<i64: 1, 32, 96>}, {transform_indices = @transform_5, window_bounds = array<i64: 1, 1, 96>}, {transform_indices = @transform_6, window_bounds = array<i64: 1, 32, 32>}, {transform_indices = @transform_7, window_bounds = array<i64: 1, 1, 32>}, {transform_indices = @transform_8, window_bounds = array<i64: 1, 1, 32>}, {transform_indices = @transform_9, window_bounds = array<i64: 1, 1, 32>}, {transform_indices = @transform_10, window_bounds = array<i64: 1, 32, 96>}, {transform_indices = @transform_11, window_bounds = array<i64: 1, 1, 96>}, {transform_indices = @transform_12, window_bounds = array<i64: 1, 32, 32>}, {transform_indices = @transform_13, window_bounds = array<i64: 1, 1, 32>}, {transform_indices = @transform_14, window_bounds = array<i64: 1, 1, 32>}, {transform_indices = @transform_15, window_bounds = array<i64: 1, 1, 32>}, {transform_indices = @transform_16, window_bounds = array<i64: 1, 32, 64>}, {transform_indices = @transform_17, window_bounds = array<i64: 1, 1, 64>}, {transform_indices = @transform_18, window_bounds = array<i64: 1, 64, 32>}, {transform_indices = @transform_19, window_bounds = array<i64: 1, 1, 32>}, {pipeline_mode = #tpu.pipeline_mode<synchronous>, transform_indices = @transform_20, window_bounds = array<i64: 32, 32>}]} {
    %c0_i32 = arith.constant 0 : i32
    %0 = arith.cmpi eq, %arg0, %c0_i32 : i32
    %1 = arith.extui %0 : i1 to i32
    %c0_i32_0 = arith.constant 0 : i32
    %2 = arith.cmpi ne, %1, %c0_i32_0 : i32
    scf.if %2 {
      %c0_116 = arith.constant 0 : index
      %c0_117 = arith.constant 0 : index
      %302 = vector.load %arg1[%c0_116, %c0_117] : memref<32x32xf32, #tpu.memory_space<vmem>>, vector<32x32xf32>
      %c0_118 = arith.constant 0 : index
      %c0_119 = arith.constant 0 : index
      %303 = vector.load %arg22[%c0_118, %c0_119] : memref<32x32xf32, #tpu.memory_space<vmem>>, vector<32x32xf32>
      tpu.vector_store %arg22[%c0_118, %c0_119], %302 {strides = array<i32>} : memref<32x32xf32, #tpu.memory_space<vmem>>, vector<32x32xf32>,
    } else {
    }
    %c0 = arith.constant 0 : index
    %c0_1 = arith.constant 0 : index
    %3 = vector.load %arg22[%c0, %c0_1] : memref<32x32xf32, #tpu.memory_space<vmem>>, vector<32x32xf32>
    %c0_2 = arith.constant 0 : index
    %c0_3 = arith.constant 0 : index
    %4 = vector.load %arg2[%c0_2, %c0_3] : memref<32x32xf32, #tpu.memory_space<vmem>>, vector<32x32xf32>
    %c0_4 = arith.constant 0 : index
    %c0_5 = arith.constant 0 : index
    %c0_6 = arith.constant 0 : index
    %5 = vector.load %arg3[%c0_4, %c0_5, %c0_6] : memref<1x1x32xf32, #tpu.memory_space<vmem>>, vector<1x1x32xf32>
    %6 = vector.shape_cast %5 : vector<1x1x32xf32> to vector<1x32xf32>
    %c0_7 = arith.constant 0 : index
    %c0_8 = arith.constant 0 : index
    %c0_9 = arith.constant 0 : index
    %7 = vector.load %arg4[%c0_7, %c0_8, %c0_9] : memref<1x1x32xf32, #tpu.memory_space<vmem>>, vector<1x1x32xf32>
    %8 = vector.shape_cast %7 : vector<1x1x32xf32> to vector<1x32xf32>
    %cst = arith.constant dense<0.000000e+00> : vector<32xf32>
    %9 = vector.multi_reduction <add>, %3, %cst [1] : vector<32x32xf32> to vector<32xf32>
    %10 = vector.shape_cast %9 : vector<32xf32> to vector<32x1xf32>
    %cst_10 = arith.constant 3.200000e+01 : f32
    %11 = vector.broadcast %cst_10 : f32 to vector<32x1xf32>
    %12 = arith.divf %10, %11 : vector<32x1xf32>
    %13 = vector.broadcast %12 : vector<32x1xf32> to vector<32x32xf32>
    %14 = arith.subf %3, %13 : vector<32x32xf32>
    %15 = arith.mulf %14, %14 : vector<32x32xf32>
    %cst_11 = arith.constant dense<0.000000e+00> : vector<32xf32>
    %16 = vector.multi_reduction <add>, %15, %cst_11 [1] : vector<32x32xf32> to vector<32xf32>
    %17 = vector.shape_cast %16 : vector<32xf32> to vector<32x1xf32>
    %cst_12 = arith.constant 3.200000e+01 : f32
    %18 = vector.broadcast %cst_12 : f32 to vector<32x1xf32>
    %19 = arith.divf %17, %18 : vector<32x1xf32>
    %cst_13 = arith.constant 9.99999974E-6 : f32
    %20 = vector.broadcast %cst_13 : f32 to vector<32x1xf32>
    %21 = arith.addf %19, %20 : vector<32x1xf32>
    %22 = math.rsqrt %21 : vector<32x1xf32>
    %23 = vector.broadcast %22 : vector<32x1xf32> to vector<32x32xf32>
    %24 = arith.mulf %14, %23 : vector<32x32xf32>
    %25 = vector.broadcast %6 : vector<1x32xf32> to vector<32x32xf32>
    %26 = arith.mulf %24, %25 : vector<32x32xf32>
    %27 = vector.broadcast %8 : vector<1x32xf32> to vector<32x32xf32>
    %28 = arith.addf %26, %27 : vector<32x32xf32>
    %c0_14 = arith.constant 0 : index
    %c0_15 = arith.constant 0 : index
    %c0_16 = arith.constant 0 : index
    %29 = vector.load %arg5[%c0_14, %c0_15, %c0_16] : memref<1x32x96xbf16, #tpu.memory_space<vmem>>, vector<1x32x96xbf16>
    %30 = vector.shape_cast %29 : vector<1x32x96xbf16> to vector<32x96xbf16>
    %c0_17 = arith.constant 0 : index
    %c0_18 = arith.constant 0 : index
    %c0_19 = arith.constant 0 : index
    %31 = vector.load %arg6[%c0_17, %c0_18, %c0_19] : memref<1x1x96xf32, #tpu.memory_space<vmem>>, vector<1x1x96xf32>
    %32 = vector.shape_cast %31 : vector<1x1x96xf32> to vector<1x96xf32>
    %c0_20 = arith.constant 0 : index
    %c0_21 = arith.constant 0 : index
    %c0_22 = arith.constant 0 : index
    %33 = vector.load %arg7[%c0_20, %c0_21, %c0_22] : memref<1x32x32xbf16, #tpu.memory_space<vmem>>, vector<1x32x32xbf16>
    %34 = vector.shape_cast %33 : vector<1x32x32xbf16> to vector<32x32xbf16>
    %c0_23 = arith.constant 0 : index
    %c0_24 = arith.constant 0 : index
    %c0_25 = arith.constant 0 : index
    %35 = vector.load %arg8[%c0_23, %c0_24, %c0_25] : memref<1x1x32xf32, #tpu.memory_space<vmem>>, vector<1x1x32xf32>
    %36 = vector.shape_cast %35 : vector<1x1x32xf32> to vector<1x32xf32>
    %37 = arith.truncf %28 : vector<32x32xf32> to vector<32x32xbf16>
    %cst_26 = arith.constant dense<0.000000e+00> : vector<32x96xf32>
    %38 = tpu.matmul %37, %30, %cst_26 {dimension_numbers = #tpu.dot_dimension_numbers<[1], [0], [0], [1], [0, 0, 1, 1], [], []>} : vector<32x32xbf16>, vector<32x96xbf16>, vector<32x96xf32> -> vector<32x96xf32>
    %39 = vector.broadcast %32 : vector<1x96xf32> to vector<32x96xf32>
    %40 = arith.addf %38, %39 : vector<32x96xf32>
    %41 = vector.extract_strided_slice %40 {offsets = [0, 0], sizes = [32, 32], strides = [1, 1]} : vector<32x96xf32> to vector<32x32xf32>
    %cst_27 = arith.constant 0.353553385 : f32
    %42 = vector.broadcast %cst_27 : f32 to vector<32x32xf32>
    %43 = arith.mulf %41, %42 : vector<32x32xf32>
    %44 = vector.extract_strided_slice %40 {offsets = [0, 32], sizes = [32, 32], strides = [1, 1]} : vector<32x96xf32> to vector<32x32xf32>
    %45 = vector.extract_strided_slice %40 {offsets = [0, 64], sizes = [32, 32], strides = [1, 1]} : vector<32x96xf32> to vector<32x32xf32>
    %46 = vector.extract_strided_slice %43 {offsets = [0, 0], sizes = [32, 8], strides = [1, 1]} : vector<32x32xf32> to vector<32x8xf32>
    %47 = arith.truncf %46 : vector<32x8xf32> to vector<32x8xbf16>
    %48 = vector.extract_strided_slice %44 {offsets = [0, 0], sizes = [32, 8], strides = [1, 1]} : vector<32x32xf32> to vector<32x8xf32>
    %49 = arith.truncf %48 : vector<32x8xf32> to vector<32x8xbf16>
    %cst_28 = arith.constant dense<0.000000e+00> : vector<32x32xf32>
    %50 = tpu.matmul %47, %49, %cst_28 {dimension_numbers = #tpu.dot_dimension_numbers<[1], [1], [0], [0], [0, 0, 1, 0], [], []>} : vector<32x8xbf16>, vector<32x8xbf16>, vector<32x32xf32> -> vector<32x32xf32>
    %cst_29 = arith.constant dense<0xFF800000> : vector<32xf32>
    %51 = vector.multi_reduction <maximumf>, %50, %cst_29 [1] : vector<32x32xf32> to vector<32xf32>
    %52 = vector.shape_cast %51 : vector<32xf32> to vector<32x1xf32>
    %53 = vector.broadcast %52 : vector<32x1xf32> to vector<32x32xf32>
    %54 = arith.subf %50, %53 : vector<32x32xf32>
    %55 = math.exp %54 : vector<32x32xf32>
    %cst_30 = arith.constant dense<0.000000e+00> : vector<32xf32>
    %56 = vector.multi_reduction <add>, %55, %cst_30 [1] : vector<32x32xf32> to vector<32xf32>
    %57 = vector.shape_cast %56 : vector<32xf32> to vector<32x1xf32>
    %58 = tpu.reciprocal %57 {approx = true} : vector<32x1xf32> -> vector<32x1xf32>
    %59 = vector.broadcast %58 : vector<32x1xf32> to vector<32x32xf32>
    %60 = arith.mulf %55, %59 : vector<32x32xf32>
    %61 = arith.truncf %60 : vector<32x32xf32> to vector<32x32xbf16>
    %62 = vector.extract_strided_slice %45 {offsets = [0, 0], sizes = [32, 8], strides = [1, 1]} : vector<32x32xf32> to vector<32x8xf32>
    %63 = arith.truncf %62 : vector<32x8xf32> to vector<32x8xbf16>
    %cst_31 = arith.constant dense<0.000000e+00> : vector<32x8xf32>
    %64 = tpu.matmul %61, %63, %cst_31 {dimension_numbers = #tpu.dot_dimension_numbers<[1], [0], [0], [1], [0, 0, 1, 1], [], []>} : vector<32x32xbf16>, vector<32x8xbf16>, vector<32x8xf32> -> vector<32x8xf32>
    %65 = vector.extract_strided_slice %43 {offsets = [0, 8], sizes = [32, 8], strides = [1, 1]} : vector<32x32xf32> to vector<32x8xf32>
    %66 = arith.truncf %65 : vector<32x8xf32> to vector<32x8xbf16>
    %67 = vector.extract_strided_slice %44 {offsets = [0, 8], sizes = [32, 8], strides = [1, 1]} : vector<32x32xf32> to vector<32x8xf32>
    %68 = arith.truncf %67 : vector<32x8xf32> to vector<32x8xbf16>
    %cst_32 = arith.constant dense<0.000000e+00> : vector<32x32xf32>
    %69 = tpu.matmul %66, %68, %cst_32 {dimension_numbers = #tpu.dot_dimension_numbers<[1], [1], [0], [0], [0, 0, 1, 0], [], []>} : vector<32x8xbf16>, vector<32x8xbf16>, vector<32x32xf32> -> vector<32x32xf32>
    %cst_33 = arith.constant dense<0xFF800000> : vector<32xf32>
    %70 = vector.multi_reduction <maximumf>, %69, %cst_33 [1] : vector<32x32xf32> to vector<32xf32>
    %71 = vector.shape_cast %70 : vector<32xf32> to vector<32x1xf32>
    %72 = vector.broadcast %71 : vector<32x1xf32> to vector<32x32xf32>
    %73 = arith.subf %69, %72 : vector<32x32xf32>
    %74 = math.exp %73 : vector<32x32xf32>
    %cst_34 = arith.constant dense<0.000000e+00> : vector<32xf32>
    %75 = vector.multi_reduction <add>, %74, %cst_34 [1] : vector<32x32xf32> to vector<32xf32>
    %76 = vector.shape_cast %75 : vector<32xf32> to vector<32x1xf32>
    %77 = tpu.reciprocal %76 {approx = true} : vector<32x1xf32> -> vector<32x1xf32>
    %78 = vector.broadcast %77 : vector<32x1xf32> to vector<32x32xf32>
    %79 = arith.mulf %74, %78 : vector<32x32xf32>
    %80 = arith.truncf %79 : vector<32x32xf32> to vector<32x32xbf16>
    %81 = vector.extract_strided_slice %45 {offsets = [0, 8], sizes = [32, 8], strides = [1, 1]} : vector<32x32xf32> to vector<32x8xf32>
    %82 = arith.truncf %81 : vector<32x8xf32> to vector<32x8xbf16>
    %cst_35 = arith.constant dense<0.000000e+00> : vector<32x8xf32>
    %83 = tpu.matmul %80, %82, %cst_35 {dimension_numbers = #tpu.dot_dimension_numbers<[1], [0], [0], [1], [0, 0, 1, 1], [], []>} : vector<32x32xbf16>, vector<32x8xbf16>, vector<32x8xf32> -> vector<32x8xf32>
    %84 = vector.extract_strided_slice %43 {offsets = [0, 16], sizes = [32, 8], strides = [1, 1]} : vector<32x32xf32> to vector<32x8xf32>
    %85 = arith.truncf %84 : vector<32x8xf32> to vector<32x8xbf16>
    %86 = vector.extract_strided_slice %44 {offsets = [0, 16], sizes = [32, 8], strides = [1, 1]} : vector<32x32xf32> to vector<32x8xf32>
    %87 = arith.truncf %86 : vector<32x8xf32> to vector<32x8xbf16>
    %cst_36 = arith.constant dense<0.000000e+00> : vector<32x32xf32>
    %88 = tpu.matmul %85, %87, %cst_36 {dimension_numbers = #tpu.dot_dimension_numbers<[1], [1], [0], [0], [0, 0, 1, 0], [], []>} : vector<32x8xbf16>, vector<32x8xbf16>, vector<32x32xf32> -> vector<32x32xf32>
    %cst_37 = arith.constant dense<0xFF800000> : vector<32xf32>
    %89 = vector.multi_reduction <maximumf>, %88, %cst_37 [1] : vector<32x32xf32> to vector<32xf32>
    %90 = vector.shape_cast %89 : vector<32xf32> to vector<32x1xf32>
    %91 = vector.broadcast %90 : vector<32x1xf32> to vector<32x32xf32>
    %92 = arith.subf %88, %91 : vector<32x32xf32>
    %93 = math.exp %92 : vector<32x32xf32>
    %cst_38 = arith.constant dense<0.000000e+00> : vector<32xf32>
    %94 = vector.multi_reduction <add>, %93, %cst_38 [1] : vector<32x32xf32> to vector<32xf32>
    %95 = vector.shape_cast %94 : vector<32xf32> to vector<32x1xf32>
    %96 = tpu.reciprocal %95 {approx = true} : vector<32x1xf32> -> vector<32x1xf32>
    %97 = vector.broadcast %96 : vector<32x1xf32> to vector<32x32xf32>
    %98 = arith.mulf %93, %97 : vector<32x32xf32>
    %99 = arith.truncf %98 : vector<32x32xf32> to vector<32x32xbf16>
    %100 = vector.extract_strided_slice %45 {offsets = [0, 16], sizes = [32, 8], strides = [1, 1]} : vector<32x32xf32> to vector<32x8xf32>
    %101 = arith.truncf %100 : vector<32x8xf32> to vector<32x8xbf16>
    %cst_39 = arith.constant dense<0.000000e+00> : vector<32x8xf32>
    %102 = tpu.matmul %99, %101, %cst_39 {dimension_numbers = #tpu.dot_dimension_numbers<[1], [0], [0], [1], [0, 0, 1, 1], [], []>} : vector<32x32xbf16>, vector<32x8xbf16>, vector<32x8xf32> -> vector<32x8xf32>
    %103 = vector.extract_strided_slice %43 {offsets = [0, 24], sizes = [32, 8], strides = [1, 1]} : vector<32x32xf32> to vector<32x8xf32>
    %104 = arith.truncf %103 : vector<32x8xf32> to vector<32x8xbf16>
    %105 = vector.extract_strided_slice %44 {offsets = [0, 24], sizes = [32, 8], strides = [1, 1]} : vector<32x32xf32> to vector<32x8xf32>
    %106 = arith.truncf %105 : vector<32x8xf32> to vector<32x8xbf16>
    %cst_40 = arith.constant dense<0.000000e+00> : vector<32x32xf32>
    %107 = tpu.matmul %104, %106, %cst_40 {dimension_numbers = #tpu.dot_dimension_numbers<[1], [1], [0], [0], [0, 0, 1, 0], [], []>} : vector<32x8xbf16>, vector<32x8xbf16>, vector<32x32xf32> -> vector<32x32xf32>
    %cst_41 = arith.constant dense<0xFF800000> : vector<32xf32>
    %108 = vector.multi_reduction <maximumf>, %107, %cst_41 [1] : vector<32x32xf32> to vector<32xf32>
    %109 = vector.shape_cast %108 : vector<32xf32> to vector<32x1xf32>
    %110 = vector.broadcast %109 : vector<32x1xf32> to vector<32x32xf32>
    %111 = arith.subf %107, %110 : vector<32x32xf32>
    %112 = math.exp %111 : vector<32x32xf32>
    %cst_42 = arith.constant dense<0.000000e+00> : vector<32xf32>
    %113 = vector.multi_reduction <add>, %112, %cst_42 [1] : vector<32x32xf32> to vector<32xf32>
    %114 = vector.shape_cast %113 : vector<32xf32> to vector<32x1xf32>
    %115 = tpu.reciprocal %114 {approx = true} : vector<32x1xf32> -> vector<32x1xf32>
    %116 = vector.broadcast %115 : vector<32x1xf32> to vector<32x32xf32>
    %117 = arith.mulf %112, %116 : vector<32x32xf32>
    %118 = arith.truncf %117 : vector<32x32xf32> to vector<32x32xbf16>
    %119 = vector.extract_strided_slice %45 {offsets = [0, 24], sizes = [32, 8], strides = [1, 1]} : vector<32x32xf32> to vector<32x8xf32>
    %120 = arith.truncf %119 : vector<32x8xf32> to vector<32x8xbf16>
    %cst_43 = arith.constant dense<0.000000e+00> : vector<32x8xf32>
    %121 = tpu.matmul %118, %120, %cst_43 {dimension_numbers = #tpu.dot_dimension_numbers<[1], [0], [0], [1], [0, 0, 1, 1], [], []>} : vector<32x32xbf16>, vector<32x8xbf16>, vector<32x8xf32> -> vector<32x8xf32>
    %122 = tpu.concatenate %64, %83, %102, %121 in 1 : vector<32x8xf32>, vector<32x8xf32>, vector<32x8xf32>, vector<32x8xf32> -> vector<32x32xf32>
    %123 = arith.truncf %122 : vector<32x32xf32> to vector<32x32xbf16>
    %cst_44 = arith.constant dense<0.000000e+00> : vector<32x32xf32>
    %124 = tpu.matmul %123, %34, %cst_44 {dimension_numbers = #tpu.dot_dimension_numbers<[1], [0], [0], [1], [0, 0, 1, 1], [], []>} : vector<32x32xbf16>, vector<32x32xbf16>, vector<32x32xf32> -> vector<32x32xf32>
    %125 = vector.broadcast %36 : vector<1x32xf32> to vector<32x32xf32>
    %126 = arith.addf %124, %125 : vector<32x32xf32>
    %127 = arith.addf %3, %126 : vector<32x32xf32>
    %c0_45 = arith.constant 0 : index
    %c0_46 = arith.constant 0 : index
    %c0_47 = arith.constant 0 : index
    %128 = vector.load %arg9[%c0_45, %c0_46, %c0_47] : memref<1x1x32xf32, #tpu.memory_space<vmem>>, vector<1x1x32xf32>
    %129 = vector.shape_cast %128 : vector<1x1x32xf32> to vector<1x32xf32>
    %c0_48 = arith.constant 0 : index
    %c0_49 = arith.constant 0 : index
    %c0_50 = arith.constant 0 : index
    %130 = vector.load %arg10[%c0_48, %c0_49, %c0_50] : memref<1x1x32xf32, #tpu.memory_space<vmem>>, vector<1x1x32xf32>
    %131 = vector.shape_cast %130 : vector<1x1x32xf32> to vector<1x32xf32>
    %cst_51 = arith.constant dense<0.000000e+00> : vector<32xf32>
    %132 = vector.multi_reduction <add>, %127, %cst_51 [1] : vector<32x32xf32> to vector<32xf32>
    %133 = vector.shape_cast %132 : vector<32xf32> to vector<32x1xf32>
    %cst_52 = arith.constant 3.200000e+01 : f32
    %134 = vector.broadcast %cst_52 : f32 to vector<32x1xf32>
    %135 = arith.divf %133, %134 : vector<32x1xf32>
    %136 = vector.broadcast %135 : vector<32x1xf32> to vector<32x32xf32>
    %137 = arith.subf %127, %136 : vector<32x32xf32>
    %138 = arith.mulf %137, %137 : vector<32x32xf32>
    %cst_53 = arith.constant dense<0.000000e+00> : vector<32xf32>
    %139 = vector.multi_reduction <add>, %138, %cst_53 [1] : vector<32x32xf32> to vector<32xf32>
    %140 = vector.shape_cast %139 : vector<32xf32> to vector<32x1xf32>
    %cst_54 = arith.constant 3.200000e+01 : f32
    %141 = vector.broadcast %cst_54 : f32 to vector<32x1xf32>
    %142 = arith.divf %140, %141 : vector<32x1xf32>
    %cst_55 = arith.constant 9.99999974E-6 : f32
    %143 = vector.broadcast %cst_55 : f32 to vector<32x1xf32>
    %144 = arith.addf %142, %143 : vector<32x1xf32>
    %145 = math.rsqrt %144 : vector<32x1xf32>
    %146 = vector.broadcast %145 : vector<32x1xf32> to vector<32x32xf32>
    %147 = arith.mulf %137, %146 : vector<32x32xf32>
    %148 = vector.broadcast %129 : vector<1x32xf32> to vector<32x32xf32>
    %149 = arith.mulf %147, %148 : vector<32x32xf32>
    %150 = vector.broadcast %131 : vector<1x32xf32> to vector<32x32xf32>
    %151 = arith.addf %149, %150 : vector<32x32xf32>
    %c0_56 = arith.constant 0 : index
    %c0_57 = arith.constant 0 : index
    %c0_58 = arith.constant 0 : index
    %152 = vector.load %arg11[%c0_56, %c0_57, %c0_58] : memref<1x32x96xbf16, #tpu.memory_space<vmem>>, vector<1x32x96xbf16>
    %153 = vector.shape_cast %152 : vector<1x32x96xbf16> to vector<32x96xbf16>
    %c0_59 = arith.constant 0 : index
    %c0_60 = arith.constant 0 : index
    %c0_61 = arith.constant 0 : index
    %154 = vector.load %arg12[%c0_59, %c0_60, %c0_61] : memref<1x1x96xf32, #tpu.memory_space<vmem>>, vector<1x1x96xf32>
    %155 = vector.shape_cast %154 : vector<1x1x96xf32> to vector<1x96xf32>
    %c0_62 = arith.constant 0 : index
    %c0_63 = arith.constant 0 : index
    %c0_64 = arith.constant 0 : index
    %156 = vector.load %arg13[%c0_62, %c0_63, %c0_64] : memref<1x32x32xbf16, #tpu.memory_space<vmem>>, vector<1x32x32xbf16>
    %157 = vector.shape_cast %156 : vector<1x32x32xbf16> to vector<32x32xbf16>
    %c0_65 = arith.constant 0 : index
    %c0_66 = arith.constant 0 : index
    %c0_67 = arith.constant 0 : index
    %158 = vector.load %arg14[%c0_65, %c0_66, %c0_67] : memref<1x1x32xf32, #tpu.memory_space<vmem>>, vector<1x1x32xf32>
    %159 = vector.shape_cast %158 : vector<1x1x32xf32> to vector<1x32xf32>
    %160 = arith.truncf %151 : vector<32x32xf32> to vector<32x32xbf16>
    %cst_68 = arith.constant dense<0.000000e+00> : vector<32x96xf32>
    %161 = tpu.matmul %160, %153, %cst_68 {dimension_numbers = #tpu.dot_dimension_numbers<[1], [0], [0], [1], [0, 0, 1, 1], [], []>} : vector<32x32xbf16>, vector<32x96xbf16>, vector<32x96xf32> -> vector<32x96xf32>
    %162 = vector.broadcast %155 : vector<1x96xf32> to vector<32x96xf32>
    %163 = arith.addf %161, %162 : vector<32x96xf32>
    %164 = vector.extract_strided_slice %163 {offsets = [0, 0], sizes = [32, 32], strides = [1, 1]} : vector<32x96xf32> to vector<32x32xf32>
    %cst_69 = arith.constant 0.353553385 : f32
    %165 = vector.broadcast %cst_69 : f32 to vector<32x32xf32>
    %166 = arith.mulf %164, %165 : vector<32x32xf32>
    %167 = vector.extract_strided_slice %163 {offsets = [0, 32], sizes = [32, 32], strides = [1, 1]} : vector<32x96xf32> to vector<32x32xf32>
    %168 = vector.extract_strided_slice %163 {offsets = [0, 64], sizes = [32, 32], strides = [1, 1]} : vector<32x96xf32> to vector<32x32xf32>
    %169 = vector.extract_strided_slice %166 {offsets = [0, 0], sizes = [32, 8], strides = [1, 1]} : vector<32x32xf32> to vector<32x8xf32>
    %170 = arith.truncf %169 : vector<32x8xf32> to vector<32x8xbf16>
    %171 = vector.extract_strided_slice %167 {offsets = [0, 0], sizes = [32, 8], strides = [1, 1]} : vector<32x32xf32> to vector<32x8xf32>
    %172 = arith.truncf %171 : vector<32x8xf32> to vector<32x8xbf16>
    %cst_70 = arith.constant dense<0.000000e+00> : vector<32x32xf32>
    %173 = tpu.matmul %170, %172, %cst_70 {dimension_numbers = #tpu.dot_dimension_numbers<[1], [1], [0], [0], [0, 0, 1, 0], [], []>} : vector<32x8xbf16>, vector<32x8xbf16>, vector<32x32xf32> -> vector<32x32xf32>
    %174 = arith.addf %173, %4 : vector<32x32xf32>
    %cst_71 = arith.constant dense<0xFF800000> : vector<32xf32>
    %175 = vector.multi_reduction <maximumf>, %174, %cst_71 [1] : vector<32x32xf32> to vector<32xf32>
    %176 = vector.shape_cast %175 : vector<32xf32> to vector<32x1xf32>
    %177 = vector.broadcast %176 : vector<32x1xf32> to vector<32x32xf32>
    %178 = arith.subf %174, %177 : vector<32x32xf32>
    %179 = math.exp %178 : vector<32x32xf32>
    %cst_72 = arith.constant dense<0.000000e+00> : vector<32xf32>
    %180 = vector.multi_reduction <add>, %179, %cst_72 [1] : vector<32x32xf32> to vector<32xf32>
    %181 = vector.shape_cast %180 : vector<32xf32> to vector<32x1xf32>
    %182 = tpu.reciprocal %181 {approx = true} : vector<32x1xf32> -> vector<32x1xf32>
    %183 = vector.broadcast %182 : vector<32x1xf32> to vector<32x32xf32>
    %184 = arith.mulf %179, %183 : vector<32x32xf32>
    %185 = arith.truncf %184 : vector<32x32xf32> to vector<32x32xbf16>
    %186 = vector.extract_strided_slice %168 {offsets = [0, 0], sizes = [32, 8], strides = [1, 1]} : vector<32x32xf32> to vector<32x8xf32>
    %187 = arith.truncf %186 : vector<32x8xf32> to vector<32x8xbf16>
    %cst_73 = arith.constant dense<0.000000e+00> : vector<32x8xf32>
    %188 = tpu.matmul %185, %187, %cst_73 {dimension_numbers = #tpu.dot_dimension_numbers<[1], [0], [0], [1], [0, 0, 1, 1], [], []>} : vector<32x32xbf16>, vector<32x8xbf16>, vector<32x8xf32> -> vector<32x8xf32>
    %189 = vector.extract_strided_slice %166 {offsets = [0, 8], sizes = [32, 8], strides = [1, 1]} : vector<32x32xf32> to vector<32x8xf32>
    %190 = arith.truncf %189 : vector<32x8xf32> to vector<32x8xbf16>
    %191 = vector.extract_strided_slice %167 {offsets = [0, 8], sizes = [32, 8], strides = [1, 1]} : vector<32x32xf32> to vector<32x8xf32>
    %192 = arith.truncf %191 : vector<32x8xf32> to vector<32x8xbf16>
    %cst_74 = arith.constant dense<0.000000e+00> : vector<32x32xf32>
    %193 = tpu.matmul %190, %192, %cst_74 {dimension_numbers = #tpu.dot_dimension_numbers<[1], [1], [0], [0], [0, 0, 1, 0], [], []>} : vector<32x8xbf16>, vector<32x8xbf16>, vector<32x32xf32> -> vector<32x32xf32>
    %194 = arith.addf %193, %4 : vector<32x32xf32>
    %cst_75 = arith.constant dense<0xFF800000> : vector<32xf32>
    %195 = vector.multi_reduction <maximumf>, %194, %cst_75 [1] : vector<32x32xf32> to vector<32xf32>
    %196 = vector.shape_cast %195 : vector<32xf32> to vector<32x1xf32>
    %197 = vector.broadcast %196 : vector<32x1xf32> to vector<32x32xf32>
    %198 = arith.subf %194, %197 : vector<32x32xf32>
    %199 = math.exp %198 : vector<32x32xf32>
    %cst_76 = arith.constant dense<0.000000e+00> : vector<32xf32>
    %200 = vector.multi_reduction <add>, %199, %cst_76 [1] : vector<32x32xf32> to vector<32xf32>
    %201 = vector.shape_cast %200 : vector<32xf32> to vector<32x1xf32>
    %202 = tpu.reciprocal %201 {approx = true} : vector<32x1xf32> -> vector<32x1xf32>
    %203 = vector.broadcast %202 : vector<32x1xf32> to vector<32x32xf32>
    %204 = arith.mulf %199, %203 : vector<32x32xf32>
    %205 = arith.truncf %204 : vector<32x32xf32> to vector<32x32xbf16>
    %206 = vector.extract_strided_slice %168 {offsets = [0, 8], sizes = [32, 8], strides = [1, 1]} : vector<32x32xf32> to vector<32x8xf32>
    %207 = arith.truncf %206 : vector<32x8xf32> to vector<32x8xbf16>
    %cst_77 = arith.constant dense<0.000000e+00> : vector<32x8xf32>
    %208 = tpu.matmul %205, %207, %cst_77 {dimension_numbers = #tpu.dot_dimension_numbers<[1], [0], [0], [1], [0, 0, 1, 1], [], []>} : vector<32x32xbf16>, vector<32x8xbf16>, vector<32x8xf32> -> vector<32x8xf32>
    %209 = vector.extract_strided_slice %166 {offsets = [0, 16], sizes = [32, 8], strides = [1, 1]} : vector<32x32xf32> to vector<32x8xf32>
    %210 = arith.truncf %209 : vector<32x8xf32> to vector<32x8xbf16>
    %211 = vector.extract_strided_slice %167 {offsets = [0, 16], sizes = [32, 8], strides = [1, 1]} : vector<32x32xf32> to vector<32x8xf32>
    %212 = arith.truncf %211 : vector<32x8xf32> to vector<32x8xbf16>
    %cst_78 = arith.constant dense<0.000000e+00> : vector<32x32xf32>
    %213 = tpu.matmul %210, %212, %cst_78 {dimension_numbers = #tpu.dot_dimension_numbers<[1], [1], [0], [0], [0, 0, 1, 0], [], []>} : vector<32x8xbf16>, vector<32x8xbf16>, vector<32x32xf32> -> vector<32x32xf32>
    %214 = arith.addf %213, %4 : vector<32x32xf32>
    %cst_79 = arith.constant dense<0xFF800000> : vector<32xf32>
    %215 = vector.multi_reduction <maximumf>, %214, %cst_79 [1] : vector<32x32xf32> to vector<32xf32>
    %216 = vector.shape_cast %215 : vector<32xf32> to vector<32x1xf32>
    %217 = vector.broadcast %216 : vector<32x1xf32> to vector<32x32xf32>
    %218 = arith.subf %214, %217 : vector<32x32xf32>
    %219 = math.exp %218 : vector<32x32xf32>
    %cst_80 = arith.constant dense<0.000000e+00> : vector<32xf32>
    %220 = vector.multi_reduction <add>, %219, %cst_80 [1] : vector<32x32xf32> to vector<32xf32>
    %221 = vector.shape_cast %220 : vector<32xf32> to vector<32x1xf32>
    %222 = tpu.reciprocal %221 {approx = true} : vector<32x1xf32> -> vector<32x1xf32>
    %223 = vector.broadcast %222 : vector<32x1xf32> to vector<32x32xf32>
    %224 = arith.mulf %219, %223 : vector<32x32xf32>
    %225 = arith.truncf %224 : vector<32x32xf32> to vector<32x32xbf16>
    %226 = vector.extract_strided_slice %168 {offsets = [0, 16], sizes = [32, 8], strides = [1, 1]} : vector<32x32xf32> to vector<32x8xf32>
    %227 = arith.truncf %226 : vector<32x8xf32> to vector<32x8xbf16>
    %cst_81 = arith.constant dense<0.000000e+00> : vector<32x8xf32>
    %228 = tpu.matmul %225, %227, %cst_81 {dimension_numbers = #tpu.dot_dimension_numbers<[1], [0], [0], [1], [0, 0, 1, 1], [], []>} : vector<32x32xbf16>, vector<32x8xbf16>, vector<32x8xf32> -> vector<32x8xf32>
    %229 = vector.extract_strided_slice %166 {offsets = [0, 24], sizes = [32, 8], strides = [1, 1]} : vector<32x32xf32> to vector<32x8xf32>
    %230 = arith.truncf %229 : vector<32x8xf32> to vector<32x8xbf16>
    %231 = vector.extract_strided_slice %167 {offsets = [0, 24], sizes = [32, 8], strides = [1, 1]} : vector<32x32xf32> to vector<32x8xf32>
    %232 = arith.truncf %231 : vector<32x8xf32> to vector<32x8xbf16>
    %cst_82 = arith.constant dense<0.000000e+00> : vector<32x32xf32>
    %233 = tpu.matmul %230, %232, %cst_82 {dimension_numbers = #tpu.dot_dimension_numbers<[1], [1], [0], [0], [0, 0, 1, 0], [], []>} : vector<32x8xbf16>, vector<32x8xbf16>, vector<32x32xf32> -> vector<32x32xf32>
    %234 = arith.addf %233, %4 : vector<32x32xf32>
    %cst_83 = arith.constant dense<0xFF800000> : vector<32xf32>
    %235 = vector.multi_reduction <maximumf>, %234, %cst_83 [1] : vector<32x32xf32> to vector<32xf32>
    %236 = vector.shape_cast %235 : vector<32xf32> to vector<32x1xf32>
    %237 = vector.broadcast %236 : vector<32x1xf32> to vector<32x32xf32>
    %238 = arith.subf %234, %237 : vector<32x32xf32>
    %239 = math.exp %238 : vector<32x32xf32>
    %cst_84 = arith.constant dense<0.000000e+00> : vector<32xf32>
    %240 = vector.multi_reduction <add>, %239, %cst_84 [1] : vector<32x32xf32> to vector<32xf32>
    %241 = vector.shape_cast %240 : vector<32xf32> to vector<32x1xf32>
    %242 = tpu.reciprocal %241 {approx = true} : vector<32x1xf32> -> vector<32x1xf32>
    %243 = vector.broadcast %242 : vector<32x1xf32> to vector<32x32xf32>
    %244 = arith.mulf %239, %243 : vector<32x32xf32>
    %245 = arith.truncf %244 : vector<32x32xf32> to vector<32x32xbf16>
    %246 = vector.extract_strided_slice %168 {offsets = [0, 24], sizes = [32, 8], strides = [1, 1]} : vector<32x32xf32> to vector<32x8xf32>
    %247 = arith.truncf %246 : vector<32x8xf32> to vector<32x8xbf16>
    %cst_85 = arith.constant dense<0.000000e+00> : vector<32x8xf32>
    %248 = tpu.matmul %245, %247, %cst_85 {dimension_numbers = #tpu.dot_dimension_numbers<[1], [0], [0], [1], [0, 0, 1, 1], [], []>} : vector<32x32xbf16>, vector<32x8xbf16>, vector<32x8xf32> -> vector<32x8xf32>
    %249 = tpu.concatenate %188, %208, %228, %248 in 1 : vector<32x8xf32>, vector<32x8xf32>, vector<32x8xf32>, vector<32x8xf32> -> vector<32x32xf32>
    %250 = arith.truncf %249 : vector<32x32xf32> to vector<32x32xbf16>
    %cst_86 = arith.constant dense<0.000000e+00> : vector<32x32xf32>
    %251 = tpu.matmul %250, %157, %cst_86 {dimension_numbers = #tpu.dot_dimension_numbers<[1], [0], [0], [1], [0, 0, 1, 1], [], []>} : vector<32x32xbf16>, vector<32x32xbf16>, vector<32x32xf32> -> vector<32x32xf32>
    %252 = vector.broadcast %159 : vector<1x32xf32> to vector<32x32xf32>
    %253 = arith.addf %251, %252 : vector<32x32xf32>
    %254 = arith.addf %127, %253 : vector<32x32xf32>
    %c0_87 = arith.constant 0 : index
    %c0_88 = arith.constant 0 : index
    %c0_89 = arith.constant 0 : index
    %255 = vector.load %arg15[%c0_87, %c0_88, %c0_89] : memref<1x1x32xf32, #tpu.memory_space<vmem>>, vector<1x1x32xf32>
    %256 = vector.shape_cast %255 : vector<1x1x32xf32> to vector<1x32xf32>
    %c0_90 = arith.constant 0 : index
    %c0_91 = arith.constant 0 : index
    %c0_92 = arith.constant 0 : index
    %257 = vector.load %arg16[%c0_90, %c0_91, %c0_92] : memref<1x1x32xf32, #tpu.memory_space<vmem>>, vector<1x1x32xf32>
    %258 = vector.shape_cast %257 : vector<1x1x32xf32> to vector<1x32xf32>
    %cst_93 = arith.constant dense<0.000000e+00> : vector<32xf32>
    %259 = vector.multi_reduction <add>, %254, %cst_93 [1] : vector<32x32xf32> to vector<32xf32>
    %260 = vector.shape_cast %259 : vector<32xf32> to vector<32x1xf32>
    %cst_94 = arith.constant 3.200000e+01 : f32
    %261 = vector.broadcast %cst_94 : f32 to vector<32x1xf32>
    %262 = arith.divf %260, %261 : vector<32x1xf32>
    %263 = vector.broadcast %262 : vector<32x1xf32> to vector<32x32xf32>
    %264 = arith.subf %254, %263 : vector<32x32xf32>
    %265 = arith.mulf %264, %264 : vector<32x32xf32>
    %cst_95 = arith.constant dense<0.000000e+00> : vector<32xf32>
    %266 = vector.multi_reduction <add>, %265, %cst_95 [1] : vector<32x32xf32> to vector<32xf32>
    %267 = vector.shape_cast %266 : vector<32xf32> to vector<32x1xf32>
    %cst_96 = arith.constant 3.200000e+01 : f32
    %268 = vector.broadcast %cst_96 : f32 to vector<32x1xf32>
    %269 = arith.divf %267, %268 : vector<32x1xf32>
    %cst_97 = arith.constant 9.99999974E-6 : f32
    %270 = vector.broadcast %cst_97 : f32 to vector<32x1xf32>
    %271 = arith.addf %269, %270 : vector<32x1xf32>
    %272 = math.rsqrt %271 : vector<32x1xf32>
    %273 = vector.broadcast %272 : vector<32x1xf32> to vector<32x32xf32>
    %274 = arith.mulf %264, %273 : vector<32x32xf32>
    %275 = vector.broadcast %256 : vector<1x32xf32> to vector<32x32xf32>
    %276 = arith.mulf %274, %275 : vector<32x32xf32>
    %277 = vector.broadcast %258 : vector<1x32xf32> to vector<32x32xf32>
    %278 = arith.addf %276, %277 : vector<32x32xf32>
    %c0_98 = arith.constant 0 : index
    %c0_99 = arith.constant 0 : index
    %c0_100 = arith.constant 0 : index
    %279 = vector.load %arg17[%c0_98, %c0_99, %c0_100] : memref<1x32x64xbf16, #tpu.memory_space<vmem>>, vector<1x32x64xbf16>
    %280 = vector.shape_cast %279 : vector<1x32x64xbf16> to vector<32x64xbf16>
    %c0_101 = arith.constant 0 : index
    %c0_102 = arith.constant 0 : index
    %c0_103 = arith.constant 0 : index
    %281 = vector.load %arg18[%c0_101, %c0_102, %c0_103] : memref<1x1x64xf32, #tpu.memory_space<vmem>>, vector<1x1x64xf32>
    %282 = vector.shape_cast %281 : vector<1x1x64xf32> to vector<1x64xf32>
    %c0_104 = arith.constant 0 : index
    %c0_105 = arith.constant 0 : index
    %c0_106 = arith.constant 0 : index
    %283 = vector.load %arg19[%c0_104, %c0_105, %c0_106] : memref<1x64x32xbf16, #tpu.memory_space<vmem>>, vector<1x64x32xbf16>
    %284 = vector.shape_cast %283 : vector<1x64x32xbf16> to vector<64x32xbf16>
    %c0_107 = arith.constant 0 : index
    %c0_108 = arith.constant 0 : index
    %c0_109 = arith.constant 0 : index
    %285 = vector.load %arg20[%c0_107, %c0_108, %c0_109] : memref<1x1x32xf32, #tpu.memory_space<vmem>>, vector<1x1x32xf32>
    %286 = vector.shape_cast %285 : vector<1x1x32xf32> to vector<1x32xf32>
    %287 = arith.truncf %278 : vector<32x32xf32> to vector<32x32xbf16>
    %cst_110 = arith.constant dense<0.000000e+00> : vector<32x64xf32>
    %288 = tpu.matmul %287, %280, %cst_110 {dimension_numbers = #tpu.dot_dimension_numbers<[1], [0], [0], [1], [0, 0, 1, 1], [], []>} : vector<32x32xbf16>, vector<32x64xbf16>, vector<32x64xf32> -> vector<32x64xf32>
    %289 = vector.broadcast %282 : vector<1x64xf32> to vector<32x64xf32>
    %290 = arith.addf %288, %289 : vector<32x64xf32>
    %cst_111 = arith.constant 0.000000e+00 : f32
    %291 = vector.broadcast %cst_111 : f32 to vector<32x64xf32>
    %292 = arith.maximumf %290, %291 : vector<32x64xf32>
    %293 = arith.truncf %292 : vector<32x64xf32> to vector<32x64xbf16>
    %cst_112 = arith.constant dense<0.000000e+00> : vector<32x32xf32>
    %294 = tpu.matmul %293, %284, %cst_112 {dimension_numbers = #tpu.dot_dimension_numbers<[1], [0], [0], [1], [0, 0, 1, 1], [], []>} : vector<32x64xbf16>, vector<64x32xbf16>, vector<32x32xf32> -> vector<32x32xf32>
    %295 = vector.broadcast %286 : vector<1x32xf32> to vector<32x32xf32>
    %296 = arith.addf %294, %295 : vector<32x32xf32>
    %297 = arith.addf %254, %296 : vector<32x32xf32>
    %c0_113 = arith.constant 0 : index
    %c0_114 = arith.constant 0 : index
    %298 = vector.load %arg22[%c0_113, %c0_114] : memref<32x32xf32, #tpu.memory_space<vmem>>, vector<32x32xf32>
    tpu.vector_store %arg22[%c0_113, %c0_114], %297 {strides = array<i32>} : memref<32x32xf32, #tpu.memory_space<vmem>>, vector<32x32xf32>,
    %c1_i32 = arith.constant 1 : i32
    %299 = arith.cmpi eq, %arg0, %c1_i32 : i32
    %300 = arith.extui %299 : i1 to i32
    %c0_i32_115 = arith.constant 0 : i32
    %301 = arith.cmpi ne, %300, %c0_i32_115 : i32
    scf.if %301 {
      %c0_116 = arith.constant 0 : index
      %c0_117 = arith.constant 0 : index
      %302 = vector.load %arg21[%c0_116, %c0_117] : memref<32x32xf32, #tpu.memory_space<vmem>>, vector<32x32xf32>
      tpu.vector_store %arg21[%c0_116, %c0_117], %297 {strides = array<i32>} : memref<32x32xf32, #tpu.memory_space<vmem>>, vector<32x32xf32>,
    } else {
    }
    return
  }
  func.func @transform_0(%arg0: i32) -> (i32, i32) {
    %c0_i32 = arith.constant 0 : i32
    %c0_i32_0 = arith.constant 0 : i32
    %c0_i32_1 = arith.constant 0 : i32
    return %c0_i32, %c0_i32_0 : i32, i32
  }
  func.func @transform_1(%arg0: i32) -> (i32, i32) {
    %c0_i32 = arith.constant 0 : i32
    %c0_i32_0 = arith.constant 0 : i32
    %c0_i32_1 = arith.constant 0 : i32
    return %c0_i32, %c0_i32_0 : i32, i32
  }
  func.func @transform_2(%arg0: i32) -> (i32, i32, i32) {
    %c0_i32 = arith.constant 0 : i32
    %c0_i32_0 = arith.constant 0 : i32
    %c0_i32_1 = arith.constant 0 : i32
    return %arg0, %c0_i32, %c0_i32_0 : i32, i32, i32
  }
  func.func @transform_3(%arg0: i32) -> (i32, i32, i32) {
    %c0_i32 = arith.constant 0 : i32
    %c0_i32_0 = arith.constant 0 : i32
    %c0_i32_1 = arith.constant 0 : i32
    return %arg0, %c0_i32, %c0_i32_0 : i32, i32, i32
  }
  func.func @transform_4(%arg0: i32) -> (i32, i32, i32) {
    %c0_i32 = arith.constant 0 : i32
    %c0_i32_0 = arith.constant 0 : i32
    %c0_i32_1 = arith.constant 0 : i32
    return %arg0, %c0_i32, %c0_i32_0 : i32, i32, i32
  }
  func.func @transform_5(%arg0: i32) -> (i32, i32, i32) {
    %c0_i32 = arith.constant 0 : i32
    %c0_i32_0 = arith.constant 0 : i32
    %c0_i32_1 = arith.constant 0 : i32
    return %arg0, %c0_i32, %c0_i32_0 : i32, i32, i32
  }
  func.func @transform_6(%arg0: i32) -> (i32, i32, i32) {
    %c0_i32 = arith.constant 0 : i32
    %c0_i32_0 = arith.constant 0 : i32
    %c0_i32_1 = arith.constant 0 : i32
    return %arg0, %c0_i32, %c0_i32_0 : i32, i32, i32
  }
  func.func @transform_7(%arg0: i32) -> (i32, i32, i32) {
    %c0_i32 = arith.constant 0 : i32
    %c0_i32_0 = arith.constant 0 : i32
    %c0_i32_1 = arith.constant 0 : i32
    return %arg0, %c0_i32, %c0_i32_0 : i32, i32, i32
  }
  func.func @transform_8(%arg0: i32) -> (i32, i32, i32) {
    %c0_i32 = arith.constant 0 : i32
    %c0_i32_0 = arith.constant 0 : i32
    %c0_i32_1 = arith.constant 0 : i32
    return %arg0, %c0_i32, %c0_i32_0 : i32, i32, i32
  }
  func.func @transform_9(%arg0: i32) -> (i32, i32, i32) {
    %c0_i32 = arith.constant 0 : i32
    %c0_i32_0 = arith.constant 0 : i32
    %c0_i32_1 = arith.constant 0 : i32
    return %arg0, %c0_i32, %c0_i32_0 : i32, i32, i32
  }
  func.func @transform_10(%arg0: i32) -> (i32, i32, i32) {
    %c0_i32 = arith.constant 0 : i32
    %c0_i32_0 = arith.constant 0 : i32
    %c0_i32_1 = arith.constant 0 : i32
    return %arg0, %c0_i32, %c0_i32_0 : i32, i32, i32
  }
  func.func @transform_11(%arg0: i32) -> (i32, i32, i32) {
    %c0_i32 = arith.constant 0 : i32
    %c0_i32_0 = arith.constant 0 : i32
    %c0_i32_1 = arith.constant 0 : i32
    return %arg0, %c0_i32, %c0_i32_0 : i32, i32, i32
  }
  func.func @transform_12(%arg0: i32) -> (i32, i32, i32) {
    %c0_i32 = arith.constant 0 : i32
    %c0_i32_0 = arith.constant 0 : i32
    %c0_i32_1 = arith.constant 0 : i32
    return %arg0, %c0_i32, %c0_i32_0 : i32, i32, i32
  }
  func.func @transform_13(%arg0: i32) -> (i32, i32, i32) {
    %c0_i32 = arith.constant 0 : i32
    %c0_i32_0 = arith.constant 0 : i32
    %c0_i32_1 = arith.constant 0 : i32
    return %arg0, %c0_i32, %c0_i32_0 : i32, i32, i32
  }
  func.func @transform_14(%arg0: i32) -> (i32, i32, i32) {
    %c0_i32 = arith.constant 0 : i32
    %c0_i32_0 = arith.constant 0 : i32
    %c0_i32_1 = arith.constant 0 : i32
    return %arg0, %c0_i32, %c0_i32_0 : i32, i32, i32
  }
  func.func @transform_15(%arg0: i32) -> (i32, i32, i32) {
    %c0_i32 = arith.constant 0 : i32
    %c0_i32_0 = arith.constant 0 : i32
    %c0_i32_1 = arith.constant 0 : i32
    return %arg0, %c0_i32, %c0_i32_0 : i32, i32, i32
  }
  func.func @transform_16(%arg0: i32) -> (i32, i32, i32) {
    %c0_i32 = arith.constant 0 : i32
    %c0_i32_0 = arith.constant 0 : i32
    %c0_i32_1 = arith.constant 0 : i32
    return %arg0, %c0_i32, %c0_i32_0 : i32, i32, i32
  }
  func.func @transform_17(%arg0: i32) -> (i32, i32, i32) {
    %c0_i32 = arith.constant 0 : i32
    %c0_i32_0 = arith.constant 0 : i32
    %c0_i32_1 = arith.constant 0 : i32
    return %arg0, %c0_i32, %c0_i32_0 : i32, i32, i32
  }
  func.func @transform_18(%arg0: i32) -> (i32, i32, i32) {
    %c0_i32 = arith.constant 0 : i32
    %c0_i32_0 = arith.constant 0 : i32
    %c0_i32_1 = arith.constant 0 : i32
    return %arg0, %c0_i32, %c0_i32_0 : i32, i32, i32
  }
  func.func @transform_19(%arg0: i32) -> (i32, i32, i32) {
    %c0_i32 = arith.constant 0 : i32
    %c0_i32_0 = arith.constant 0 : i32
    %c0_i32_1 = arith.constant 0 : i32
    return %arg0, %c0_i32, %c0_i32_0 : i32, i32, i32
  }
  func.func @transform_20(%arg0: i32) -> (i32, i32) {
    %c0_i32 = arith.constant 0 : i32
    %c0_i32_0 = arith.constant 0 : i32
    %c0_i32_1 = arith.constant 0 : i32
    return %c0_i32, %c0_i32_0 : i32, i32
  }
}

</mosaic_0001>

<bundles_post_ra>
// kernel: transformer_forward.2
= control target key start
LH: loop header
LB: loop body
LE: loop exit
PB: predicated region body
PF: predicated region fallthrough
CT: control target
= control target key end

     0   :  { %s2801_s0 = inlined_call_operand.vmem [shape: f32[32,32], index: 0, kind: input, shape index: {}]   ;;  %s2802_s1 = inlined_call_operand.vmem [shape: f32[2,1,32], index: 1, kind: input, shape index: {}]   ;;  %s2803_s2 = inlined_call_operand.vmem [shape: f32[2,1,32], index: 2, kind: input, shape index: {}]   ;;  %s2804_s3 = inlined_call_operand.vmem [shape: bf16[2,32,96], index: 3, kind: input, shape index: {}]   ;;  %s2805_s4 = inlined_call_operand.vmem [shape: f32[2,1,96], index: 4, kind: input, shape index: {}]   ;;  %s2806_s5 = inlined_call_operand.hbm [shape: bf16[2,32,32], index: 5, kind: input, shape index: {}]   ;;  %s2807_s6 = inlined_call_operand.vmem [shape: f32[2,1,32], index: 6, kind: input, shape index: {}]   ;;  %s2808_s7 = inlined_call_operand.vmem [shape: f32[2,1,32], index: 7, kind: input, shape index: {}]   ;;  %s2809_s8 = inlined_call_operand.vmem [shape: f32[2,1,32], index: 8, kind: input, shape index: {}]   ;;  %s2810_s9 = inlined_call_operand.hbm [shape: bf16[2,32,64], index: 9, kind: input, shape index: {}]   ;;  %s2811_s10 = inlined_call_operand.vmem [shape: f32[2,1,64], index: 10, kind: input, shape index: {}]   ;;  %s2812_s11 = inlined_call_operand.vmem [shape: bf16[2,64,32], index: 11, kind: input, shape index: {}]   ;;  %s2813_s12 = inlined_call_operand.vmem [shape: f32[2,1,32], index: 12, kind: input, shape index: {}]   ;;  %s2814_s13 = inlined_call_operand.vmem [shape: f32[32,32], index: 13, kind: output, shape index: {}]  }
   0x1   :  { %2822 = sst [smem:[#allocation12_spill]] %s2801_s0 }
   0x2   :  { %2823 = sst [smem:[#allocation13_spill]] %s2804_s3 }
   0x3   :  { %2824 = sst [smem:[#allocation14_spill]] %s2806_s5 }
   0x4   :  { %2825 = sst [smem:[#allocation15_spill]] %s2810_s9 }
   0x5   :  { %2826 = sst [smem:[#allocation16_spill]] %s2812_s11 }
   0x6   :  { %2827 = sst [smem:[#allocation17_spill]] %s2813_s12 }
   0x7   :  { %2828 = sst [smem:[#allocation18_spill]] %s2814_s13 }
   0x8   :  { %18 = vsyncpa [#allocation4], 0 }
   0x9   :  { %20 = vsyncpa [#allocation4 + $0x1], 0 }
   0xa   :  { %21 = vsyncpa [#allocation6], 0 }
   0xb   :  { %23 = vsyncpa [#allocation6 + $0x1], 0  ;;  %s2268_s25 = smov 0   ;;  %s2270_s26 = smov 0  }
   0xc   :  { %s2272_s27 = smov 0   ;;  %s2274_s28 = smov 0  }
   0xd LB: > { %2829 = sst [smem:[#allocation9_spill]] %s2175_s27  ;;  %s2287_s29 = sadd.s32 4294967295, %s2179_s28   ;;  %s2179_s28 = sphi %s2274_s28, %s2850_s28   ;;  %s2175_s27 = sphi %s2272_s27, %s2852_s27   ;;  %s2171_s26 = sphi %s2270_s26, %s2854_s26   ;;  %s2167_s25 = sphi %s2268_s25, %s2853_s25  }
   0xe   : > { %s2290_s30 = sadd.s32 1, %s2179_s28   ;;  %s161_s15 = sadd.s32 1, %s2175_s27 }
   0xf   : > { %2830 = sst [smem:[#allocation10_spill]] %s2290_s30  ;;  %s158_s14 = ssub.s32 %s2179_s28, %s2290_s30 }
  0x10   : > { %p159_p0 = scmp.eq.s32.totalorder %s158_s14, 0  ;;  %p168_p1 = scmp.ne.s32.totalorder %s2175_s27, %s2171_s26 }
  0x11   : > { %p169_p2 = scmp.eq.s32.totalorder %s2179_s28, 0  ;;  %p174_p3 = scmp.ne.s32.totalorder %s2171_s26, %s2167_s25 }
  0x12   : > { %s2300_s16 = scalar_select %p159_p0, %s2175_s27, %s161_s15  }
  0x13   : > { %p2302_p4 = por %p169_p2, %p168_p1  ;;  %p175_p5 = scmp.eq.s32.totalorder %s2287_s29, 0 }
  0x14   : > { %2831 = sst [smem:[#allocation11_spill]] %s2300_s16  ;;  %p1907_p6 = scmp.lt.s32.totalorder %s2179_s28, 2 }
  0x15   : > { %p2308_p7 = por %p175_p5, %p174_p3  ;;  %s2313_s19 = sand.u32 1, %s2175_s27  }
  0x16   : > { %s2819_s20 = sshll.u32 %s2313_s19, 4  ;;  %s2820_s21 = sshll.u32 %s2179_s28, 4 }
  0x17   : > { %s2834_s5 = sld [smem:[#allocation14_spill]]  ;;  %s434_s25 = scalar_lea.vmem [#allocation3], %s2819_s20 }
  0x18   : > { %s442_s14 = sshll.u32 %s434_s25, 4  ;;  %p2326_p8 = pnand %p1907_p6, %p2302_p4  ;;  %s443_s14 = int_to_ptr.vmem [resolvable:$true] %s442_s14 }
  0x19   : > { %p1807_p9 = scmp.ge.s32.totalorder %s2179_s28, 1  ;;  %s431_s27 = scalar_lea.sflag [#allocation4], %s2313_s19 }
  0x1a   : > { %p2085_p11 = pneg %p2326_p8 }
  0x1d   : > { %s439_s24 = scalar_lea.hbm %s2834_s5, %s2820_s21  ;;  %s2088_s23 = scalar_lea.hbm %s2834_s5, 32 }
  0x1e   : > { %s440_s15 = sshll.u32 %s439_s24, 4  ;;  %s441_s15 = int_to_ptr.hbm [resolvable:$true] %s440_s15 }
  0x1f   : > { %s2081_s30 = sshra.s32 %s441_s15, 4  ;;  %s2082_s30 = int_to_ptr.hbm [resolvable:$true] %s2081_s30 }
  0x20   : > { %s2083_s13 = scalar_lea.hbm %s2082_s30, 16  ;;  %p2089_p0 = scmp.lt.s32.totalorder %s2082_s30, %s2834_s5 }
  0x21   : > { %p2084_p10 = scmp.ne.s32.totalorder %s2082_s30, %s2083_s13  ;;  %p2090_p1 = scmp.lt.s32.totalorder %s2088_s23, %s2083_s13 }
  0x23   : > { %p2086_p12 = pnand %p2085_p11, %p2084_p10  ;;  %p2091_p2 = por %p2090_p1, %p2089_p0 }
  0x25   : > { %p2087_p13 = pneg %p2086_p12 }
  0x27   : > { %p2092_p3 = pnand %p2091_p2, %p2087_p13 }
  0x29   : > { %2095 = shalt.err (!%p2092_p3)
}
  0x2a   : > { %s2181_s20 = smov 64   ;;  %s2182_s21 = smov 4  }
  0x2b   : > { %1903 = dma.hbm_to_vmem [thread:$0]  (!%p2326_p8), %s441_s15, 256, %s443_s14, %s431_s27, %s2181_s20, %s2181_s20, %s2182_s21  }
  0x2c   : > { %p510_p4 = scmp.lt.s32.totalorder %s2179_s28, 3  ;;  %s2836_s22 = sshll.u32 %s2179_s28, 4 }
  0x2d   : > { %s2837_s9 = sld [smem:[#allocation15_spill]]  ;;  %s2839_s25 = sshll.u32 %s2313_s19, 4 }
  0x2e   : > { %p2353_p5 = pnand %p1807_p9, %p510_p4  ;;  %s474_s5 = scalar_lea.vmem [#allocation5], %s2839_s25 }
  0x2f   : > { %s482_s0 = sshll.u32 %s474_s5, 4  ;;  %s471_s12 = scalar_lea.sflag [#allocation6], %s2313_s19  ;;  %s483_s0 = int_to_ptr.vmem [resolvable:$true] %s482_s0 }
  0x33   : > { %s479_s13 = scalar_lea.hbm %s2837_s9, %s2836_s22  ;;  %s2118_s15 = scalar_lea.hbm %s2837_s9, 32 }
  0x34   : > { %s480_s23 = sshll.u32 %s479_s13, 4  ;;  %s481_s23 = int_to_ptr.hbm [resolvable:$true] %s480_s23 }
  0x35   : > { %s2111_s11 = sshra.s32 %s481_s23, 4  ;;  %s2112_s11 = int_to_ptr.hbm [resolvable:$true] %s2111_s11 }
  0x36   : > { %s2113_s27 = scalar_lea.hbm %s2112_s11, 16  ;;  %p2119_p9 = scmp.lt.s32.totalorder %s2112_s11, %s2837_s9 }
  0x37   : > { %p2114_p6 = scmp.ne.s32.totalorder %s2112_s11, %s2113_s27  ;;  %p2120_p13 = scmp.lt.s32.totalorder %s2118_s15, %s2113_s27 }
  0x39   : > { %p2116_p10 = pnand %p2114_p6, %p2085_p11  ;;  %p2121_p0 = por %p2120_p13, %p2119_p9 }
  0x3b   : > { %p2117_p12 = pneg %p2116_p10 }
  0x3d   : > { %p2122_p1 = pnand %p2121_p0, %p2117_p12 }
  0x3f   : > { %2125 = shalt.err (!%p2122_p1)
}
  0x40   : > { %1906 = dma.hbm_to_vmem [thread:$0]  (!%p2326_p8), %s481_s23, 256, %s483_s0, %s471_s12, %s2181_s20, %s2181_s20, %s2182_s21  }
  0x41   : > { %514 = sbr.rel (%p2353_p5) target bundleno = 2579 (0xa13), region = 72  ;;  %s516_s5 = sand.u32 (!%p2353_p5), 1, %s2171_s26  }
  0x42   : > { %s1808_s19 = sshll.u32 (!%p2353_p5), %s516_s5, 4  ;;  %s517_s24 = scalar_lea.sflag (!%p2353_p5), [#allocation4], %s516_s5 }
  0x43   : > { %s2374_s13 = scalar_lea.vmem (!%p2353_p5), [#allocation3], %s1808_s19 }
  0x46   : > { %2158 = dma.done.wait (%p2308_p7), %s517_s24, 256  }
  0x47   : > { %2160 = vsyncadd (%p2308_p7), %s517_s24, 4294967040  ;;  %s527_s11 = scalar_lea.sflag [#allocation6], %s516_s5  ;;  %s2380_s25 = scalar_lea.vmem [#allocation5], %s1808_s19 }
  0x48   : > { %2162 = dma.done.wait (%p2308_p7), %s527_s11, 256  }
  0x49   : > { %2164 = vsyncadd (%p2308_p7), %s527_s11, 4294967040  ;;  %p608_p8 = scmp.lt.s32.totalorder %s2287_s29, 1  ;;  %s2840_s3 = sld [smem:[#allocation13_spill]] }
  0x4a   : > { %s2841_s22 = sld [smem:[#allocation16_spill]]  ;;  %p1814_p7 = scmp.ne.s32.totalorder %s2287_s29, 0 }
  0x4b   : > { %s2388_s0 = scalar_select %p608_p8, %s2287_s29, 1 }
  0x4c   : > { %s2842_s24 = sld [smem:[#allocation17_spill]] }
  0x4d   : > { %s1884_s23 = sshll.u32 %s2388_s0, 4  ;;  %s627_s16 = scalar_lea.vmem %s2808_s7, %s2388_s0 }
  0x4e   : > { %s630_s30 = scalar_lea.vmem %s2809_s8, %s2388_s0  ;;  %s633_s28 = scalar_lea.vmem %s2811_s10, %s2388_s0 }
  0x4f   : > { %s2406_s17 = scalar_lea.vmem %s2840_s3, %s1884_s23  ;;  %s1885_s14 = sshll.u32 %s2388_s0, 5 }
  0x50   : > { %s2428_s3 = scalar_lea.vmem %s2841_s22, %s1885_s14  ;;  %646 = sbr.rel (%p1814_p7) target bundleno = 92 (0x5c), region = 84 }
  0x51   : > { %s2843_s20 = sld [smem:[#allocation12_spill]] (!%p1814_p7) }
  0x52   : > { %s641_s9 = scalar_lea.vmem %s2842_s24, %s2388_s0 }
  0x55   : > { %vm651_vm0 = vcmask 261120  }
  0x57   : > { %v647_v0 = vld [vmem:[%s2843_s20] sm:$0xff]  ;;  %v648_v1 = vld [vmem:[%s2843_s20 + $0x8] sm:$0xff]  ;;  %v649_v2 = vld [vmem:[%s2843_s20 + $0x10] sm:$0xff] }
  0x58   : > { %652 = vst.msk [vmem:[#allocation2] sm:$0xff] %vm651_vm0, %v647_v0  ;;  %v650_v3 = vld [vmem:[%s2843_s20 + $0x18] sm:$0xff] }
  0x59   : > { %653 = vst.msk [vmem:[#allocation2 + $0x8] sm:$0xff] %vm651_vm0, %v648_v1 }
  0x5a   : > { %654 = vst.msk [vmem:[#allocation2 + $0x10] sm:$0xff] %vm651_vm0, %v649_v2 }
  0x5b   : > { %655 = vst.msk [vmem:[#allocation2 + $0x18] sm:$0xff] %vm651_vm0, %v650_v3 }
  0x5c PF: > { %vm662_vm1 = vcmask 261120   ;;  %v2183_v12 = vmov 32.0   ;;  %v1887_v39 = vld [vmem:[%s2406_s17 + $0x8] sm:$0xff]  ;;  %v1886_v43 = vld [vmem:[%s2406_s17] sm:$0xff]  ;;  %s2844_s22 = scalar_lea.vmem %s2802_s1, %s2388_s0  ;;  %s2845_s11 = scalar_lea.vmem %s2803_s2, %s2388_s0  ;;  %vm838_vm15 = vcmask 64512   ;;  %vm1349_vm0 = vcmask 130048  }
  0x5d   : > { %1995 = vrcp.f32 %v2183_v12  ;;  %811 = vmatpush.bf16.msra.mxu0 %v1887_v39  ;;  %s2846_s21 = scalar_lea.vmem %s2805_s4, %s2388_s0  ;;  %s2184_s27 = smov 96  }
  0x5e   : > { %s2185_s15 = smov 88   ;;  %s2186_s14 = smov 64  }
  0x5f   : > { %v656_v5 = vld [vmem:[#allocation2] sm:$0xff]  ;;  %s2187_s23 = smov 120   ;;  %s2188_s17 = smov 72  }
  0x60   : > { %v663_v7 = vsel %vm662_vm1, %v656_v5, 0.0  ;;  %v657_v9 = vld [vmem:[#allocation2 + $0x8] sm:$0xff]  ;;  %s2189_s24 = smov 80   ;;  %s2191_s5 = smov 104  }
  0x61   : > { %v658_v4 = vld [vmem:[#allocation2 + $0x10] sm:$0xff]  ;;  %664 = vadd.xlane.f32.xlu0 %v663_v7  ;;  %v666_v11 = vsel %vm662_vm1, %v657_v9, 0.0  ;;  %812 = vmatpush.bf16.msra.mxu0 %v1886_v43  ;;  %s2192_s19 = smov 56   ;;  %s2194_s12 = smov 40  }
  0x62   : > { %v669_v6 = vsel %vm662_vm1, %v658_v4, 0.0  ;;  %v659_v8 = vld [vmem:[#allocation2 + $0x18] sm:$0xff]  ;;  %s2195_s18 = smov 8   ;;  %p1879_p11 = scmp.ne.s32.totalorder %s2287_s29, 1 }
  0x63   : > { %670 = vadd.xlane.f32.xlu1 %v669_v6  ;;  %v672_v10 = vsel %vm662_vm1, %v659_v8, 0.0  ;;  %v1996_v13 = vpop.eup %1995 }
  0x64   : > { %v676_v14 = vmul.f32 32.0, %v1996_v13  ;;  %vm680_vm2 = vweird.f32 %v1996_v13 }
  0x66   : > { %v677_v15 = vsub.f32 1.0, %v676_v14 }
  0x68   : > { %v678_v16 = vmul.f32 %v1996_v13, %v677_v15 }
  0x69   : > { %667 = vadd.xlane.f32.xlu0 %v666_v11 }
  0x6a   : > { %v679_v17 = vadd.f32 %v1996_v13, %v678_v16  ;;  %v1988_v16 = vld [vmem:[%s2845_s11] ss:$0 sm:$0xff]  ;;  %s2193_s11 = smov 48  }
  0x6b   : > { %673 = vadd.xlane.f32.xlu1 %v672_v10 }
  0x6c   : > { %v2451_v18 = vsel %vm680_vm2, %v1996_v13, %v679_v17  ;;  %vm1354_vm2 = vcmask 195584  }
  0xd4   : > { %v665_v20 = vpop.xlane.xlu0 %664 }
  0xd5   : > { %v682_v22 = vmul.f32 %v2451_v18, %v665_v20 }
  0xd6   : > { %v671_v19 = vpop.xlane.xlu1 %670 }
  0xd7   : > { %v684_v21 = vmul.f32 %v2451_v18, %v671_v19  ;;  %v686_v24 = vsub.f32 %v656_v5, %v682_v22 }
  0xd9   : > { %v2455_v23 = vsub.f32 %v658_v4, %v684_v21  ;;  %v690_v26 = vmul.f32 %v686_v24, %v686_v24 }
  0xdb   : > { %v692_v25 = vmul.f32 %v2455_v23, %v2455_v23  ;;  %v694_v28 = vsel %vm662_vm1, %v690_v26, 0.0 }
  0xdc   : > { %695 = vadd.xlane.f32.xlu2 %v694_v28  ;;  %v668_v30 = vpop.xlane.xlu0 %667 }
  0xdd   : > { %v700_v27 = vsel %vm662_vm1, %v692_v25, 0.0  ;;  %v683_v32 = vmul.f32 %v2451_v18, %v668_v30 }
  0xde   : > { %v674_v29 = vpop.xlane.xlu1 %673  ;;  %701 = vadd.xlane.f32.xlu0 %v700_v27 }
  0xdf   : > { %v685_v31 = vmul.f32 %v2451_v18, %v674_v29  ;;  %v687_v34 = vsub.f32 %v657_v9, %v683_v32  ;;  %v1987_v9 = vld [vmem:[%s2844_s22] ss:$0 sm:$0xff]  ;;  %s2190_s22 = smov 112  }
  0xe1   : > { %v2463_v33 = vsub.f32 %v659_v8, %v685_v31  ;;  %v691_v36 = vmul.f32 %v687_v34, %v687_v34 }
  0xe3   : > { %v693_v35 = vmul.f32 %v2463_v33, %v2463_v33  ;;  %v697_v38 = vsel %vm662_vm1, %v691_v36, 0.0 }
  0xe4   : > { %698 = vadd.xlane.f32.xlu2 %v697_v38 }
  0xe5   : > { %v703_v37 = vsel %vm662_vm1, %v693_v35, 0.0 }
  0xe6   : > { %704 = vadd.xlane.f32.xlu1 %v703_v37  ;;  %v1989_v37 = vld [vmem:[%s2846_s21] ss:$0 sm:$0xff]  ;;  %s2196_s21 = smov 24  }
 0x14f   : > { %v696_v40 = vpop.xlane.xlu2 %695 }
 0x150   : > { %v706_v41 = vmul.f32 %v696_v40, %v2451_v18 }
 0x151   : > { %v702_v42 = vpop.xlane.xlu0 %701 }
 0x152   : > { %v710_v44 = vadd.f32 1e-05, %v706_v41  ;;  %v708_v45 = vmul.f32 %v702_v42, %v2451_v18 }
 0x154   : > { %1997 = vrsqrt.f32 %v710_v44  ;;  %v712_v46 = vadd.f32 1e-05, %v708_v45  ;;  %vm720_vm4 = vweird.f32 %v710_v44 }
 0x156   : > { %1999 = vrsqrt.f32 %v712_v46  ;;  %vm740_vm11 = vweird.f32 %v712_v46 }
 0x157   : > { %v699_v48 = vpop.xlane.xlu2 %698 }
 0x158   : > { %v707_v50 = vmul.f32 %v699_v48, %v2451_v18 }
 0x159   : > { %v705_v47 = vpop.xlane.xlu1 %704 }
 0x15a   : > { %v709_v49 = vmul.f32 %v705_v47, %v2451_v18  ;;  %v1998_v51 = vpop.eup %1997  ;;  %v711_v53 = vadd.f32 1e-05, %v707_v50 }
 0x15b   : > { %v715_v54 = vmul.f32 %v1998_v51, %v710_v44  ;;  %vm721_vm3 = vweird.f32 %v1998_v51 }
 0x15c   : > { %v713_v52 = vadd.f32 1e-05, %v709_v49  ;;  %v2000_v57 = vpop.eup %1999  ;;  %vm722_vm5 = vmor %vm720_vm4, %vm721_vm3  ;;  %vm730_vm7 = vweird.f32 %v711_v53 }
 0x15d   : > { %v716_v55 = vmul.f32 %v1998_v51, %v715_v54  ;;  %v735_v63 = vmul.f32 %v2000_v57, %v712_v46  ;;  %vm741_vm12 = vweird.f32 %v2000_v57 }
 0x15e   : > { %2001 = vrsqrt.f32 %v713_v52  ;;  %vm750_vm9 = vweird.f32 %v713_v52  ;;  %vm742_vm14 = vmor %vm740_vm11, %vm741_vm12 }
 0x15f   : > { %2003 = vrsqrt.f32 %v711_v53  ;;  %v717_v56 = vmul.f32 0.5, %v716_v55  ;;  %v736_v4 = vmul.f32 %v2000_v57, %v735_v63 }
 0x161   : > { %v718_v58 = vsub.f32 1.5, %v717_v56  ;;  %v737_v10 = vmul.f32 0.5, %v736_v4 }
 0x163   : > { %v719_v62 = vmul.f32 %v1998_v51, %v718_v58  ;;  %v738_v17 = vsub.f32 1.5, %v737_v10 }
 0x164   : > { %v2002_v59 = vpop.eup %2001 }
 0x165   : > { %v2004_v60 = vpop.eup %2003  ;;  %v745_v61 = vmul.f32 %v2002_v59, %v713_v52  ;;  %v723_v3 = vsel %vm722_vm5, %v1998_v51, %v719_v62  ;;  %vm751_vm10 = vweird.f32 %v2002_v59 }
 0x166   : > { %v725_v0 = vmul.f32 %v2004_v60, %v711_v53  ;;  %vm731_vm6 = vweird.f32 %v2004_v60  ;;  %v754_v8 = vmul.f32 %v723_v3, %v686_v24  ;;  %vm752_vm13 = vmor %vm750_vm9, %vm751_vm10  ;;  %v739_v24 = vmul.f32 %v2000_v57, %v738_v17 }
 0x167   : > { %v746_v1 = vmul.f32 %v2002_v59, %v745_v61  ;;  %vm732_vm8 = vmor %vm730_vm7, %vm731_vm6 }
 0x168   : > { %v726_v2 = vmul.f32 %v2004_v60, %v725_v0  ;;  %v761_v15 = vmul.f32 %v1987_v9, %v754_v8  ;;  %v743_v27 = vsel %vm742_vm14, %v2000_v57, %v739_v24 }
 0x169   : > { %v747_v6 = vmul.f32 0.5, %v746_v1  ;;  %v756_v29 = vmul.f32 %v743_v27, %v2455_v23 }
 0x16a   : > { %v727_v5 = vmul.f32 0.5, %v726_v2  ;;  %v768_v21 = vadd.f32 %v1988_v16, %v761_v15 }
 0x16b   : > { %v748_v12 = vsub.f32 1.5, %v747_v6  ;;  %v763_v31 = vmul.f32 %v1987_v9, %v756_v29 }
 0x16c   : > { %v728_v7 = vsub.f32 1.5, %v727_v5 }
 0x16d   : > { %v749_v20 = vmul.f32 %v2002_v59, %v748_v12 }
 0x16e   : > { %v729_v11 = vmul.f32 %v2004_v60, %v728_v7 }
 0x16f   : > { %v753_v26 = vsel %vm752_vm13, %v2002_v59, %v749_v20 }
 0x170   : > { %v733_v13 = vsel %vm732_vm8, %v2004_v60, %v729_v11  ;;  %v757_v28 = vmul.f32 %v753_v26, %v2463_v33 }
 0x171   : > { %v755_v14 = vmul.f32 %v733_v13, %v687_v34  ;;  %v770_v34 = vadd.f32 %v1988_v16, %v763_v31 }
 0x172   : > { %v764_v30 = vmul.f32 %v1987_v9, %v757_v28 }
 0x173   : > { %v762_v19 = vmul.f32 %v1987_v9, %v755_v14 }
 0x174   : > { %v771_v32 = vadd.f32 %v1988_v16, %v764_v30 }
 0x175   : > { %v769_v22 = vadd.f32 %v1988_v16, %v762_v19 }
 0x176   : > { %v783_v35 = vpack.c.bf16 %v771_v32, %v770_v34 }
 0x177   : > { %v782_v25 = vpack.c.bf16 %v769_v22, %v768_v21 }
 0x179   : > { %1823 = vmatmul.msk.bf16.vlgmr.msra.gmra.mxu0 %vm662_vm1, %v782_v25 }
 0x189   : > { %1824 = vmatmul.msk.bf16.gmra.mxu0 %vm662_vm1, %v783_v35 }
 0x1f6   : > { %v814_v36 = vpop.f32.mrf.mxu0 }
 0x1f7   : > { %v815_v38 = vadd.f32 %v1989_v37, %v814_v36 }
 0x1f9   : > { %v824_v41 = vmul.f32 0.35355338, %v815_v38 }
 0x1fe   : > { %v816_v39 = vpop.f32.mrf.mxu0 }
 0x1ff   : > { %v817_v40 = vadd.f32 %v1989_v37, %v816_v39 }
 0x201   : > { %v825_v33 = vmul.f32 0.35355338, %v817_v40  ;;  %v2494_v42 = vpack.c.bf16 %v817_v40, %v815_v38 }
 0x203   : > { %v2496_v23 = vpack.c.bf16 %v825_v33, %v824_v41  ;;  %834 = vrot.lane.b32.xlu0 %v2494_v42, %s2184_s27 }
 0x206   : > { %v819_v43 = vpop.f32.mrf.mxu0 }
 0x207   : > { %v820_v44 = vadd.f32 %v1989_v37, %v819_v43 }
 0x209   : > { %v826_v47 = vmul.f32 0.35355338, %v820_v44 }
 0x20e   : > { %v821_v45 = vpop.f32.mrf.mxu0 }
 0x20f   : > { %v822_v46 = vadd.f32 %v1989_v37, %v821_v45 }
 0x211   : > { %v827_v48 = vmul.f32 0.35355338, %v822_v46  ;;  %v2499_v49 = vpack.c.bf16 %v822_v46, %v820_v44 }
 0x213   : > { %v2501_v50 = vpack.c.bf16 %v827_v48, %v826_v47  ;;  %955 = vrot.lane.b32.xlu0 %v2499_v49, %s2185_s15  ;;  %836 = vrot.lane.b32.xlu2 %v2499_v49, %s2184_s27  ;;  %s2197_s27 = smov 16  }
 0x26d   : > { %v837_v51 = vpop.permute.xlu2 %836 }
 0x26e   : > { %v849_v52 = vsel %vm838_vm15, %v837_v51, 0 }
 0x26f   : > { %857 = vmatpush.bf16.xpose.msra.mxu1 %v849_v52 }
 0x275   : > { %v835_v53 = vpop.permute.xlu0 %834 }
 0x276   : > { %v846_v54 = vsel %vm838_vm15, %v835_v53, 0 }
 0x277   : > { %858 = vmatpush.bf16.xpose.msra.mxu1 %v846_v54 }
 0x27e   : > { %1825 = vmatmul.msk.bf16.vlgmr.msra.gmra.mxu1 %vm838_vm15, %v2496_v23 }
 0x285   : > { %v956_v55 = vpop.permute.xlu0 %955 }
 0x286   : > { %v967_v56 = vsel %vm838_vm15, %v956_v55, 0 }
 0x287   : > { %975 = vmatpush.bf16.xpose.msra.mxu3 %v967_v56 }
 0x28e   : > { %1826 = vmatmul.msk.bf16.gmra.mxu1 %vm838_vm15, %v2501_v50 }
 0x2fb   : > { %v860_v57 = vpop.f32.mrf.mxu1 }
 0x2fc   : > { %v870_v58 = vsel %vm662_vm1, %v860_v57, -inf }
 0x2fd   : > { %871 = vmax.xlane.f32.xlu1 %v870_v58 }
 0x303   : > { %v862_v59 = vpop.f32.mrf.mxu1 }
 0x304   : > { %v873_v60 = vsel %vm662_vm1, %v862_v59, -inf }
 0x305   : > { %874 = vmax.xlane.f32.xlu1 %v873_v60 }
 0x30b   : > { %v865_v61 = vpop.f32.mrf.mxu1 }
 0x30c   : > { %v876_v62 = vsel %vm662_vm1, %v865_v61, -inf }
 0x30d   : > { %877 = vmax.xlane.f32.xlu1 %v876_v62 }
 0x313   : > { %v867_v63 = vpop.f32.mrf.mxu1 }
 0x314   : > { %v879_v0 = vsel %vm662_vm1, %v867_v63, -inf }
 0x315   : > { %880 = vmax.xlane.f32.xlu2 %v879_v0 }
 0x326   : > { %918 = vrot.lane.b32.xlu1 %v2499_v49, %s2186_s14 }
 0x32d   : > { %916 = vrot.lane.b32.xlu2 %v2494_v42, %s2186_s14  ;;  %s2847_s14 = scalar_lea.vmem %s2807_s6, %s2388_s0 }
 0x32e   : > { %953 = vrot.lane.b32.xlu1 %v2494_v42, %s2185_s15 }
 0x335   : > { %951 = vrot.lane.b32.xlu2 %v2501_v50, %s2187_s23 }
 0x33d   : > { %1187 = vrot.lane.b32.xlu2 %v2499_v49, %s2188_s17 }
 0x345   : > { %1069 = vrot.lane.b32.xlu2 %v2494_v42, %s2189_s24 }
 0x34d   : > { %1065 = vrot.lane.b32.xlu2 %v2496_v23, %s2190_s22 }
 0x355   : > { %1067 = vrot.lane.b32.xlu2 %v2501_v50, %s2190_s22 }
 0x370   : > { %v872_v1 = vpop.xlane.xlu1 %871 }
 0x371   : > { %v882_v2 = vsub.f32 %v860_v57, %v872_v1 }
 0x373   : > { %v886_v3 = vmul.f32 1.442695, %v882_v2 }
 0x375   : > { %2005 = vpow2.f32 %v886_v3 }
 0x378   : > { %v875_v4 = vpop.xlane.xlu1 %874 }
 0x379   : > { %v883_v5 = vsub.f32 %v862_v59, %v875_v4 }
 0x37b   : > { %v2006_v6 = vpop.eup %2005  ;;  %v888_v7 = vmul.f32 1.442695, %v883_v5 }
 0x37c   : > { %v894_v8 = vsel %vm662_vm1, %v2006_v6, 0.0 }
 0x37d   : > { %2007 = vpow2.f32 %v888_v7  ;;  %895 = vadd.xlane.f32.xlu1 %v894_v8 }
 0x380   : > { %v878_v9 = vpop.xlane.xlu1 %877 }
 0x381   : > { %v884_v10 = vsub.f32 %v865_v61, %v878_v9 }
 0x383   : > { %v2008_v11 = vpop.eup %2007  ;;  %v890_v12 = vmul.f32 1.442695, %v884_v10 }
 0x384   : > { %v897_v13 = vsel %vm662_vm1, %v2008_v11, 0.0 }
 0x385   : > { %2009 = vpow2.f32 %v890_v12  ;;  %898 = vadd.xlane.f32.xlu0 %v897_v13 }
 0x388   : > { %v881_v14 = vpop.xlane.xlu2 %880 }
 0x389   : > { %v885_v26 = vsub.f32 %v867_v63, %v881_v14 }
 0x38b   : > { %v2010_v15 = vpop.eup %2009  ;;  %v892_v27 = vmul.f32 1.442695, %v885_v26 }
 0x38c   : > { %v900_v16 = vsel %vm662_vm1, %v2010_v15, 0.0 }
 0x38d   : > { %901 = vadd.xlane.f32.xlu0 %v900_v16  ;;  %2011 = vpow2.f32 %v892_v27 }
 0x390   : > { %v917_v17 = vpop.permute.xlu2 %916 }
 0x393   : > { %v2012_v28 = vpop.eup %2011 }
 0x394   : > { %v903_v29 = vsel %vm662_vm1, %v2012_v28, 0.0 }
 0x396   : > { %949 = vrot.lane.b32.xlu1 %v2496_v23, %s2187_s23 }
 0x398   : > { %v919_v19 = vpop.permute.xlu1 %918  ;;  %v952_v20 = vpop.permute.xlu2 %951 }
 0x399   : > { %934 = vmatpush.bf16.msra.mxu2 %v919_v19 }
 0x39d   : > { %935 = vmatpush.bf16.msra.mxu2 %v917_v17 }
 0x3a0   : > { %v954_v21 = vpop.permute.xlu1 %953  ;;  %v1188_v22 = vpop.permute.xlu2 %1187 }
 0x3a1   : > { %1071 = vrot.lane.b32.xlu0 %v2499_v49, %s2189_s24  ;;  %v964_v24 = vsel %vm838_vm15, %v954_v21, 0  ;;  %v1199_v25 = vsel %vm838_vm15, %v1188_v22, 0 }
 0x3a2   : > { %976 = vmatpush.bf16.xpose.msra.mxu3 %v964_v24 }
 0x3a8   : > { %v1070_v33 = vpop.permute.xlu2 %1069 }
 0x3a9   : > { %1185 = vrot.lane.b32.xlu0 %v2494_v42, %s2188_s17  ;;  %v1080_v43 = vsel %vm838_vm15, %v1070_v33, 0 }
 0x3aa   : > { %1207 = vmatpush.bf16.xpose.msrb.mxu3 %v1199_v25 }
 0x3b0   : > { %v1066_v54 = vpop.permute.xlu2 %1065 }
 0x3b1   : > { %1181 = vrot.lane.b32.xlu0 %v2496_v23, %s2191_s5 }
 0x3b8   : > { %v1068_v55 = vpop.permute.xlu2 %1067 }
 0x3b9   : > { %1183 = vrot.lane.b32.xlu0 %v2501_v50, %s2191_s5  ;;  %s2849_s5 = sld [smem:[#allocation18_spill]] (!%p1879_p11) }
 0x3c0   : > { %904 = vadd.xlane.f32.xlu1 %v903_v29 }
 0x3f0   : > { %v896_v30 = vpop.xlane.xlu1 %895 }
 0x3f1   : > { %2013 = vrcp.f32 %v896_v30 }
 0x3f7   : > { %v2014_v32 = vpop.eup %2013 }
 0x3f8   : > { %v899_v31 = vpop.xlane.xlu0 %898  ;;  %v910_v35 = vmul.f32 %v2014_v32, %v2006_v6 }
 0x3f9   : > { %2015 = vrcp.f32 %v899_v31 }
 0x3ff   : > { %v2016_v34 = vpop.eup %2015 }
 0x400   : > { %v911_v36 = vmul.f32 %v2016_v34, %v2008_v11  ;;  %v902_v39 = vpop.xlane.xlu0 %901 }
 0x401   : > { %2017 = vrcp.f32 %v902_v39 }
 0x402   : > { %v914_v37 = vpack.c.bf16 %v911_v36, %v910_v35 }
 0x404   : > { %1827 = vmatmul.msk.bf16.vlgmr.msra.gmra.mxu2 %vm662_vm1, %v914_v37 }
 0x407   : > { %v2018_v47 = vpop.eup %2017 }
 0x408   : > { %v950_v38 = vpop.permute.xlu1 %949  ;;  %v912_v51 = vmul.f32 %v2018_v47, %v2010_v15 }
 0x409   : > { %1829 = vmatmul.msk.bf16.vlgmr.msra.gmra.mxu3 %vm838_vm15, %v950_v38 }
 0x413   : > { %v1072_v40 = vpop.permute.xlu0 %1071 }
 0x414   : > { %v1083_v41 = vsel %vm838_vm15, %v1072_v40, 0 }
 0x415   : > { %1091 = vmatpush.bf16.xpose.msrb.mxu2 %v1083_v41 }
 0x419   : > { %1830 = vmatmul.msk.bf16.gmra.mxu3 %vm838_vm15, %v952_v20 }
 0x41b   : > { %v1186_v23 = vpop.permute.xlu0 %1185 }
 0x41c   : > { %v1196_v44 = vsel %vm838_vm15, %v1186_v23, 0 }
 0x41d   : > { %1092 = vmatpush.bf16.xpose.msrb.mxu2 %v1080_v43  ;;  %1208 = vmatpush.bf16.xpose.msrb.mxu3 %v1196_v44 }
 0x423   : > { %v1182_v45 = vpop.permute.xlu0 %1181 }
 0x429   : > { %1837 = vmatmul.msk.bf16.vlgmr.msrb.gmra.mxu3 %vm838_vm15, %v1182_v45 }
 0x42b   : > { %v1184_v48 = vpop.permute.xlu0 %1183 }
 0x433   : > { %v905_v46 = vpop.xlane.xlu1 %904 }
 0x434   : > { %2019 = vrcp.f32 %v905_v46 }
 0x439   : > { %1838 = vmatmul.msk.bf16.gmra.mxu3 %vm838_vm15, %v1184_v48 }
 0x43a   : > { %v2020_v50 = vpop.eup %2019 }
 0x43b   : > { %v913_v52 = vmul.f32 %v2020_v50, %v2012_v28 }
 0x43d   : > { %v915_v53 = vpack.c.bf16 %v913_v52, %v912_v51 }
 0x43f   : > { %1828 = vmatmul.msk.bf16.gmra.mxu2 %vm662_vm1, %v915_v53 }
 0x44f   : > { %1833 = vmatmul.msk.bf16.vlgmr.msrb.gmra.mxu2 %vm838_vm15, %v1066_v54 }
 0x45f   : > { %1834 = vmatmul.msk.bf16.gmra.mxu2 %vm838_vm15, %v1068_v55 }
 0x487   : > { %v2571_v8 = vpop.f32.mrf.mxu2 }
 0x48c   : > { %v978_v56 = vpop.f32.mrf.mxu3 }
 0x48d   : > { %v988_v57 = vsel %vm662_vm1, %v978_v56, -inf }
 0x48e   : > { %989 = vmax.xlane.f32.xlu1 %v988_v57 }
 0x48f   : > { %v2573_v9 = vpop.f32.mrf.mxu2 }
 0x494   : > { %v980_v58 = vpop.f32.mrf.mxu3 }
 0x495   : > { %v991_v59 = vsel %vm662_vm1, %v980_v58, -inf }
 0x496   : > { %992 = vmax.xlane.f32.xlu2 %v991_v59 }
 0x49c   : > { %v983_v60 = vpop.f32.mrf.mxu3 }
 0x49d   : > { %v994_v61 = vsel %vm662_vm1, %v983_v60, -inf }
 0x49e   : > { %995 = vmax.xlane.f32.xlu0 %v994_v61 }
 0x4a4   : > { %v985_v62 = vpop.f32.mrf.mxu3 }
 0x4a5   : > { %v997_v63 = vsel %vm662_vm1, %v985_v62, -inf }
 0x4a6   : > { %998 = vmax.xlane.f32.xlu1 %v997_v63 }
 0x4ac   : > { %v1210_v0 = vpop.f32.mrf.mxu3 }
 0x4ad   : > { %v1220_v1 = vsel %vm662_vm1, %v1210_v0, -inf }
 0x4ae   : > { %1221 = vmax.xlane.f32.xlu1 %v1220_v1 }
 0x4b4   : > { %v2559_v2 = vpop.f32.mrf.mxu3 }
 0x4b5   : > { %v1223_v3 = vsel %vm662_vm1, %v2559_v2, -inf }
 0x4b6   : > { %1224 = vmax.xlane.f32.xlu1 %v1223_v3 }
 0x4bc   : > { %v2563_v4 = vpop.f32.mrf.mxu3 }
 0x4bd   : > { %v1226_v5 = vsel %vm662_vm1, %v2563_v4, -inf }
 0x4be   : > { %1227 = vmax.xlane.f32.xlu0 %v1226_v5 }
 0x4c2   : > { %v2575_v10 = vpop.f32.mrf.mxu2 }
 0x4c4   : > { %v2567_v6 = vpop.f32.mrf.mxu3 }
 0x4c5   : > { %v1229_v7 = vsel %vm662_vm1, %v2567_v6, -inf }
 0x4c6   : > { %1230 = vmax.xlane.f32.xlu2 %v1229_v7 }
 0x4ca   : > { %v2579_v11 = vpop.f32.mrf.mxu2 }
 0x4d2   : > { %v2581_v12 = vpop.f32.mrf.mxu2 }
 0x4d3   : > { %v1104_v30 = vsel %vm662_vm1, %v2581_v12, -inf }
 0x4da   : > { %v2583_v13 = vpop.f32.mrf.mxu2 }
 0x4db   : > { %v1107_v37 = vsel %vm662_vm1, %v2583_v13, -inf }
 0x4de   : > { %1036 = vrot.lane.b32.xlu2 %v2499_v49, %s2192_s19 }
 0x4e2   : > { %v1099_v16 = vpop.f32.mrf.mxu2 }
 0x4e3   : > { %v1110_v19 = vsel %vm662_vm1, %v1099_v16, -inf }
 0x4ea   : > { %v2602_v40 = vpop.f32.mrf.mxu2 }
 0x4eb   : > { %v1113_v43 = vsel %vm662_vm1, %v2602_v40, -inf }
 0x501   : > { %v990_v14 = vpop.xlane.xlu1 %989 }
 0x502   : > { %v1000_v15 = vsub.f32 %v978_v56, %v990_v14 }
 0x504   : > { %v1004_v17 = vmul.f32 1.442695, %v1000_v15 }
 0x506   : > { %2021 = vpow2.f32 %v1004_v17 }
 0x507   : > { %1111 = vmax.xlane.f32.xlu2 %v1110_v19 }
 0x509   : > { %v993_v20 = vpop.xlane.xlu2 %992 }
 0x50a   : > { %v1001_v21 = vsub.f32 %v980_v58, %v993_v20 }
 0x50c   : > { %v2586_v22 = vpop.eup %2021  ;;  %v1006_v24 = vmul.f32 1.442695, %v1001_v21 }
 0x50d   : > { %v1012_v25 = vsel %vm662_vm1, %v2586_v22, 0.0 }
 0x50e   : > { %2023 = vpow2.f32 %v1006_v24  ;;  %1013 = vadd.xlane.f32.xlu1 %v1012_v25 }
 0x511   : > { %v996_v26 = vpop.xlane.xlu0 %995 }
 0x512   : > { %v1002_v27 = vsub.f32 %v983_v60, %v996_v26 }
 0x514   : > { %v2590_v28 = vpop.eup %2023  ;;  %v1008_v29 = vmul.f32 1.442695, %v1002_v27 }
 0x515   : > { %v1015_v31 = vsel %vm662_vm1, %v2590_v28, 0.0 }
 0x516   : > { %2025 = vpow2.f32 %v1008_v29  ;;  %1105 = vmax.xlane.f32.xlu1 %v1104_v30  ;;  %1016 = vadd.xlane.f32.xlu0 %v1015_v31 }
 0x519   : > { %v999_v32 = vpop.xlane.xlu1 %998 }
 0x51a   : > { %v1003_v34 = vsub.f32 %v985_v62, %v999_v32 }
 0x51c   : > { %v2596_v35 = vpop.eup %2025  ;;  %v1010_v36 = vmul.f32 1.442695, %v1003_v34 }
 0x51d   : > { %v1018_v38 = vsel %vm662_vm1, %v2596_v35, 0.0 }
 0x51e   : > { %2027 = vpow2.f32 %v1010_v36  ;;  %1108 = vmax.xlane.f32.xlu1 %v1107_v37  ;;  %1019 = vadd.xlane.f32.xlu0 %v1018_v38 }
 0x521   : > { %v1222_v39 = vpop.xlane.xlu1 %1221 }
 0x522   : > { %v1232_v41 = vsub.f32 %v1210_v0, %v1222_v39 }
 0x524   : > { %v2604_v33 = vpop.eup %2027  ;;  %v1236_v23 = vmul.f32 1.442695, %v1232_v41 }
 0x525   : > { %v1021_v44 = vsel %vm662_vm1, %v2604_v33, 0.0 }
 0x526   : > { %2029 = vpow2.f32 %v1236_v23  ;;  %1114 = vmax.xlane.f32.xlu1 %v1113_v43  ;;  %1022 = vadd.xlane.f32.xlu0 %v1021_v44 }
 0x529   : > { %v1225_v50 = vpop.xlane.xlu1 %1224 }
 0x52a   : > { %v1233_v51 = vsub.f32 %v2559_v2, %v1225_v50 }
 0x52c   : > { %v2610_v45 = vpop.eup %2029  ;;  %v1238_v52 = vmul.f32 1.442695, %v1233_v51 }
 0x52d   : > { %v1244_v46 = vsel %vm662_vm1, %v2610_v45, 0.0 }
 0x52e   : > { %1245 = vadd.xlane.f32.xlu0 %v1244_v46  ;;  %2031 = vpow2.f32 %v1238_v52 }
 0x531   : > { %v1228_v55 = vpop.xlane.xlu0 %1227 }
 0x532   : > { %v1234_v58 = vsub.f32 %v2563_v4, %v1228_v55 }
 0x534   : > { %v2621_v53 = vpop.eup %2031  ;;  %v1240_v60 = vmul.f32 1.442695, %v1234_v58 }
 0x535   : > { %v1247_v54 = vsel %vm662_vm1, %v2621_v53, 0.0 }
 0x539   : > { %v1231_v47 = vpop.xlane.xlu2 %1230 }
 0x53a   : > { %v1235_v62 = vsub.f32 %v2567_v6, %v1231_v47 }
 0x53c   : > { %v1242_v0 = vmul.f32 1.442695, %v1235_v62 }
 0x53f   : > { %1034 = vrot.lane.b32.xlu1 %v2494_v42, %s2192_s19 }
 0x541   : > { %v1037_v48 = vpop.permute.xlu2 %1036 }
 0x542   : > { %1052 = vmatpush.bf16.msrb.mxu0 %v1037_v48  ;;  %1152 = vrot.lane.b32.xlu0 %v2499_v49, %s2193_s11 }
 0x54a   : > { %1268 = vrot.lane.b32.xlu0 %v2499_v49, %s2194_s12 }
 0x569   : > { %1248 = vadd.xlane.f32.xlu1 %v1247_v54 }
 0x57a   : > { %v1112_v56 = vpop.xlane.xlu2 %1111 }
 0x57b   : > { %v1118_v57 = vsub.f32 %v1099_v16, %v1112_v56 }
 0x57d   : > { %v1124_v59 = vmul.f32 1.442695, %v1118_v57 }
 0x57f   : > { %2033 = vpow2.f32 %v1124_v59 }
 0x580   : > { %2035 = vpow2.f32 %v1240_v60 }
 0x581   : > { %v1014_v49 = vpop.xlane.xlu1 %1013  ;;  %2037 = vpow2.f32 %v1242_v0 }
 0x585   : > { %v2626_v61 = vpop.eup %2033 }
 0x586   : > { %v1134_v63 = vsel %vm662_vm1, %v2626_v61, 0.0  ;;  %v2632_v3 = vpop.eup %2035 }
 0x587   : > { %1135 = vadd.xlane.f32.xlu1 %v1134_v63  ;;  %v1250_v7 = vsel %vm662_vm1, %v2632_v3, 0.0  ;;  %v2637_v15 = vpop.eup %2037 }
 0x588   : > { %v1253_v19 = vsel %vm662_vm1, %v2637_v15, 0.0 }
 0x589   : > { %v1106_v1 = vpop.xlane.xlu1 %1105  ;;  %v1017_v5 = vpop.xlane.xlu0 %1016 }
 0x58a   : > { %v1116_v2 = vsub.f32 %v2581_v12, %v1106_v1 }
 0x58c   : > { %v1120_v4 = vmul.f32 1.442695, %v1116_v2 }
 0x58e   : > { %2039 = vpow2.f32 %v1120_v4 }
 0x58f   : > { %1251 = vadd.xlane.f32.xlu1 %v1250_v7 }
 0x591   : > { %v1109_v14 = vpop.xlane.xlu1 %1108  ;;  %v1020_v20 = vpop.xlane.xlu0 %1019 }
 0x592   : > { %v1117_v6 = vsub.f32 %v2583_v13, %v1109_v14 }
 0x594   : > { %v2639_v16 = vpop.eup %2039  ;;  %v1122_v17 = vmul.f32 1.442695, %v1117_v6 }
 0x595   : > { %v1128_v12 = vsel %vm662_vm1, %v2639_v16, 0.0 }
 0x596   : > { %2041 = vpow2.f32 %v1122_v17  ;;  %1129 = vadd.xlane.f32.xlu0 %v1128_v12 }
 0x597   : > { %1254 = vadd.xlane.f32.xlu1 %v1253_v19  ;;  %2043 = vrcp.f32 %v1017_v5 }
 0x598   : > { %2045 = vrcp.f32 %v1014_v49 }
 0x599   : > { %v1023_v13 = vpop.xlane.xlu0 %1022  ;;  %v1115_v25 = vpop.xlane.xlu1 %1114 }
 0x59a   : > { %2047 = vrcp.f32 %v1023_v13  ;;  %v1119_v41 = vsub.f32 %v2602_v40, %v1115_v25 }
 0x59b   : > { %2049 = vrcp.f32 %v1020_v20 }
 0x59c   : > { %v2042_v21 = vpop.eup %2041  ;;  %v1126_v43 = vmul.f32 1.442695, %v1119_v41 }
 0x59d   : > { %v1131_v24 = vsel %vm662_vm1, %v2042_v21, 0.0  ;;  %v2044_v26 = vpop.eup %2043 }
 0x59e   : > { %1132 = vadd.xlane.f32.xlu2 %v1131_v24  ;;  %v2046_v29 = vpop.eup %2045  ;;  %v1029_v30 = vmul.f32 %v2044_v26, %v2590_v28  ;;  %2051 = vpow2.f32 %v1126_v43 }
 0x59f   : > { %v1028_v31 = vmul.f32 %v2046_v29, %v2586_v22 }
 0x5a0   : > { %v2048_v37 = vpop.eup %2047 }
 0x5a1   : > { %v1246_v27 = vpop.xlane.xlu0 %1245  ;;  %v1032_v34 = vpack.c.bf16 %v1029_v30, %v1028_v31  ;;  %v2050_v39 = vpop.eup %2049  ;;  %v1031_v28 = vmul.f32 %v2048_v37, %v2604_v33 }
 0x5a2   : > { %v1030_v22 = vmul.f32 %v2050_v39, %v2596_v35 }
 0x5a4   : > { %v1033_v23 = vpack.c.bf16 %v1031_v28, %v1030_v22  ;;  %v2052_v44 = vpop.eup %2051 }
 0x5a5   : > { %v1137_v46 = vsel %vm662_vm1, %v2052_v44, 0.0 }
 0x5aa   : > { %1150 = vrot.lane.b32.xlu0 %v2494_v42, %s2193_s11 }
 0x5b1   : > { %v1035_v32 = vpop.permute.xlu1 %1034 }
 0x5b2   : > { %1053 = vmatpush.bf16.msrb.mxu0 %v1035_v32 }
 0x5b4   : > { %v1153_v36 = vpop.permute.xlu0 %1152 }
 0x5b5   : > { %1831 = vmatmul.msk.bf16.vlgmr.msrb.gmra.mxu0 %vm662_vm1, %v1032_v34  ;;  %1168 = vmatpush.bf16.msrb.mxu1 %v1153_v36  ;;  %v1889_v34 = vld [vmem:[%s2374_s13 + $0x8] sm:$0xff]  ;;  %v1888_v36 = vld [vmem:[%s2374_s13] sm:$0xff] }
 0x5b6   : > { %1266 = vrot.lane.b32.xlu2 %v2494_v42, %s2194_s12  ;;  %1388 = vmatpush.bf16.msra.mxu2 %v1889_v34 }
 0x5ba   : > { %1389 = vmatpush.bf16.msra.mxu2 %v1888_v36 }
 0x5bc   : > { %v1269_v38 = vpop.permute.xlu0 %1268 }
 0x5bd   : > { %1284 = vmatpush.bf16.msra.mxu0 %v1269_v38 }
 0x5c5   : > { %1832 = vmatmul.msk.bf16.gmra.mxu0 %vm662_vm1, %v1033_v23 }
 0x5d4   : > { %1138 = vadd.xlane.f32.xlu0 %v1137_v46 }
 0x5dc   : > { %v1249_v42 = vpop.xlane.xlu1 %1248 }
 0x5dd   : > { %2053 = vrcp.f32 %v1249_v42 }
 0x5de   : > { %2055 = vrcp.f32 %v1246_v27 }
 0x5e3   : > { %v2054_v35 = vpop.eup %2053 }
 0x5e4   : > { %v2056_v40 = vpop.eup %2055  ;;  %v1261_v51 = vmul.f32 %v2054_v35, %v2621_v53 }
 0x5e5   : > { %v1260_v55 = vmul.f32 %v2056_v40, %v2610_v45 }
 0x5e7   : > { %v1264_v58 = vpack.c.bf16 %v1261_v51, %v1260_v55 }
 0x5fa   : > { %v1136_v47 = vpop.xlane.xlu1 %1135 }
 0x602   : > { %v1252_v50 = vpop.xlane.xlu1 %1251 }
 0x609   : > { %v1130_v48 = vpop.xlane.xlu0 %1129 }
 0x60a   : > { %v1255_v59 = vpop.xlane.xlu1 %1254 }
 0x611   : > { %v1133_v33 = vpop.xlane.xlu2 %1132 }
 0x612   : > { %2057 = vrcp.f32 %v1133_v33 }
 0x613   : > { %2059 = vrcp.f32 %v1130_v48 }
 0x614   : > { %2061 = vrcp.f32 %v1255_v59 }
 0x615   : > { %2063 = vrcp.f32 %v1252_v50 }
 0x616   : > { %2065 = vrcp.f32 %v1136_v47 }
 0x618   : > { %v2058_v52 = vpop.eup %2057 }
 0x619   : > { %v2060_v54 = vpop.eup %2059  ;;  %v1267_v56 = vpop.permute.xlu2 %1266  ;;  %v1145_v57 = vmul.f32 %v2058_v52, %v2042_v21 }
 0x61a   : > { %1285 = vmatpush.bf16.msra.mxu0 %v1267_v56  ;;  %v1144_v60 = vmul.f32 %v2060_v54, %v2639_v16  ;;  %v2062_v53 = vpop.eup %2061 }
 0x61b   : > { %v2064_v63 = vpop.eup %2063  ;;  %v1263_v45 = vmul.f32 %v2062_v53, %v2637_v15 }
 0x61c   : > { %v1151_v49 = vpop.permute.xlu0 %1150  ;;  %v1148_v62 = vpack.c.bf16 %v1145_v57, %v1144_v60  ;;  %v1262_v0 = vmul.f32 %v2064_v63, %v2632_v3  ;;  %v2066_v14 = vpop.eup %2065 }
 0x61d   : > { %1169 = vmatpush.bf16.msrb.mxu1 %v1151_v49  ;;  %1839 = vmatmul.msk.bf16.vlgmr.msra.gmra.mxu0 %vm662_vm1, %v1264_v58  ;;  %v1146_v16 = vmul.f32 %v2066_v14, %v2626_v61 }
 0x61e   : > { %v1265_v1 = vpack.c.bf16 %v1263_v45, %v1262_v0  ;;  %v2077_v0 = vld [vmem:[#allocation2] sm:$0xff] }
 0x620   : > { %1835 = vmatmul.msk.bf16.vlgmr.msrb.gmra.mxu1 %vm662_vm1, %v1148_v62 }
 0x62d   : > { %1840 = vmatmul.msk.bf16.gmra.mxu0 %vm662_vm1, %v1265_v1 }
 0x632   : > { %v1055_v2 = vpop.f32.mrf.mxu0 }
 0x63a   : > { %v1057_v4 = vpop.f32.mrf.mxu0 }
 0x63b   : > { %v1957_v5 = vpack.i.bf16 %v1057_v4, %v1055_v2 }
 0x63d   : > { %1958 = vrot.lane.b32.xlu2 %v1957_v5, %s2195_s18 }
 0x642   : > { %v1060_v3 = vpop.f32.mrf.mxu0 }
 0x647   : > { %v1139_v7 = vpop.xlane.xlu0 %1138 }
 0x648   : > { %2067 = vrcp.f32 %v1139_v7  ;;  %v2078_v7 = vld [vmem:[#allocation2 + $0x8] sm:$0xff] }
 0x64a   : > { %v1062_v15 = vpop.f32.mrf.mxu0 }
 0x64b   : > { %v1972_v61 = vpack.i.bf16 %v1062_v15, %v1060_v3 }
 0x64e   : > { %v2068_v6 = vpop.eup %2067 }
 0x64f   : > { %v1147_v17 = vmul.f32 %v2068_v6, %v2052_v44 }
 0x651   : > { %v1149_v12 = vpack.c.bf16 %v1147_v17, %v1146_v16 }
 0x653   : > { %1836 = vmatmul.msk.bf16.gmra.mxu1 %vm662_vm1, %v1149_v12  ;;  %v2079_v12 = vld [vmem:[#allocation2 + $0x10] sm:$0xff] }
 0x697   : > { %v1959_v37 = vpop.permute.xlu2 %1958 }
 0x698   : > { %v1961_v38 = vunpack.i.h.bf16 %v1959_v37  ;;  %v1960_v39 = vunpack.i.l.bf16 %v1959_v37 }
 0x69a   : > { %v1287_v19 = vpop.f32.mrf.mxu0  ;;  %v1346_v43 = vsel %vm838_vm15, %v2573_v9, %v1961_v38  ;;  %v1345_v44 = vsel %vm838_vm15, %v2571_v8, %v1960_v39 }
 0x69d   : > { %v1171_v20 = vpop.f32.mrf.mxu1 }
 0x6a2   : > { %v1289_v21 = vpop.f32.mrf.mxu0 }
 0x6a3   : > { %v1967_v24 = vpack.i.bf16 %v1289_v21, %v1287_v19  ;;  %v2080_v21 = vld [vmem:[#allocation2 + $0x18] sm:$0xff] }
 0x6a5   : > { %1968 = vrot.lane.b32.xlu2 %v1967_v24, %s2196_s21  ;;  %v1173_v13 = vpop.f32.mrf.mxu1 }
 0x6a6   : > { %v1962_v25 = vpack.i.bf16 %v1173_v13, %v1171_v20 }
 0x6a8   : > { %1963 = vrot.lane.b32.xlu1 %v1962_v25, %s2197_s27 }
 0x6aa   : > { %v1292_v26 = vpop.f32.mrf.mxu0 }
 0x6ad   : > { %1973 = vrot.lane.b32.xlu2 %v1972_v61, %s2195_s18 }
 0x6b2   : > { %v1294_v27 = vpop.f32.mrf.mxu0 }
 0x6b3   : > { %v1982_v29 = vpack.i.bf16 %v1294_v27, %v1292_v26 }
 0x6b5   : > { %1983 = vrot.lane.b32.xlu2 %v1982_v29, %s2196_s21 }
 0x6d0   : > { %v1176_v30 = vpop.f32.mrf.mxu1 }
 0x6d8   : > { %v1178_v31 = vpop.f32.mrf.mxu1 }
 0x6d9   : > { %v1977_v32 = vpack.i.bf16 %v1178_v31, %v1176_v30 }
 0x6db   : > { %1978 = vrot.lane.b32.xlu0 %v1977_v32, %s2197_s27 }
 0x6ff   : > { %v1969_v28 = vpop.permute.xlu2 %1968 }
 0x700   : > { %v1971_v46 = vunpack.i.h.bf16 %v1969_v28  ;;  %v1970_v42 = vunpack.i.l.bf16 %v1969_v28 }
 0x707   : > { %v1974_v40 = vpop.permute.xlu2 %1973 }
 0x708   : > { %v1976_v51 = vunpack.i.h.bf16 %v1974_v40  ;;  %v1975_v9 = vunpack.i.l.bf16 %v1974_v40 }
 0x70a   : > { %v1348_v56 = vsel %vm838_vm15, %v2579_v11, %v1976_v51  ;;  %v1347_v57 = vsel %vm838_vm15, %v2575_v10, %v1975_v9  ;;  %v1990_v11 = vld [vmem:[%s2847_s14] ss:$0 sm:$0xff]  ;;  %vm1598_vm15 = vcmask 523264  }
 0x70f   : > { %v1984_v52 = vpop.permute.xlu2 %1983 }
 0x710   : > { %v1986_v58 = vunpack.i.h.bf16 %v1984_v52  ;;  %v1985_v59 = vunpack.i.l.bf16 %v1984_v52 }
 0x71a   : > { %v1964_v22 = vpop.permute.xlu1 %1963 }
 0x71b   : > { %v1966_v41 = vunpack.i.h.bf16 %v1964_v22  ;;  %v1965_v23 = vunpack.i.l.bf16 %v1964_v22 }
 0x71d   : > { %v1351_v47 = vsel %vm1349_vm0, %v1346_v43, %v1966_v41  ;;  %v1350_v48 = vsel %vm1349_vm0, %v1345_v44, %v1965_v23 }
 0x71e   : > { %v1356_v50 = vsel %vm1354_vm2, %v1351_v47, %v1971_v46  ;;  %v1355_v33 = vsel %vm1354_vm2, %v1350_v48, %v1970_v42  ;;  %v1891_v42 = vld [vmem:[%s2380_s25 + $0x8] sm:$0xff] }
 0x71f   : > { %v1359_v35 = vpack.c.bf16 %v1356_v50, %v1355_v33  ;;  %1552 = vmatpush.bf16.msra.mxu1 %v1891_v42  ;;  %v1890_v50 = vld [vmem:[%s2380_s25] sm:$0xff]  ;;  %v1895_v42 = vld [vmem:[%s2428_s3 + $0x18] sm:$0xff] }
 0x720   : > { %1609 = vmatpush.bf16.msra.mxu3 %v1895_v42 }
 0x721   : > { %1849 = vmatmul.msk.bf16.vlgmr.msra.gmra.mxu2 %vm662_vm1, %v1359_v35 }
 0x723   : > { %1553 = vmatpush.bf16.msra.mxu1 %v1890_v50 }
 0x74d   : > { %v1979_v54 = vpop.permute.xlu0 %1978 }
 0x74e   : > { %v1981_v8 = vunpack.i.h.bf16 %v1979_v54  ;;  %v1980_v55 = vunpack.i.l.bf16 %v1979_v54 }
 0x750   : > { %v1353_v60 = vsel %vm1349_vm0, %v1348_v56, %v1981_v8  ;;  %v1352_v49 = vsel %vm1349_vm0, %v1347_v57, %v1980_v55 }
 0x751   : > { %v1357_v62 = vsel %vm1354_vm2, %v1352_v49, %v1985_v59  ;;  %v1358_v53 = vsel %vm1354_vm2, %v1353_v60, %v1986_v58 }
 0x752   : > { %v1360_v63 = vpack.c.bf16 %v1358_v53, %v1357_v62  ;;  %v1991_v53 = vld [vmem:[%s627_s16] ss:$0 sm:$0xff] }
 0x754   : > { %1850 = vmatmul.msk.bf16.gmra.mxu2 %vm662_vm1, %v1360_v63 }
 0x7a4   : > { %v1391_v45 = vpop.f32.mrf.mxu2 }
 0x7a5   : > { %v1392_v10 = vadd.f32 %v1990_v11, %v1391_v45 }
 0x7a7   : > { %v2693_v1 = vadd.f32 %v2077_v0, %v1392_v10  ;;  %v1992_v10 = vld [vmem:[%s630_s30] ss:$0 sm:$0xff] }
 0x7a9   : > { %v1407_v2 = vsel %vm662_vm1, %v2693_v1, 0.0 }
 0x7aa   : > { %1408 = vadd.xlane.f32.xlu1 %v1407_v2 }
 0x7ac   : > { %v1393_v4 = vpop.f32.mrf.mxu2 }
 0x7ad   : > { %v1394_v5 = vadd.f32 %v1990_v11, %v1393_v4 }
 0x7af   : > { %v2697_v14 = vadd.f32 %v2078_v7, %v1394_v5 }
 0x7b1   : > { %v1410_v6 = vsel %vm662_vm1, %v2697_v14, 0.0 }
 0x7b2   : > { %1411 = vadd.xlane.f32.xlu2 %v1410_v6 }
 0x7d7   : > { %v1396_v16 = vpop.f32.mrf.mxu2 }
 0x7d8   : > { %v1397_v17 = vadd.f32 %v1990_v11, %v1396_v16 }
 0x7da   : > { %v2701_v3 = vadd.f32 %v2079_v12, %v1397_v17 }
 0x7dc   : > { %v1413_v15 = vsel %vm662_vm1, %v2701_v3, 0.0 }
 0x7dd   : > { %1414 = vadd.xlane.f32.xlu0 %v1413_v15 }
 0x7df   : > { %v1398_v19 = vpop.f32.mrf.mxu2 }
 0x7e0   : > { %v1399_v20 = vadd.f32 %v1990_v11, %v1398_v19 }
 0x7e2   : > { %v2705_v24 = vadd.f32 %v2080_v21, %v1399_v20 }
 0x7e4   : > { %v1416_v13 = vsel %vm662_vm1, %v2705_v24, 0.0 }
 0x7e5   : > { %1417 = vadd.xlane.f32.xlu1 %v1416_v13 }
 0x81d   : > { %v1409_v25 = vpop.xlane.xlu1 %1408 }
 0x81e   : > { %v1419_v26 = vmul.f32 %v1409_v25, %v2451_v18 }
 0x820   : > { %v1423_v61 = vsub.f32 %v2693_v1, %v1419_v26 }
 0x822   : > { %v1427_v27 = vmul.f32 %v1423_v61, %v1423_v61 }
 0x824   : > { %v1431_v29 = vsel %vm662_vm1, %v1427_v27, 0.0 }
 0x825   : > { %v1412_v30 = vpop.xlane.xlu2 %1411  ;;  %1432 = vadd.xlane.f32.xlu2 %v1431_v29 }
 0x826   : > { %v1420_v31 = vmul.f32 %v1412_v30, %v2451_v18 }
 0x828   : > { %v1424_v32 = vsub.f32 %v2697_v14, %v1420_v31 }
 0x82a   : > { %v1428_v34 = vmul.f32 %v1424_v32, %v1424_v32 }
 0x82c   : > { %v1434_v36 = vsel %vm662_vm1, %v1428_v34, 0.0 }
 0x82d   : > { %1435 = vadd.xlane.f32.xlu1 %v1434_v36 }
 0x850   : > { %v1415_v37 = vpop.xlane.xlu0 %1414 }
 0x851   : > { %v1421_v38 = vmul.f32 %v1415_v37, %v2451_v18 }
 0x853   : > { %v2717_v39 = vsub.f32 %v2701_v3, %v1421_v38 }
 0x855   : > { %v1429_v28 = vmul.f32 %v2717_v39, %v2717_v39 }
 0x857   : > { %v1437_v22 = vsel %vm662_vm1, %v1429_v28, 0.0 }
 0x858   : > { %v1418_v41 = vpop.xlane.xlu1 %1417  ;;  %1438 = vadd.xlane.f32.xlu2 %v1437_v22 }
 0x859   : > { %v1422_v23 = vmul.f32 %v1418_v41, %v2451_v18 }
 0x85b   : > { %v2724_v43 = vsub.f32 %v2705_v24, %v1422_v23 }
 0x85d   : > { %v1430_v44 = vmul.f32 %v2724_v43, %v2724_v43 }
 0x85f   : > { %v1440_v46 = vsel %vm662_vm1, %v1430_v44, 0.0 }
 0x860   : > { %1441 = vadd.xlane.f32.xlu0 %v1440_v46 }
 0x898   : > { %v1433_v47 = vpop.xlane.xlu2 %1432 }
 0x899   : > { %v1443_v48 = vmul.f32 %v1433_v47, %v2451_v18  ;;  %v1894_v47 = vld [vmem:[%s2428_s3 + $0x10] sm:$0xff] }
 0x89a   : > { %1610 = vmatpush.bf16.msra.mxu3 %v1894_v47 }
 0x89b   : > { %v1447_v33 = vadd.f32 1e-05, %v1443_v48  ;;  %v1892_v48 = vld [vmem:[%s2428_s3] sm:$0xff] }
 0x89d   : > { %2069 = vrsqrt.f32 %v1447_v33  ;;  %vm1457_vm4 = vweird.f32 %v1447_v33 }
 0x8a0   : > { %v1436_v35 = vpop.xlane.xlu1 %1435 }
 0x8a1   : > { %v1444_v40 = vmul.f32 %v1436_v35, %v2451_v18 }
 0x8a3   : > { %v2070_v51 = vpop.eup %2069  ;;  %v1448_v9 = vadd.f32 1e-05, %v1444_v40 }
 0x8a4   : > { %v1452_v52 = vmul.f32 %v2070_v51, %v1447_v33  ;;  %vm1458_vm3 = vweird.f32 %v2070_v51 }
 0x8a5   : > { %2071 = vrsqrt.f32 %v1448_v9  ;;  %vm1459_vm5 = vmor %vm1457_vm4, %vm1458_vm3  ;;  %vm1467_vm7 = vweird.f32 %v1448_v9 }
 0x8a6   : > { %v1453_v54 = vmul.f32 %v2070_v51, %v1452_v52 }
 0x8a8   : > { %v1454_v8 = vmul.f32 0.5, %v1453_v54 }
 0x8aa   : > { %v1455_v55 = vsub.f32 1.5, %v1454_v8 }
 0x8ab   : > { %v2072_v56 = vpop.eup %2071 }
 0x8ac   : > { %v1456_v57 = vmul.f32 %v2070_v51, %v1455_v55  ;;  %v1462_v58 = vmul.f32 %v2072_v56, %v1448_v9  ;;  %vm1468_vm6 = vweird.f32 %v2072_v56 }
 0x8ad   : > { %vm1469_vm8 = vmor %vm1467_vm7, %vm1468_vm6 }
 0x8ae   : > { %v1463_v59 = vmul.f32 %v2072_v56, %v1462_v58  ;;  %v1460_v60 = vsel %vm1459_vm5, %v2070_v51, %v1456_v57 }
 0x8af   : > { %v1491_v63 = vmul.f32 %v1460_v60, %v1423_v61  ;;  %v1994_v60 = vld [vmem:[%s641_s9] ss:$0 sm:$0xff] }
 0x8b0   : > { %v1464_v49 = vmul.f32 0.5, %v1463_v59 }
 0x8b1   : > { %v1498_v0 = vmul.f32 %v1991_v53, %v1491_v63 }
 0x8b2   : > { %v1465_v62 = vsub.f32 1.5, %v1464_v49 }
 0x8b3   : > { %v1505_v5 = vadd.f32 %v1992_v10, %v1498_v0 }
 0x8b4   : > { %v1466_v11 = vmul.f32 %v2072_v56, %v1465_v62 }
 0x8b6   : > { %v1470_v45 = vsel %vm1469_vm8, %v2072_v56, %v1466_v11 }
 0x8b7   : > { %v1492_v2 = vmul.f32 %v1470_v45, %v1424_v32 }
 0x8b9   : > { %v1499_v4 = vmul.f32 %v1991_v53, %v1492_v2 }
 0x8bb   : > { %v1506_v7 = vadd.f32 %v1992_v10, %v1499_v4 }
 0x8bd   : > { %v1523_v6 = vpack.c.bf16 %v1506_v7, %v1505_v5 }
 0x8bf   : > { %1859 = vmatmul.msk.bf16.vlgmr.msra.gmra.mxu1 %vm662_vm1, %v1523_v6 }
 0x8cb   : > { %v1439_v16 = vpop.xlane.xlu2 %1438 }
 0x8cc   : > { %v1445_v17 = vmul.f32 %v1439_v16, %v2451_v18 }
 0x8ce   : > { %v1449_v12 = vadd.f32 1e-05, %v1445_v17 }
 0x8d0   : > { %2073 = vrsqrt.f32 %v1449_v12  ;;  %vm1477_vm10 = vweird.f32 %v1449_v12 }
 0x8d3   : > { %v1442_v15 = vpop.xlane.xlu0 %1441 }
 0x8d4   : > { %v1446_v19 = vmul.f32 %v1442_v15, %v2451_v18 }
 0x8d6   : > { %v2074_v20 = vpop.eup %2073  ;;  %v1450_v21 = vadd.f32 1e-05, %v1446_v19 }
 0x8d7   : > { %v1472_v13 = vmul.f32 %v2074_v20, %v1449_v12  ;;  %vm1478_vm9 = vweird.f32 %v2074_v20 }
 0x8d8   : > { %2075 = vrsqrt.f32 %v1450_v21  ;;  %vm1479_vm11 = vmor %vm1477_vm10, %vm1478_vm9  ;;  %vm1487_vm13 = vweird.f32 %v1450_v21 }
 0x8d9   : > { %v1473_v25 = vmul.f32 %v2074_v20, %v1472_v13 }
 0x8db   : > { %v1474_v26 = vmul.f32 0.5, %v1473_v25 }
 0x8dd   : > { %v1475_v61 = vsub.f32 1.5, %v1474_v26 }
 0x8de   : > { %v2076_v27 = vpop.eup %2075 }
 0x8df   : > { %v1476_v29 = vmul.f32 %v2074_v20, %v1475_v61  ;;  %v1482_v30 = vmul.f32 %v2076_v27, %v1450_v21  ;;  %vm1488_vm12 = vweird.f32 %v2076_v27 }
 0x8e0   : > { %vm1489_vm14 = vmor %vm1487_vm13, %vm1488_vm12 }
 0x8e1   : > { %v1483_v31 = vmul.f32 %v2076_v27, %v1482_v30  ;;  %v1480_v32 = vsel %vm1479_vm11, %v2074_v20, %v1476_v29 }
 0x8e2   : > { %v1493_v18 = vmul.f32 %v1480_v32, %v2717_v39  ;;  %v1893_v39 = vld [vmem:[%s2428_s3 + $0x8] sm:$0xff] }
 0x8e3   : > { %v1484_v34 = vmul.f32 0.5, %v1483_v31  ;;  %1611 = vmatpush.bf16.msra.mxu3 %v1893_v39 }
 0x8e4   : > { %v1500_v22 = vmul.f32 %v1991_v53, %v1493_v18 }
 0x8e5   : > { %v1485_v36 = vsub.f32 1.5, %v1484_v34 }
 0x8e6   : > { %v1507_v23 = vadd.f32 %v1992_v10, %v1500_v22 }
 0x8e7   : > { %v1486_v37 = vmul.f32 %v2076_v27, %v1485_v36  ;;  %1612 = vmatpush.bf16.msra.mxu3 %v1892_v48 }
 0x8e9   : > { %v1490_v38 = vsel %vm1489_vm14, %v2076_v27, %v1486_v37 }
 0x8ea   : > { %v1494_v28 = vmul.f32 %v1490_v38, %v2724_v43  ;;  %v1993_v43 = vld [vmem:[%s633_s28] ss:$0 sm:$0xff] }
 0x8ec   : > { %v1501_v41 = vmul.f32 %v1991_v53, %v1494_v28 }
 0x8ee   : > { %v1508_v44 = vadd.f32 %v1992_v10, %v1501_v41 }
 0x8f0   : > { %v1524_v46 = vpack.c.bf16 %v1508_v44, %v1507_v23 }
 0x8f2   : > { %1860 = vmatmul.msk.bf16.gmra.mxu1 %vm662_vm1, %v1524_v46 }
 0x93c   : > { %v1555_v50 = vpop.f32.mrf.mxu1 }
 0x93d   : > { %v1556_v33 = vadd.f32 %v1993_v43, %v1555_v50 }
 0x93f   : > { %v1565_v51 = vmax.f32 %v1556_v33, 0.0 }
 0x944   : > { %v1557_v35 = vpop.f32.mrf.mxu1 }
 0x945   : > { %v1558_v40 = vadd.f32 %v1993_v43, %v1557_v35 }
 0x947   : > { %v1566_v9 = vmax.f32 %v1558_v40, 0.0 }
 0x949   : > { %v1569_v52 = vpack.c.bf16 %v1566_v9, %v1565_v51 }
 0x94b   : > { %1877 = vmatmul.msk.bf16.vlgmr.msra.gmra.mxu3 %vm1598_vm15, %v1569_v52 }
 0x96f   : > { %v1560_v54 = vpop.f32.mrf.mxu1 }
 0x970   : > { %v1561_v8 = vadd.f32 %v1993_v43, %v1560_v54 }
 0x972   : > { %v1567_v57 = vmax.f32 %v1561_v8, 0.0 }
 0x977   : > { %v1562_v55 = vpop.f32.mrf.mxu1 }
 0x978   : > { %v1563_v56 = vadd.f32 %v1993_v43, %v1562_v55 }
 0x97a   : > { %v1568_v58 = vmax.f32 %v1563_v56, 0.0 }
 0x97c   : > { %v1570_v59 = vpack.c.bf16 %v1568_v58, %v1567_v57 }
 0x97e   : > { %1878 = vmatmul.msk.bf16.gmra.mxu3 %vm1598_vm15, %v1570_v59 }
 0x9ce   : > { %v1614_v49 = vpop.f32.mrf.mxu3 }
 0x9cf   : > { %v1615_v62 = vadd.f32 %v1994_v60, %v1614_v49 }
 0x9d1   : > { %v1624_v53 = vadd.f32 %v1615_v62, %v2693_v1 }
 0x9d3   : > { %1628 = vst.msk [vmem:[#allocation2] sm:$0xff] %vm662_vm1, %v1624_v53 }
 0x9d6   : > { %v1616_v63 = vpop.f32.mrf.mxu3 }
 0x9d7   : > { %v1617_v11 = vadd.f32 %v1994_v60, %v1616_v63 }
 0x9d9   : > { %v1625_v45 = vadd.f32 %v1617_v11, %v2697_v14 }
 0x9db   : > { %1629 = vst.msk [vmem:[#allocation2 + $0x8] sm:$0xff] %vm662_vm1, %v1625_v45 }
 0xa01   : > { %v1619_v10 = vpop.f32.mrf.mxu3 }
 0xa02   : > { %v1620_v0 = vadd.f32 %v1994_v60, %v1619_v10 }
 0xa04   : > { %v1626_v2 = vadd.f32 %v1620_v0, %v2701_v3 }
 0xa06   : > { %1630 = vst.msk [vmem:[#allocation2 + $0x10] sm:$0xff] %vm662_vm1, %v1626_v2 }
 0xa09   : > { %v1621_v4 = vpop.f32.mrf.mxu3 }
 0xa0a   : > { %v1622_v5 = vadd.f32 %v1994_v60, %v1621_v4  ;;  %1635 = sbr.rel (%p1879_p11) target bundleno = 2579 (0xa13), region = 88 }
 0xa0c   : > { %v1627_v7 = vadd.f32 %v1622_v5, %v2705_v24 }
 0xa0e   : > { %1631 = vst.msk [vmem:[#allocation2 + $0x18] sm:$0xff] %vm662_vm1, %v1627_v7 }
 0xa0f   : > { %1636 = vst.msk [vmem:[%s2849_s5] sm:$0xff] %vm662_vm1, %v1624_v53 }
 0xa10   : > { %1637 = vst.msk [vmem:[%s2849_s5 + $0x8] sm:$0xff] %vm662_vm1, %v1625_v45 }
 0xa11   : > { %1638 = vst.msk [vmem:[%s2849_s5 + $0x10] sm:$0xff] %vm662_vm1, %v1626_v2 }
 0xa12   : > { %1639 = vst.msk [vmem:[%s2849_s5 + $0x18] sm:$0xff] %vm662_vm1, %v1627_v7 }
 0xa13 PF: > { %s2850_s28 = sld [smem:[#allocation10_spill]]  ;;  %s2853_s25 = smov %s2171_s26 }
 0xa14   : > { %s2851_s29 = sld [smem:[#allocation9_spill]] }
 0xa15   : > { %s2852_s27 = sld [smem:[#allocation11_spill]] }
 0xa19   : > { %p26_p2 = scmp.ge.s32.totalorder %s2850_s28, 4  }
 0xa1a   : > { %s2854_s26 = smov %s2851_s29 }
 0xa1b   :  { %28 = sbr.rel (!%p26_p2) target bundleno = 13 (0xd), region = 159 }
 0xa20   :  { %1651 = vsyncpa [#allocation4], 1 }
 0xa21   :  { %1653 = vsyncpa [#allocation4 + $0x1], 1 }
 0xa22   :  { %1654 = vsyncpa [#allocation6], 1 }
 0xa23   :  { %1656 = vsyncpa [#allocation6 + $0x1], 1 }

// kernel: transformer_forward.3
= control target key start
LH: loop header
LB: loop body
LE: loop exit
PB: predicated region body
PF: predicated region fallthrough
CT: control target
= control target key end

     0   :  { %s5464_s0 = inlined_call_operand.vmem [shape: f32[32,32], index: 0, kind: input, shape index: {}]   ;;  %s5465_s1 = inlined_call_operand.vmem [shape: f32[32,32], index: 1, kind: input, shape index: {}]   ;;  %s5466_s2 = inlined_call_operand.hbm [shape: f32[2,1,32], index: 2, kind: input, shape index: {}]   ;;  %s5467_s3 = inlined_call_operand.hbm [shape: f32[2,1,32], index: 3, kind: input, shape index: {}]   ;;  %s5468_s4 = inlined_call_operand.vmem [shape: bf16[2,32,96], index: 4, kind: input, shape index: {}]   ;;  %s5469_s5 = inlined_call_operand.hbm [shape: f32[2,1,96], index: 5, kind: input, shape index: {}]   ;;  %s5470_s6 = inlined_call_operand.vmem [shape: bf16[2,32,32], index: 6, kind: input, shape index: {}]   ;;  %s5471_s7 = inlined_call_operand.hbm [shape: f32[2,1,32], index: 7, kind: input, shape index: {}]   ;;  %s5472_s8 = inlined_call_operand.hbm [shape: f32[2,1,32], index: 8, kind: input, shape index: {}]   ;;  %s5473_s9 = inlined_call_operand.hbm [shape: f32[2,1,32], index: 9, kind: input, shape index: {}]   ;;  %s5474_s10 = inlined_call_operand.hbm [shape: bf16[2,32,96], index: 10, kind: input, shape index: {}]   ;;  %s5475_s11 = inlined_call_operand.hbm [shape: f32[2,1,96], index: 11, kind: input, shape index: {}]   ;;  %s5476_s12 = inlined_call_operand.hbm [shape: bf16[2,32,32], index: 12, kind: input, shape index: {}]   ;;  %s5477_s13 = inlined_call_operand.hbm [shape: f32[2,1,32], index: 13, kind: input, shape index: {}]   ;;  %s5478_s14 = inlined_call_operand.hbm [shape: f32[2,1,32], index: 14, kind: input, shape index: {}]   ;;  %s5479_s15 = inlined_call_operand.hbm [shape: f32[2,1,32], index: 15, kind: input, shape index: {}]   ;;  %s5480_s16 = inlined_call_operand.hbm [shape: bf16[2,32,64], index: 16, kind: input, shape index: {}]   ;;  %s5481_s17 = inlined_call_operand.hbm [shape: f32[2,1,64], index: 17, kind: input, shape index: {}]   ;;  %s5482_s18 = inlined_call_operand.vmem [shape: bf16[2,64,32], index: 18, kind: input, shape index: {}]   ;;  %s5483_s19 = inlined_call_operand.hbm [shape: f32[2,1,32], index: 19, kind: input, shape index: {}]   ;;  %s5484_s20 = inlined_call_operand.hbm [shape: f32[32,32], index: 20, kind: output, shape index: {}]  }
   0x1   :  { %5506 = sst [smem:[#allocation43_spill]] %s5464_s0 }
   0x2   :  { %5507 = sst [smem:[#allocation44_spill]] %s5465_s1 }
   0x3   :  { %5508 = sst [smem:[#allocation45_spill]] %s5466_s2 }
   0x4   :  { %5509 = sst [smem:[#allocation46_spill]] %s5467_s3 }
   0x5   :  { %5510 = sst [smem:[#allocation47_spill]] %s5468_s4 }
   0x6   :  { %5511 = sst [smem:[#allocation48_spill]] %s5469_s5 }
   0x7   :  { %5512 = sst [smem:[#allocation49_spill]] %s5470_s6 }
   0x8   :  { %5513 = sst [smem:[#allocation50_spill]] %s5471_s7 }
   0x9   :  { %5514 = sst [smem:[#allocation51_spill]] %s5472_s8 }
   0xa   :  { %5515 = sst [smem:[#allocation52_spill]] %s5482_s18 }
   0xb   :  { %5516 = sst [smem:[#allocation53_spill]] %s5484_s20 }
   0xc   :  { %25 = vsyncpa [#allocation4], 0 }
   0xd   :  { %27 = vsyncpa [#allocation4 + $0x1], 0 }
   0xe   :  { %28 = vsyncpa [#allocation7], 0 }
   0xf   :  { %30 = vsyncpa [#allocation7 + $0x1], 0 }
  0x10   :  { %31 = vsyncpa [#allocation10], 0 }
  0x11   :  { %33 = vsyncpa [#allocation10 + $0x1], 0 }
  0x12   :  { %34 = vsyncpa [#allocation13], 0 }
  0x13   :  { %36 = vsyncpa [#allocation13 + $0x1], 0 }
  0x14   :  { %37 = vsyncpa [#allocation16], 0 }
  0x15   :  { %39 = vsyncpa [#allocation16 + $0x1], 0 }
  0x16   :  { %40 = vsyncpa [#allocation19], 0 }
  0x17   :  { %42 = vsyncpa [#allocation19 + $0x1], 0 }
  0x18   :  { %43 = vsyncpa [#allocation22], 0 }
  0x19   :  { %45 = vsyncpa [#allocation22 + $0x1], 0 }
  0x1a   :  { %46 = vsyncpa [#allocation25], 0 }
  0x1b   :  { %48 = vsyncpa [#allocation25 + $0x1], 0 }
  0x1c   :  { %49 = vsyncpa [#allocation5], 0  ;;  %s4376_s1 = smov 0   ;;  %s4378_s22 = smov 0  }
  0x1d   :  { %s4380_s23 = smov 0   ;;  %s4382_s24 = smov 0  }
  0x1e LB: > { %5517 = sst [smem:[#allocation37_spill]] %s4242_s22  ;;  %s4395_s2 = sadd.s32 4294967295, %s4250_s24   ;;  %s4250_s24 = sphi %s4382_s24, %s5566_s24   ;;  %s4246_s23 = sphi %s4380_s23, %s5569_s23   ;;  %s4242_s22 = sphi %s4378_s22, %s5568_s22   ;;  %s4238_s1 = sphi %s4376_s1, %s5567_s1  }
  0x1f   : > { %5518 = sst [smem:[#allocation38_spill]] %s4246_s23  ;;  %s4398_s25 = sadd.s32 1, %s4250_s24  }
  0x20   : > { %5519 = sst [smem:[#allocation39_spill]] %s4395_s2  ;;  %s101_s3 = ssub.s32 %s4250_s24, %s4398_s25 }
  0x21   : > { %5520 = sst [smem:[#allocation40_spill]] %s4398_s25  ;;  %s104_s26 = sadd.s32 1, %s4246_s23 }
  0x22   : > { %p102_p0 = scmp.eq.s32.totalorder %s101_s3, 0  ;;  %p111_p1 = scmp.ne.s32.totalorder %s4246_s23, %s4242_s22 }
  0x23   : > { %p112_p2 = scmp.eq.s32.totalorder %s4250_s24, 0  ;;  %p117_p3 = scmp.ne.s32.totalorder %s4242_s22, %s4238_s1 }
  0x24   : > { %s4408_s27 = scalar_select %p102_p0, %s4246_s23, %s104_s26  }
  0x25   : > { %p4410_p4 = por %p112_p2, %p111_p1  ;;  %p118_p5 = scmp.eq.s32.totalorder %s4395_s2, 0 }
  0x26   : > { %5521 = sst [smem:[#allocation41_spill]] %s4408_s27  ;;  %p3269_p7 = scmp.ge.s32.totalorder %s4250_s24, 2 }
  0x27   : > { %p4415_p6 = por %p118_p5, %p117_p3  ;;  %s4421_s29 = sand.u32 (!%p3269_p7), 1, %s4246_s23  }
  0x28   : > { %606 = sbr.rel (%p3269_p7) target bundleno = 285 (0x11d), region = 24  ;;  %s4424_s30 = sand.u32 (!%p3269_p7), 1, %s4250_s24  }
  0x29   : > { %s5523_s4 = scalar_select %p4415_p6, 1, 0 }
  0x2a   : > { %s5525_s1 = sld [smem:[#allocation46_spill]] (!%p3269_p7)  ;;  %s630_s27 = scalar_lea.vmem (!%p3269_p7), [#allocation6], %s4421_s29 }
  0x2b   : > { %5524 = sst [smem:[#allocation42_spill]] %s5523_s4  ;;  %s637_s25 = sshll.u32 (!%p3269_p7), %s630_s27, 4  ;;  %s638_s25 = int_to_ptr.vmem [resolvable:$true] %s637_s25 }
  0x2c   : > { %s5498_s18 = scalar_lea.sflag (!%p3269_p7), [#allocation7], %s4424_s30 }
  0x30   : > { %s5526_s3 = smov %s5525_s1  ;;  %s633_s26 = scalar_lea.hbm %s5525_s1, %s4250_s24 }
  0x31   : > { %s635_s20 = sshll.u32 %s633_s26, 4  ;;  %s3742_s22 = scalar_lea.hbm %s5526_s3, 2  ;;  %s636_s20 = int_to_ptr.hbm [resolvable:$true] %s635_s20 }
  0x32   : > { %s3736_s6 = sshra.s32 %s636_s20, 4  ;;  %s3737_s6 = int_to_ptr.hbm [resolvable:$true] %s3736_s6 }
  0x33   : > { %s3738_s2 = scalar_lea.hbm %s3737_s6, 1  ;;  %p3743_p11 = scmp.lt.s32.totalorder %s3737_s6, %s5526_s3 }
  0x34   : > { %p3739_p8 = scmp.ne.s32.totalorder %s3737_s6, %s3738_s2  ;;  %p3744_p12 = scmp.lt.s32.totalorder %s3742_s22, %s3738_s2 }
  0x36   : > { %p3740_p9 = pnand %p3739_p8, %p4410_p4  ;;  %p3745_p13 = por %p3744_p12, %p3743_p11 }
  0x38   : > { %p3741_p10 = pneg %p3740_p9 }
  0x3a   : > { %p3746_p0 = pnand %p3745_p13, %p3741_p10 }
  0x3c   : > { %3749 = shalt.err (!%p3746_p0)
}
  0x3d   : > { %3420 = dma.hbm_to_vmem [thread:$0]  (%p4410_p4), %s636_s20, 16, %s638_s25, %s5498_s18  }
  0x3e   : > { %s5527_s7 = sld [smem:[#allocation50_spill]]  ;;  %s680_s26 = scalar_lea.vmem [#allocation9], %s4421_s29 }
  0x3f   : > { %s687_s6 = sshll.u32 %s680_s26, 4  ;;  %s5499_s22 = scalar_lea.sflag [#allocation10], %s4424_s30  ;;  %s688_s6 = int_to_ptr.vmem [resolvable:$true] %s687_s6 }
  0x44   : > { %s683_s4 = scalar_lea.hbm %s5527_s7, %s4250_s24  ;;  %s3770_s20 = scalar_lea.hbm %s5527_s7, 2 }
  0x45   : > { %s685_s1 = sshll.u32 %s683_s4, 4  ;;  %s686_s1 = int_to_ptr.hbm [resolvable:$true] %s685_s1 }
  0x46   : > { %s3764_s2 = sshra.s32 %s686_s1, 4  ;;  %s3765_s2 = int_to_ptr.hbm [resolvable:$true] %s3764_s2 }
  0x47   : > { %s3766_s0 = scalar_lea.hbm %s3765_s2, 1  ;;  %p3771_p5 = scmp.lt.s32.totalorder %s3765_s2, %s5527_s7 }
  0x48   : > { %p3767_p1 = scmp.ne.s32.totalorder %s3765_s2, %s3766_s0  ;;  %p3772_p7 = scmp.lt.s32.totalorder %s3770_s20, %s3766_s0 }
  0x4a   : > { %p3768_p2 = pnand %p3767_p1, %p4410_p4  ;;  %p3773_p8 = por %p3772_p7, %p3771_p5 }
  0x4c   : > { %p3769_p3 = pneg %p3768_p2 }
  0x4e   : > { %p3774_p9 = pnand %p3773_p8, %p3769_p3 }
  0x50   : > { %3777 = shalt.err (!%p3774_p9)
}
  0x51   : > { %3422 = dma.hbm_to_vmem [thread:$0]  (%p4410_p4), %s686_s1, 16, %s688_s6, %s5499_s22  }
  0x52   : > { %s717_s4 = scalar_lea.hbm %s5473_s9, %s4250_s24  ;;  %s714_s26 = scalar_lea.vmem [#allocation12], %s4421_s29 }
  0x53   : > { %s721_s21 = sshll.u32 %s714_s26, 4  ;;  %s719_s2 = sshll.u32 %s717_s4, 4  ;;  %s722_s21 = int_to_ptr.vmem [resolvable:$true] %s721_s21  ;;  %s720_s2 = int_to_ptr.hbm [resolvable:$true] %s719_s2 }
  0x54   : > { %s5500_s0 = scalar_lea.sflag [#allocation13], %s4424_s30  ;;  %s3792_s20 = sshra.s32 %s720_s2, 4  ;;  %s3793_s20 = int_to_ptr.hbm [resolvable:$true] %s3792_s20 }
  0x55   : > { %s3794_s25 = scalar_lea.hbm %s3793_s20, 1  ;;  %s3798_s1 = scalar_lea.hbm %s5473_s9, 2 }
  0x56   : > { %p3795_p10 = scmp.ne.s32.totalorder %s3793_s20, %s3794_s25  ;;  %p3799_p13 = scmp.lt.s32.totalorder %s3793_s20, %s5473_s9 }
  0x57   : > { %p3800_p0 = scmp.lt.s32.totalorder %s3798_s1, %s3794_s25 }
  0x58   : > { %p3796_p11 = pnand %p3795_p10, %p4410_p4 }
  0x59   : > { %p3801_p1 = por %p3800_p0, %p3799_p13 }
  0x5a   : > { %p3797_p12 = pneg %p3796_p11 }
  0x5c   : > { %p3802_p2 = pnand %p3801_p1, %p3797_p12 }
  0x5e   : > { %3805 = shalt.err (!%p3802_p2)
}
  0x5f   : > { %3424 = dma.hbm_to_vmem [thread:$0]  (%p4410_p4), %s720_s2, 16, %s722_s21, %s5500_s0  }
  0x60   : > { %s756_s4 = scalar_lea.hbm %s5475_s11, %s4250_s24  ;;  %s753_s27 = scalar_lea.vmem [#allocation15], %s4421_s29 }
  0x61   : > { %s758_s26 = sshll.u32 %s756_s4, 4  ;;  %s760_s20 = sshll.u32 %s753_s27, 4  ;;  %s759_s26 = int_to_ptr.hbm [resolvable:$true] %s758_s26  ;;  %s761_s20 = int_to_ptr.vmem [resolvable:$true] %s760_s20 }
  0x62   : > { %s5501_s25 = scalar_lea.sflag [#allocation16], %s4424_s30  ;;  %s3820_s1 = sshra.s32 %s759_s26, 4  ;;  %s3821_s1 = int_to_ptr.hbm [resolvable:$true] %s3820_s1 }
  0x63   : > { %s3822_s6 = scalar_lea.hbm %s3821_s1, 1  ;;  %s3826_s21 = scalar_lea.hbm %s5475_s11, 2 }
  0x64   : > { %p3823_p3 = scmp.ne.s32.totalorder %s3821_s1, %s3822_s6  ;;  %p3827_p8 = scmp.lt.s32.totalorder %s3821_s1, %s5475_s11 }
  0x65   : > { %p3828_p9 = scmp.lt.s32.totalorder %s3826_s21, %s3822_s6 }
  0x66   : > { %p3824_p5 = pnand %p3823_p3, %p4410_p4 }
  0x67   : > { %p3829_p10 = por %p3828_p9, %p3827_p8 }
  0x68   : > { %p3825_p7 = pneg %p3824_p5 }
  0x6a   : > { %p3830_p11 = pnand %p3829_p10, %p3825_p7 }
  0x6c   : > { %3833 = shalt.err (!%p3830_p11)
}
  0x6d   : > { %3426 = dma.hbm_to_vmem [thread:$0]  (%p4410_p4), %s759_s26, 16, %s761_s20, %s5501_s25  }
  0x6e   : > { %s795_s4 = scalar_lea.hbm %s5477_s13, %s4250_s24  ;;  %s792_s27 = scalar_lea.vmem [#allocation18], %s4421_s29 }
  0x6f   : > { %s799_s23 = sshll.u32 %s792_s27, 4  ;;  %s797_s1 = sshll.u32 %s795_s4, 4  ;;  %s800_s23 = int_to_ptr.vmem [resolvable:$true] %s799_s23  ;;  %s798_s1 = int_to_ptr.hbm [resolvable:$true] %s797_s1 }
  0x70   : > { %s5502_s6 = scalar_lea.sflag [#allocation19], %s4424_s30  ;;  %s3848_s21 = sshra.s32 %s798_s1, 4  ;;  %s3849_s21 = int_to_ptr.hbm [resolvable:$true] %s3848_s21 }
  0x71   : > { %s3850_s2 = scalar_lea.hbm %s3849_s21, 1  ;;  %s3854_s26 = scalar_lea.hbm %s5477_s13, 2 }
  0x72   : > { %p3851_p12 = scmp.ne.s32.totalorder %s3849_s21, %s3850_s2  ;;  %p3855_p1 = scmp.lt.s32.totalorder %s3849_s21, %s5477_s13 }
  0x73   : > { %p3856_p2 = scmp.lt.s32.totalorder %s3854_s26, %s3850_s2 }
  0x74   : > { %p3852_p13 = pnand %p3851_p12, %p4410_p4 }
  0x75   : > { %p3857_p3 = por %p3856_p2, %p3855_p1 }
  0x76   : > { %p3853_p0 = pneg %p3852_p13 }
  0x78   : > { %p3858_p5 = pnand %p3857_p3, %p3853_p0 }
  0x7a   : > { %3861 = shalt.err (!%p3858_p5)
}
  0x7b   : > { %3428 = dma.hbm_to_vmem [thread:$0]  (%p4410_p4), %s798_s1, 16, %s800_s23, %s5502_s6  }
  0x7c   : > { %s829_s4 = scalar_lea.hbm %s5479_s15, %s4250_s24  ;;  %s826_s3 = scalar_lea.vmem [#allocation21], %s4421_s29 }
  0x7d   : > { %s831_s27 = sshll.u32 %s829_s4, 4  ;;  %s833_s21 = sshll.u32 %s826_s3, 4  ;;  %s832_s27 = int_to_ptr.hbm [resolvable:$true] %s831_s27  ;;  %s834_s21 = int_to_ptr.vmem [resolvable:$true] %s833_s21 }
  0x7e   : > { %s5503_s2 = scalar_lea.sflag [#allocation22], %s4424_s30  ;;  %s3876_s26 = sshra.s32 %s832_s27, 4  ;;  %s3877_s26 = int_to_ptr.hbm [resolvable:$true] %s3876_s26 }
  0x7f   : > { %s3878_s20 = scalar_lea.hbm %s3877_s26, 1  ;;  %s3882_s23 = scalar_lea.hbm %s5479_s15, 2 }
  0x80   : > { %p3879_p7 = scmp.ne.s32.totalorder %s3877_s26, %s3878_s20  ;;  %p3883_p10 = scmp.lt.s32.totalorder %s3877_s26, %s5479_s15 }
  0x81   : > { %p3884_p11 = scmp.lt.s32.totalorder %s3882_s23, %s3878_s20 }
  0x82   : > { %p3880_p8 = pnand %p3879_p7, %p4410_p4 }
  0x83   : > { %p3885_p12 = por %p3884_p11, %p3883_p10 }
  0x84   : > { %p3881_p9 = pneg %p3880_p8 }
  0x86   : > { %p3886_p13 = pnand %p3885_p12, %p3881_p9 }
  0x88   : > { %3889 = shalt.err (!%p3886_p13)
}
  0x89   : > { %3430 = dma.hbm_to_vmem [thread:$0]  (%p4410_p4), %s832_s27, 16, %s834_s21, %s5503_s2  }
  0x8a   : > { %s868_s4 = scalar_lea.hbm %s5481_s17, %s4250_s24  ;;  %s865_s3 = scalar_lea.vmem [#allocation24], %s4421_s29 }
  0x8b   : > { %s872_s18 = sshll.u32 %s865_s3, 4  ;;  %s870_s26 = sshll.u32 %s868_s4, 4  ;;  %s873_s18 = int_to_ptr.vmem [resolvable:$true] %s872_s18  ;;  %s871_s26 = int_to_ptr.hbm [resolvable:$true] %s870_s26 }
  0x8c   : > { %s5504_s20 = scalar_lea.sflag [#allocation25], %s4424_s30  ;;  %s3904_s23 = sshra.s32 %s871_s26, 4  ;;  %s3905_s23 = int_to_ptr.hbm [resolvable:$true] %s3904_s23 }
  0x8d   : > { %s3906_s1 = scalar_lea.hbm %s3905_s23, 1  ;;  %s3910_s27 = scalar_lea.hbm %s5481_s17, 2 }
  0x8e   : > { %p3907_p0 = scmp.ne.s32.totalorder %s3905_s23, %s3906_s1  ;;  %p3911_p3 = scmp.lt.s32.totalorder %s3905_s23, %s5481_s17 }
  0x8f   : > { %p3912_p5 = scmp.lt.s32.totalorder %s3910_s27, %s3906_s1 }
  0x90   : > { %p3908_p1 = pnand %p3907_p0, %p4410_p4 }
  0x91   : > { %p3913_p7 = por %p3912_p5, %p3911_p3 }
  0x92   : > { %p3909_p2 = pneg %p3908_p1 }
  0x94   : > { %p3914_p8 = pnand %p3913_p7, %p3909_p2 }
  0x96   : > { %3917 = shalt.err (!%p3914_p8)
}
  0x97   : > { %3432 = dma.hbm_to_vmem [thread:$0]  (%p4410_p4), %s871_s26, 16, %s873_s18, %s5504_s20  }
  0x98   : > { %s5528_s4 = sld [smem:[#allocation45_spill]]  ;;  %s613_s21 = scalar_lea.vmem [#allocation3], %s4421_s29 }
  0x99   : > { %s620_s23 = sshll.u32 %s613_s21, 4  ;;  %s611_s1 = scalar_lea.sflag [#allocation4], %s4421_s29  ;;  %s621_s23 = int_to_ptr.vmem [resolvable:$true] %s620_s23 }
  0x9e   : > { %s616_s3 = scalar_lea.hbm %s5528_s4, %s4250_s24  ;;  %s3938_s18 = scalar_lea.hbm %s5528_s4, 2 }
  0x9f   : > { %s618_s22 = sshll.u32 %s616_s3, 4  ;;  %s619_s22 = int_to_ptr.hbm [resolvable:$true] %s618_s22 }
  0xa0   : > { %s3932_s27 = sshra.s32 %s619_s22, 4  ;;  %s3933_s27 = int_to_ptr.hbm [resolvable:$true] %s3932_s27 }
  0xa1   : > { %s3934_s0 = scalar_lea.hbm %s3933_s27, 1  ;;  %p3939_p12 = scmp.lt.s32.totalorder %s3933_s27, %s5528_s4 }
  0xa2   : > { %p3935_p9 = scmp.ne.s32.totalorder %s3933_s27, %s3934_s0  ;;  %p3940_p13 = scmp.lt.s32.totalorder %s3938_s18, %s3934_s0 }
  0xa4   : > { %p3936_p10 = pnand %p3935_p9, %p4410_p4  ;;  %p3941_p0 = por %p3940_p13, %p3939_p12 }
  0xa6   : > { %p3937_p11 = pneg %p3936_p10 }
  0xa8   : > { %p3942_p1 = pnand %p3941_p0, %p3937_p11 }
  0xaa   : > { %3945 = shalt.err (!%p3942_p1)
}
  0xab   : > { %3419 = dma.hbm_to_vmem [thread:$0]  (%p4410_p4), %s619_s22, 16, %s621_s23, %s611_s1  }
  0xac   : > { %s5529_s5 = sld [smem:[#allocation48_spill]]  ;;  %s655_s2 = scalar_lea.vmem [#allocation8], %s4421_s29 }
  0xad   : > { %s662_s20 = sshll.u32 %s655_s2, 4  ;;  %s663_s20 = int_to_ptr.vmem [resolvable:$true] %s662_s20 }
  0xb2   : > { %s658_s21 = scalar_lea.hbm %s5529_s5, %s4250_s24  ;;  %s3966_s22 = scalar_lea.hbm %s5529_s5, 2 }
  0xb3   : > { %s660_s7 = sshll.u32 %s658_s21, 4  ;;  %s661_s7 = int_to_ptr.hbm [resolvable:$true] %s660_s7 }
  0xb4   : > { %s3960_s27 = sshra.s32 %s661_s7, 4  ;;  %s3961_s27 = int_to_ptr.hbm [resolvable:$true] %s3960_s27 }
  0xb5   : > { %s3962_s0 = scalar_lea.hbm %s3961_s27, 1  ;;  %p3967_p7 = scmp.lt.s32.totalorder %s3961_s27, %s5529_s5 }
  0xb6   : > { %p3963_p2 = scmp.ne.s32.totalorder %s3961_s27, %s3962_s0  ;;  %p3968_p8 = scmp.lt.s32.totalorder %s3966_s22, %s3962_s0 }
  0xb8   : > { %p3964_p3 = pnand %p3963_p2, %p4410_p4  ;;  %p3969_p9 = por %p3968_p8, %p3967_p7 }
  0xba   : > { %p3965_p5 = pneg %p3964_p3 }
  0xbc   : > { %p3970_p10 = pnand %p3969_p9, %p3965_p5 }
  0xbe   : > { %3973 = shalt.err (!%p3970_p10)
}
  0xbf   : > { %s5530_s25 = scalar_lea.sflag [#allocation7], %s4424_s30  ;;  %s5531_s8 = sld [smem:[#allocation51_spill]] }
  0xc0   : > { %3421 = dma.hbm_to_vmem [thread:$0]  (%p4410_p4), %s661_s7, 16, %s663_s20, %s5530_s25  }
  0xc1   : > { %s697_s18 = scalar_lea.vmem [#allocation11], %s4421_s29 }
  0xc2   : > { %s704_s26 = sshll.u32 %s697_s18, 4  ;;  %s705_s26 = int_to_ptr.vmem [resolvable:$true] %s704_s26 }
  0xc5   : > { %s700_s21 = scalar_lea.hbm %s5531_s8, %s4250_s24  ;;  %s3994_s20 = scalar_lea.hbm %s5531_s8, 2 }
  0xc6   : > { %s702_s2 = sshll.u32 %s700_s21, 4  ;;  %s703_s2 = int_to_ptr.hbm [resolvable:$true] %s702_s2 }
  0xc7   : > { %s3988_s27 = sshra.s32 %s703_s2, 4  ;;  %s3989_s27 = int_to_ptr.hbm [resolvable:$true] %s3988_s27 }
  0xc8   : > { %s3990_s0 = scalar_lea.hbm %s3989_s27, 1  ;;  %p3995_p0 = scmp.lt.s32.totalorder %s3989_s27, %s5531_s8 }
  0xc9   : > { %p3991_p11 = scmp.ne.s32.totalorder %s3989_s27, %s3990_s0  ;;  %p3996_p1 = scmp.lt.s32.totalorder %s3994_s20, %s3990_s0 }
  0xcb   : > { %p3992_p12 = pnand %p3991_p11, %p4410_p4  ;;  %p3997_p2 = por %p3996_p1, %p3995_p0 }
  0xcd   : > { %p3993_p13 = pneg %p3992_p12 }
  0xcf   : > { %p3998_p3 = pnand %p3997_p2, %p3993_p13 }
  0xd1   : > { %4001 = shalt.err (!%p3998_p3)
}
  0xd2   : > { %s5532_s25 = scalar_lea.sflag [#allocation10], %s4424_s30  ;;  %s4603_s6 = sshll.u32 %s4421_s29, 4 }
  0xd3   : > { %3423 = dma.hbm_to_vmem [thread:$0]  (%p4410_p4), %s703_s2, 16, %s705_s26, %s5532_s25  }
  0xd4   : > { %s4606_s3 = sshll.u32 %s4250_s24, 4  ;;  %s732_s22 = scalar_lea.vmem [#allocation14], %s4603_s6 }
  0xd5   : > { %s737_s27 = scalar_lea.hbm %s5474_s10, %s4606_s3  ;;  %s740_s23 = sshll.u32 %s732_s22, 4  ;;  %s741_s23 = int_to_ptr.vmem [resolvable:$true] %s740_s23 }
  0xd6   : > { %s738_s0 = sshll.u32 %s737_s27, 4  ;;  %s4022_s1 = scalar_lea.hbm %s5474_s10, 32  ;;  %s739_s0 = int_to_ptr.hbm [resolvable:$true] %s738_s0 }
  0xd7   : > { %s4016_s20 = sshra.s32 %s739_s0, 4  ;;  %s4017_s20 = int_to_ptr.hbm [resolvable:$true] %s4016_s20 }
  0xd8   : > { %s4018_s7 = scalar_lea.hbm %s4017_s20, 16  ;;  %p4023_p9 = scmp.lt.s32.totalorder %s4017_s20, %s5474_s10 }
  0xd9   : > { %p4019_p5 = scmp.ne.s32.totalorder %s4017_s20, %s4018_s7  ;;  %p4024_p10 = scmp.lt.s32.totalorder %s4022_s1, %s4018_s7 }
  0xdb   : > { %p4020_p7 = pnand %p4019_p5, %p4410_p4  ;;  %p4025_p11 = por %p4024_p10, %p4023_p9 }
  0xdd   : > { %p4021_p8 = pneg %p4020_p7 }
  0xdf   : > { %p4026_p12 = pnand %p4025_p11, %p4021_p8 }
  0xe1   : > { %4029 = shalt.err (!%p4026_p12)
}
  0xe2   : > { %s4252_s21 = smov 64   ;;  %s4253_s18 = smov 4  }
  0xe3   : > { %s5533_s27 = scalar_lea.sflag [#allocation13], %s4424_s30  ;;  %s776_s20 = scalar_lea.hbm %s5476_s12, %s4606_s3 }
  0xe4   : > { %3425 = dma.hbm_to_vmem [thread:$0]  (%p4410_p4), %s739_s0, 256, %s741_s23, %s5533_s27, %s4252_s21, %s4252_s21, %s4253_s18  }
  0xe5   : > { %s777_s7 = sshll.u32 %s776_s20, 4  ;;  %s771_s2 = scalar_lea.vmem [#allocation17], %s4603_s6  ;;  %s778_s7 = int_to_ptr.hbm [resolvable:$true] %s777_s7 }
  0xe6   : > { %s779_s26 = sshll.u32 %s771_s2, 4  ;;  %s4044_s1 = sshra.s32 %s778_s7, 4  ;;  %s780_s26 = int_to_ptr.vmem [resolvable:$true] %s779_s26  ;;  %s4045_s1 = int_to_ptr.hbm [resolvable:$true] %s4044_s1 }
  0xe7   : > { %s4046_s25 = scalar_lea.hbm %s4045_s1, 16  ;;  %s4050_s0 = scalar_lea.hbm %s5476_s12, 32 }
  0xe8   : > { %p4047_p13 = scmp.ne.s32.totalorder %s4045_s1, %s4046_s25  ;;  %p4051_p2 = scmp.lt.s32.totalorder %s4045_s1, %s5476_s12 }
  0xe9   : > { %p4052_p3 = scmp.lt.s32.totalorder %s4050_s0, %s4046_s25 }
  0xea   : > { %p4048_p0 = pnand %p4047_p13, %p4410_p4 }
  0xeb   : > { %p4053_p5 = por %p4052_p3, %p4051_p2 }
  0xec   : > { %p4049_p1 = pneg %p4048_p0 }
  0xee   : > { %p4054_p7 = pnand %p4053_p5, %p4049_p1 }
  0xf0   : > { %4057 = shalt.err (!%p4054_p7)
}
  0xf1   : > { %s5534_s22 = scalar_lea.sflag [#allocation16], %s4424_s30  ;;  %s812_s4 = scalar_lea.hbm %s5478_s14, %s4250_s24 }
  0xf2   : > { %3427 = dma.hbm_to_vmem [thread:$0]  (%p4410_p4), %s778_s7, 256, %s780_s26, %s5534_s22, %s4252_s21, %s4252_s21, %s4253_s18  }
  0xf3   : > { %s814_s20 = sshll.u32 %s812_s4, 4  ;;  %s809_s2 = scalar_lea.vmem [#allocation20], %s4421_s29  ;;  %s815_s20 = int_to_ptr.hbm [resolvable:$true] %s814_s20 }
  0xf4   : > { %s816_s1 = sshll.u32 %s809_s2, 4  ;;  %s4072_s25 = sshra.s32 %s815_s20, 4  ;;  %s817_s1 = int_to_ptr.vmem [resolvable:$true] %s816_s1  ;;  %s4073_s25 = int_to_ptr.hbm [resolvable:$true] %s4072_s25 }
  0xf5   : > { %s4074_s0 = scalar_lea.hbm %s4073_s25, 1  ;;  %s4078_s7 = scalar_lea.hbm %s5478_s14, 2 }
  0xf6   : > { %p4075_p8 = scmp.ne.s32.totalorder %s4073_s25, %s4074_s0  ;;  %p4079_p11 = scmp.lt.s32.totalorder %s4073_s25, %s5478_s14 }
  0xf7   : > { %p4080_p12 = scmp.lt.s32.totalorder %s4078_s7, %s4074_s0 }
  0xf8   : > { %p4076_p9 = pnand %p4075_p8, %p4410_p4 }
  0xf9   : > { %p4081_p13 = por %p4080_p12, %p4079_p11 }
  0xfa   : > { %p4077_p10 = pneg %p4076_p9 }
  0xfc   : > { %p4082_p0 = pnand %p4081_p13, %p4077_p10 }
  0xfe   : > { %4085 = shalt.err (!%p4082_p0)
}
  0xff   : > { %s5535_s5 = scalar_lea.sflag [#allocation19], %s4424_s30  ;;  %s849_s2 = scalar_lea.hbm %s5480_s16, %s4606_s3 }
 0x100   : > { %3429 = dma.hbm_to_vmem [thread:$0]  (%p4410_p4), %s815_s20, 16, %s817_s1, %s5535_s5  }
 0x101   : > { %s850_s23 = sshll.u32 %s849_s2, 4  ;;  %s844_s27 = scalar_lea.vmem [#allocation23], %s4603_s6  ;;  %s851_s23 = int_to_ptr.hbm [resolvable:$true] %s850_s23 }
 0x102   : > { %s852_s26 = sshll.u32 %s844_s27, 4  ;;  %s4100_s25 = sshra.s32 %s851_s23, 4  ;;  %s853_s26 = int_to_ptr.vmem [resolvable:$true] %s852_s26  ;;  %s4101_s25 = int_to_ptr.hbm [resolvable:$true] %s4100_s25 }
 0x103   : > { %s4102_s0 = scalar_lea.hbm %s4101_s25, 16  ;;  %s4106_s20 = scalar_lea.hbm %s5480_s16, 32 }
 0x104   : > { %p4103_p1 = scmp.ne.s32.totalorder %s4101_s25, %s4102_s0  ;;  %p4107_p5 = scmp.lt.s32.totalorder %s4101_s25, %s5480_s16 }
 0x105   : > { %p4108_p7 = scmp.lt.s32.totalorder %s4106_s20, %s4102_s0 }
 0x106   : > { %p4104_p2 = pnand %p4103_p1, %p4410_p4 }
 0x107   : > { %p4109_p8 = por %p4108_p7, %p4107_p5 }
 0x108   : > { %p4105_p3 = pneg %p4104_p2 }
 0x10a   : > { %p4110_p9 = pnand %p4109_p8, %p4105_p3 }
 0x10c   : > { %4113 = shalt.err (!%p4110_p9)
}
 0x10d   : > { %s5536_s6 = scalar_lea.sflag [#allocation22], %s4424_s30  ;;  %s893_s4 = scalar_lea.hbm %s5483_s19, %s4250_s24 }
 0x10e   : > { %3431 = dma.hbm_to_vmem [thread:$0]  (%p4410_p4), %s851_s23, 256, %s853_s26, %s5536_s6, %s4252_s21, %s4252_s21, %s4253_s18  }
 0x10f   : > { %s895_s2 = sshll.u32 %s893_s4, 4  ;;  %s890_s27 = scalar_lea.vmem [#allocation26], %s4421_s29  ;;  %s896_s2 = int_to_ptr.hbm [resolvable:$true] %s895_s2 }
 0x110   : > { %s897_s25 = sshll.u32 %s890_s27, 4  ;;  %s4128_s0 = sshra.s32 %s896_s2, 4  ;;  %s898_s25 = int_to_ptr.vmem [resolvable:$true] %s897_s25  ;;  %s4129_s0 = int_to_ptr.hbm [resolvable:$true] %s4128_s0 }
 0x111   : > { %s4130_s7 = scalar_lea.hbm %s4129_s0, 1  ;;  %s4134_s21 = scalar_lea.hbm %s5483_s19, 2 }
 0x112   : > { %p4131_p10 = scmp.ne.s32.totalorder %s4129_s0, %s4130_s7  ;;  %p4135_p13 = scmp.lt.s32.totalorder %s4129_s0, %s5483_s19 }
 0x113   : > { %p4136_p0 = scmp.lt.s32.totalorder %s4134_s21, %s4130_s7 }
 0x114   : > { %p4132_p11 = pnand %p4131_p10, %p4410_p4 }
 0x115   : > { %p4137_p1 = por %p4136_p0, %p4135_p13 }
 0x116   : > { %p4133_p12 = pneg %p4132_p11 }
 0x118   : > { %p4138_p2 = pnand %p4137_p1, %p4133_p12 }
 0x11a   : > { %4141 = shalt.err (!%p4138_p2)
}
 0x11b   : > { %s5537_s29 = scalar_lea.sflag [#allocation25], %s4424_s30 }
 0x11c   : > { %3433 = dma.hbm_to_vmem [thread:$0]  (%p4410_p4), %s896_s2, 16, %s898_s25, %s5537_s29  }
 0x11d PF: > { %p3279_p3 = scmp.ge.s32.totalorder %s4250_s24, 1  ;;  %p902_p5 = scmp.lt.s32.totalorder %s4250_s24, 3 }
 0x11f   : > { %p903_p7 = pnand %p3279_p3, %p902_p5 }
 0x120   : > { %s5538_s26 = sld [smem:[#allocation37_spill]] (!%p903_p7) }
 0x121   : > { %906 = sbr.rel (%p903_p7) target bundleno = 4335 (0x10ef), region = 100 }
 0x126   : > { %s4705_s5 = sand.u32 1, %s5538_s26  }
 0x127   : > { %s909_s6 = scalar_lea.sflag [#allocation4], %s4705_s5 }
 0x128   : > { %4201 = dma.done.wait (%p4415_p6), %s909_s6, 16  }
 0x129   : > { %4203 = vsyncadd (%p4415_p6), %s909_s6, 4294967280  ;;  %s5540_s28 = sld [smem:[#allocation39_spill]] }
 0x12f   : > { %s4714_s30 = sand.u32 1, %s5540_s28  }
 0x130   : > { %s918_s24 = scalar_lea.sflag [#allocation7], %s4714_s30 }
 0x131   : > { %4205 = dma.done.wait (%p4415_p6), %s918_s24, 32  }
 0x132   : > { %4207 = vsyncadd (%p4415_p6), %s918_s24, 4294967264  ;;  %s936_s2 = scalar_lea.sflag [#allocation10], %s4714_s30 }
 0x133   : > { %4209 = dma.done.wait (%p4415_p6), %s936_s2, 32  }
 0x134   : > { %4211 = vsyncadd (%p4415_p6), %s936_s2, 4294967264  ;;  %s954_s0 = scalar_lea.sflag [#allocation13], %s4714_s30 }
 0x135   : > { %4213 = dma.done.wait (%p4415_p6), %s954_s0, 272  }
 0x136   : > { %4215 = vsyncadd (%p4415_p6), %s954_s0, 4294967024  ;;  %s4737_s22 = sshll.u32 %s4705_s5, 4  ;;  %s973_s21 = scalar_lea.sflag [#allocation16], %s4714_s30 }
 0x137   : > { %4217 = dma.done.wait (%p4415_p6), %s973_s21, 272  }
 0x138   : > { %4219 = vsyncadd (%p4415_p6), %s973_s21, 4294967024  ;;  %s992_s29 = scalar_lea.sflag [#allocation19], %s4714_s30 }
 0x139   : > { %4221 = dma.done.wait (%p4415_p6), %s992_s29, 32  }
 0x13a   : > { %4223 = vsyncadd (%p4415_p6), %s992_s29, 4294967264  ;;  %s1010_s24 = scalar_lea.sflag [#allocation22], %s4714_s30 }
 0x13b   : > { %4225 = dma.done.wait (%p4415_p6), %s1010_s24, 272  }
 0x13c   : > { %4227 = vsyncadd (%p4415_p6), %s1010_s24, 4294967024  ;;  %s1029_s21 = scalar_lea.sflag [#allocation25], %s4714_s30 }
 0x13d   : > { %4229 = dma.done.wait (%p4415_p6), %s1029_s21, 32  }
 0x13e   : > { %4231 = vsyncadd (%p4415_p6), %s1029_s21, 4294967264  ;;  %p1166_p4 = scmp.lt.s32.totalorder %s5540_s28, 1  ;;  %s5541_s18 = sld [smem:[#allocation47_spill]] }
 0x13f   : > { %s5542_s26 = sld [smem:[#allocation49_spill]]  ;;  %s1040_s4 = scalar_lea.vmem [#allocation26], %s4705_s5 }
 0x140   : > { %s1167_s29 = scalar_select %p1166_p4, %s5540_s28, 1 }
 0x141   : > { %s5543_s21 = sld [smem:[#allocation52_spill]]  ;;  %p3289_p6 = scmp.ne.s32.totalorder %s5540_s28, 0 }
 0x142   : > { %s3398_s2 = sshll.u32 %s1167_s29, 4  ;;  %s3400_s6 = sshll.u32 %s1167_s29, 5 }
 0x143   : > { %1185 = sbr.rel (%p3289_p6) target bundleno = 334 (0x14e), region = 164  ;;  %s5544_s3 = sld [smem:[#allocation43_spill]] (!%p3289_p6) }
 0x144   : > { %s4772_s7 = scalar_lea.vmem %s5541_s18, %s3398_s2 }
 0x145   : > { %s4777_s25 = scalar_lea.vmem %s5542_s26, %s3398_s2 }
 0x147   : > { %s4782_s27 = scalar_lea.vmem %s5543_s21, %s3400_s6 }
 0x148   : > { %vm1190_vm0 = vcmask 261120  }
 0x149   : > { %v1186_v0 = vld [vmem:[%s5544_s3] sm:$0xff]  ;;  %v1187_v1 = vld [vmem:[%s5544_s3 + $0x8] sm:$0xff]  ;;  %v1188_v2 = vld [vmem:[%s5544_s3 + $0x10] sm:$0xff] }
 0x14a   : > { %1191 = vst.msk [vmem:[#allocation2] sm:$0xff] %vm1190_vm0, %v1186_v0  ;;  %v1189_v3 = vld [vmem:[%s5544_s3 + $0x18] sm:$0xff] }
 0x14b   : > { %1192 = vst.msk [vmem:[#allocation2 + $0x8] sm:$0xff] %vm1190_vm0, %v1187_v1 }
 0x14c   : > { %1193 = vst.msk [vmem:[#allocation2 + $0x10] sm:$0xff] %vm1190_vm0, %v1188_v2 }
 0x14d   : > { %1194 = vst.msk [vmem:[#allocation2 + $0x18] sm:$0xff] %vm1190_vm0, %v1189_v3 }
 0x14e PF: > { %vm1205_vm1 = vcmask 261120   ;;  %v4254_v12 = vmov 32.0   ;;  %v3402_v39 = vld [vmem:[%s4772_s7 + $0x8] sm:$0xff]  ;;  %v3401_v44 = vld [vmem:[%s4772_s7] sm:$0xff]  ;;  %s5545_s28 = scalar_lea.vmem [#allocation3], %s4705_s5  ;;  %s5546_s8 = scalar_lea.vmem [#allocation6], %s4705_s5 }
 0x14f   : > { %3578 = vrcp.f32 %v4254_v12  ;;  %1354 = vmatpush.bf16.msra.mxu0 %v3402_v39  ;;  %3415 = vmatpush.bf16.msra.mxu1 %v3402_v39  ;;  %s5547_s7 = scalar_lea.vmem [#allocation8], %s4705_s5  ;;  %s4255_s0 = smov 96   ;;  %vm1381_vm15 = vcmask 64512   ;;  %vm1892_vm0 = vcmask 130048  }
 0x150   : > { %s4256_s24 = smov 64   ;;  %s4257_s30 = smov 88  }
 0x151   : > { %v1195_v5 = vld [vmem:[#allocation2] sm:$0xff]  ;;  %s4258_s1 = smov 112   ;;  %s4259_s21 = smov 80  }
 0x152   : > { %v1206_v7 = vsel %vm1205_vm1, %v1195_v5, 0.0  ;;  %v1196_v9 = vld [vmem:[#allocation2 + $0x8] sm:$0xff]  ;;  %s4260_s29 = smov 120   ;;  %s4261_s18 = smov 72  }
 0x153   : > { %v1197_v4 = vld [vmem:[#allocation2 + $0x10] sm:$0xff]  ;;  %1207 = vadd.xlane.f32.xlu1 %v1206_v7  ;;  %v1209_v11 = vsel %vm1205_vm1, %v1196_v9, 0.0  ;;  %1355 = vmatpush.bf16.msra.mxu0 %v3401_v44  ;;  %s4262_s23 = smov 104   ;;  %s4263_s26 = smov 48  }
 0x154   : > { %v1212_v6 = vsel %vm1205_vm1, %v1197_v4, 0.0  ;;  %v1198_v8 = vld [vmem:[#allocation2 + $0x18] sm:$0xff]  ;;  %3416 = vmatpush.bf16.msra.mxu1 %v3401_v44  ;;  %s4264_s2 = smov 56   ;;  %s4265_s20 = smov 40  }
 0x155   : > { %1213 = vadd.xlane.f32.xlu0 %v1212_v6  ;;  %v1215_v10 = vsel %vm1205_vm1, %v1198_v8, 0.0  ;;  %v3579_v13 = vpop.eup %3578  ;;  %s4266_s6 = smov 8  }
 0x156   : > { %v1219_v14 = vmul.f32 32.0, %v3579_v13  ;;  %vm1223_vm2 = vweird.f32 %v3579_v13 }
 0x158   : > { %v1220_v15 = vsub.f32 1.0, %v1219_v14  ;;  %v3566_v14 = vld [vmem:[%s5545_s28] ss:$0 sm:$0xff]  ;;  %s4267_s28 = smov 16  }
 0x15a   : > { %v1221_v16 = vmul.f32 %v3579_v13, %v1220_v15 }
 0x15b   : > { %1210 = vadd.xlane.f32.xlu1 %v1209_v11 }
 0x15c   : > { %v1222_v17 = vadd.f32 %v3579_v13, %v1221_v16 }
 0x15d   : > { %1216 = vadd.xlane.f32.xlu0 %v1215_v10 }
 0x15e   : > { %v4802_v18 = vsel %vm1223_vm2, %v3579_v13, %v1222_v17  ;;  %vm1897_vm2 = vcmask 195584  }
 0x1c6   : > { %v1208_v20 = vpop.xlane.xlu1 %1207 }
 0x1c7   : > { %v1225_v22 = vmul.f32 %v4802_v18, %v1208_v20 }
 0x1c8   : > { %v1214_v19 = vpop.xlane.xlu0 %1213 }
 0x1c9   : > { %v1227_v21 = vmul.f32 %v4802_v18, %v1214_v19  ;;  %v4806_v23 = vsub.f32 %v1195_v5, %v1225_v22  ;;  %v3567_v22 = vld [vmem:[%s5546_s8] ss:$0 sm:$0xff]  ;;  %s4268_s8 = smov 24  }
 0x1cb   : > { %v4808_v24 = vsub.f32 %v1197_v4, %v1227_v21  ;;  %v1233_v26 = vmul.f32 %v4806_v23, %v4806_v23 }
 0x1cd   : > { %v1235_v25 = vmul.f32 %v4808_v24, %v4808_v24  ;;  %v1237_v28 = vsel %vm1205_vm1, %v1233_v26, 0.0 }
 0x1ce   : > { %1238 = vadd.xlane.f32.xlu0 %v1237_v28  ;;  %v1211_v30 = vpop.xlane.xlu1 %1210 }
 0x1cf   : > { %v1243_v27 = vsel %vm1205_vm1, %v1235_v25, 0.0  ;;  %v1226_v32 = vmul.f32 %v4802_v18, %v1211_v30 }
 0x1d0   : > { %1244 = vadd.xlane.f32.xlu2 %v1243_v27  ;;  %v1217_v29 = vpop.xlane.xlu0 %1216 }
 0x1d1   : > { %v1228_v31 = vmul.f32 %v4802_v18, %v1217_v29  ;;  %v4820_v34 = vsub.f32 %v1196_v9, %v1226_v32 }
 0x1d3   : > { %v4818_v33 = vsub.f32 %v1198_v8, %v1228_v31  ;;  %v1234_v36 = vmul.f32 %v4820_v34, %v4820_v34 }
 0x1d5   : > { %v1236_v35 = vmul.f32 %v4818_v33, %v4818_v33  ;;  %v1240_v38 = vsel %vm1205_vm1, %v1234_v36, 0.0 }
 0x1d6   : > { %1241 = vadd.xlane.f32.xlu1 %v1240_v38 }
 0x1d7   : > { %v1246_v37 = vsel %vm1205_vm1, %v1236_v35, 0.0 }
 0x1d8   : > { %1247 = vadd.xlane.f32.xlu2 %v1246_v37  ;;  %v3568_v37 = vld [vmem:[%s5547_s7] ss:$0 sm:$0xff]  ;;  %s5549_s7 = scalar_lea.vmem [#allocation14], %s4737_s22 }
 0x241   : > { %v1239_v41 = vpop.xlane.xlu0 %1238 }
 0x242   : > { %v1249_v43 = vmul.f32 %v1239_v41, %v4802_v18 }
 0x243   : > { %v1245_v40 = vpop.xlane.xlu2 %1244 }
 0x244   : > { %v1251_v42 = vmul.f32 %v1245_v40, %v4802_v18  ;;  %v1253_v46 = vadd.f32 1e-05, %v1249_v43 }
 0x246   : > { %v1255_v45 = vadd.f32 1e-05, %v1251_v42  ;;  %vm1263_vm7 = vweird.f32 %v1253_v46 }
 0x248   : > { %3580 = vrsqrt.f32 %v1255_v45  ;;  %vm1283_vm3 = vweird.f32 %v1255_v45 }
 0x249   : > { %3582 = vrsqrt.f32 %v1253_v46  ;;  %v1242_v48 = vpop.xlane.xlu1 %1241 }
 0x24a   : > { %v1250_v50 = vmul.f32 %v1242_v48, %v4802_v18 }
 0x24b   : > { %v1248_v47 = vpop.xlane.xlu2 %1247 }
 0x24c   : > { %v1252_v49 = vmul.f32 %v1248_v47, %v4802_v18  ;;  %v1254_v53 = vadd.f32 1e-05, %v1250_v50 }
 0x24e   : > { %v3581_v51 = vpop.eup %3580  ;;  %v1256_v52 = vadd.f32 1e-05, %v1252_v49  ;;  %vm1273_vm13 = vweird.f32 %v1254_v53 }
 0x24f   : > { %v3583_v54 = vpop.eup %3582  ;;  %v1278_v55 = vmul.f32 %v3581_v51, %v1255_v45  ;;  %vm1284_vm4 = vweird.f32 %v3581_v51 }
 0x250   : > { %v1258_v56 = vmul.f32 %v3583_v54, %v1253_v46  ;;  %3584 = vrsqrt.f32 %v1256_v52  ;;  %vm1285_vm5 = vmor %vm1283_vm3, %vm1284_vm4  ;;  %vm1264_vm6 = vweird.f32 %v3583_v54  ;;  %vm1293_vm9 = vweird.f32 %v1256_v52 }
 0x251   : > { %v1279_v57 = vmul.f32 %v3581_v51, %v1278_v55  ;;  %3586 = vrsqrt.f32 %v1254_v53  ;;  %vm1265_vm8 = vmor %vm1263_vm7, %vm1264_vm6 }
 0x252   : > { %v1259_v58 = vmul.f32 %v3583_v54, %v1258_v56 }
 0x253   : > { %v1280_v59 = vmul.f32 0.5, %v1279_v57 }
 0x254   : > { %v1260_v60 = vmul.f32 0.5, %v1259_v58 }
 0x255   : > { %v1281_v61 = vsub.f32 1.5, %v1280_v59 }
 0x256   : > { %v3585_v62 = vpop.eup %3584  ;;  %v1261_v63 = vsub.f32 1.5, %v1260_v60 }
 0x257   : > { %v3587_v0 = vpop.eup %3586  ;;  %v1282_v1 = vmul.f32 %v3581_v51, %v1281_v61  ;;  %v1288_v2 = vmul.f32 %v3585_v62, %v1256_v52  ;;  %vm1294_vm10 = vweird.f32 %v3585_v62 }
 0x258   : > { %v1262_v3 = vmul.f32 %v3583_v54, %v1261_v63  ;;  %v1268_v4 = vmul.f32 %v3587_v0, %v1254_v53  ;;  %vm1295_vm11 = vmor %vm1293_vm9, %vm1294_vm10  ;;  %vm1274_vm12 = vweird.f32 %v3587_v0 }
 0x259   : > { %v1289_v5 = vmul.f32 %v3585_v62, %v1288_v2  ;;  %v1286_v7 = vsel %vm1285_vm5, %v3581_v51, %v1282_v1  ;;  %vm1275_vm14 = vmor %vm1273_vm13, %vm1274_vm12 }
 0x25a   : > { %v1269_v6 = vmul.f32 %v3587_v0, %v1268_v4  ;;  %v1266_v9 = vsel %vm1265_vm8, %v3583_v54, %v1262_v3  ;;  %v1299_v12 = vmul.f32 %v1286_v7, %v4808_v24 }
 0x25b   : > { %v1290_v8 = vmul.f32 0.5, %v1289_v5  ;;  %v1297_v15 = vmul.f32 %v1266_v9, %v4806_v23 }
 0x25c   : > { %v1270_v10 = vmul.f32 0.5, %v1269_v6  ;;  %v1306_v25 = vmul.f32 %v3566_v14, %v1299_v12 }
 0x25d   : > { %v1291_v11 = vsub.f32 1.5, %v1290_v8  ;;  %v1304_v26 = vmul.f32 %v3566_v14, %v1297_v15 }
 0x25e   : > { %v1271_v13 = vsub.f32 1.5, %v1270_v10  ;;  %v1313_v29 = vadd.f32 %v3567_v22, %v1306_v25 }
 0x25f   : > { %v1292_v16 = vmul.f32 %v3585_v62, %v1291_v11  ;;  %v1311_v23 = vadd.f32 %v3567_v22, %v1304_v26 }
 0x260   : > { %v1272_v17 = vmul.f32 %v3587_v0, %v1271_v13 }
 0x261   : > { %v1296_v19 = vsel %vm1295_vm11, %v3585_v62, %v1292_v16 }
 0x262   : > { %v1300_v20 = vmul.f32 %v1296_v19, %v4818_v33  ;;  %v1276_v21 = vsel %vm1275_vm14, %v3587_v0, %v1272_v17 }
 0x263   : > { %v1298_v24 = vmul.f32 %v1276_v21, %v4820_v34 }
 0x264   : > { %v1307_v27 = vmul.f32 %v3566_v14, %v1300_v20 }
 0x265   : > { %v1305_v28 = vmul.f32 %v3566_v14, %v1298_v24 }
 0x266   : > { %v1314_v30 = vadd.f32 %v3567_v22, %v1307_v27 }
 0x267   : > { %v1312_v31 = vadd.f32 %v3567_v22, %v1305_v28 }
 0x268   : > { %v1326_v32 = vpack.c.bf16 %v1314_v30, %v1313_v29 }
 0x269   : > { %v1325_v35 = vpack.c.bf16 %v1312_v31, %v1311_v23 }
 0x26a   : > { %3299 = vmatmul.msk.bf16.vlgmr.msra.gmra.mxu1 %vm1205_vm1, %v1326_v32 }
 0x26b   : > { %3298 = vmatmul.msk.bf16.vlgmr.msra.gmra.mxu0 %vm1205_vm1, %v1325_v35 }
 0x2e7   : > { %v1362_v33 = vpop.f32.mrf.mxu1 }
 0x2e8   : > { %v1357_v36 = vpop.f32.mrf.mxu0  ;;  %v1363_v38 = vadd.f32 %v3568_v37, %v1362_v33 }
 0x2e9   : > { %v1358_v39 = vadd.f32 %v3568_v37, %v1357_v36 }
 0x2ea   : > { %v1369_v43 = vmul.f32 0.35355338, %v1363_v38 }
 0x2eb   : > { %v1367_v46 = vmul.f32 0.35355338, %v1358_v39 }
 0x2ef   : > { %v1364_v34 = vpop.f32.mrf.mxu1 }
 0x2f0   : > { %v1359_v40 = vpop.f32.mrf.mxu0  ;;  %v1365_v41 = vadd.f32 %v3568_v37, %v1364_v34 }
 0x2f1   : > { %v1360_v42 = vadd.f32 %v3568_v37, %v1359_v40 }
 0x2f2   : > { %v1370_v44 = vmul.f32 0.35355338, %v1365_v41  ;;  %v4846_v45 = vpack.c.bf16 %v1365_v41, %v1363_v38 }
 0x2f3   : > { %v1368_v47 = vmul.f32 0.35355338, %v1360_v42  ;;  %v4848_v48 = vpack.c.bf16 %v1360_v42, %v1358_v39 }
 0x2f4   : > { %v4850_v49 = vpack.c.bf16 %v1370_v44, %v1369_v43  ;;  %1379 = vrot.lane.b32.xlu2 %v4846_v45, %s4255_s0  ;;  %1461 = vrot.lane.b32.xlu1 %v4846_v45, %s4256_s24 }
 0x2f5   : > { %v4856_v50 = vpack.c.bf16 %v1368_v47, %v1367_v46  ;;  %1377 = vrot.lane.b32.xlu0 %v4848_v48, %s4255_s0 }
 0x2fc   : > { %1459 = vrot.lane.b32.xlu1 %v4848_v48, %s4256_s24 }
 0x2fd   : > { %1496 = vrot.lane.b32.xlu0 %v4848_v48, %s4257_s30 }
 0x34e   : > { %v1380_v51 = vpop.permute.xlu2 %1379 }
 0x34f   : > { %v1392_v52 = vsel %vm1381_vm15, %v1380_v51, 0 }
 0x350   : > { %1400 = vmatpush.bf16.xpose.msrb.mxu1 %v1392_v52 }
 0x366   : > { %v1462_v53 = vpop.permute.xlu1 %1461 }
 0x367   : > { %v1378_v54 = vpop.permute.xlu0 %1377  ;;  %1477 = vmatpush.bf16.msra.mxu2 %v1462_v53  ;;  %3417 = vmatpush.bf16.msra.mxu3 %v1462_v53 }
 0x368   : > { %v1389_v55 = vsel %vm1381_vm15, %v1378_v54, 0 }
 0x369   : > { %1401 = vmatpush.bf16.xpose.msrb.mxu1 %v1389_v55 }
 0x36e   : > { %v1460_v56 = vpop.permute.xlu1 %1459 }
 0x36f   : > { %1478 = vmatpush.bf16.msra.mxu2 %v1460_v56  ;;  %3418 = vmatpush.bf16.msra.mxu3 %v1460_v56  ;;  %v1497_v12 = vpop.permute.xlu0 %1496 }
 0x370   : > { %3300 = vmatmul.msk.bf16.vlgmr.msrb.gmra.mxu1 %vm1381_vm15, %v4856_v50  ;;  %v1507_v15 = vsel %vm1381_vm15, %v1497_v12, 0 }
 0x380   : > { %3301 = vmatmul.msk.bf16.gmra.mxu1 %vm1381_vm15, %v4850_v49 }
 0x3ed   : > { %v1403_v57 = vpop.f32.mrf.mxu1 }
 0x3ee   : > { %v1413_v58 = vsel %vm1205_vm1, %v1403_v57, -inf }
 0x3ef   : > { %1414 = vmax.xlane.f32.xlu1 %v1413_v58 }
 0x3f5   : > { %v1405_v59 = vpop.f32.mrf.mxu1 }
 0x3f6   : > { %v1416_v60 = vsel %vm1205_vm1, %v1405_v59, -inf }
 0x3f7   : > { %1417 = vmax.xlane.f32.xlu2 %v1416_v60 }
 0x3fd   : > { %v1408_v61 = vpop.f32.mrf.mxu1 }
 0x3fe   : > { %v1419_v62 = vsel %vm1205_vm1, %v1408_v61, -inf }
 0x3ff   : > { %1420 = vmax.xlane.f32.xlu1 %v1419_v62 }
 0x405   : > { %v1410_v63 = vpop.f32.mrf.mxu1 }
 0x406   : > { %v1422_v0 = vsel %vm1205_vm1, %v1410_v63, -inf }
 0x407   : > { %1423 = vmax.xlane.f32.xlu1 %v1422_v0 }
 0x40f   : > { %1498 = vrot.lane.b32.xlu2 %v4846_v45, %s4257_s30 }
 0x462   : > { %v1415_v1 = vpop.xlane.xlu1 %1414 }
 0x463   : > { %v1425_v22 = vsub.f32 %v1403_v57, %v1415_v1 }
 0x465   : > { %v1429_v25 = vmul.f32 1.442695, %v1425_v22 }
 0x46a   : > { %v1418_v2 = vpop.xlane.xlu2 %1417 }
 0x46b   : > { %v1426_v3 = vsub.f32 %v1405_v59, %v1418_v2 }
 0x46d   : > { %v1431_v4 = vmul.f32 1.442695, %v1426_v3 }
 0x46f   : > { %3588 = vpow2.f32 %v1431_v4 }
 0x472   : > { %v1499_v5 = vpop.permute.xlu2 %1498  ;;  %v1421_v6 = vpop.xlane.xlu1 %1420 }
 0x473   : > { %v1427_v7 = vsub.f32 %v1408_v61, %v1421_v6  ;;  %v1510_v8 = vsel %vm1381_vm15, %v1499_v5, 0 }
 0x474   : > { %1518 = vmatpush.bf16.xpose.msrb.mxu3 %v1510_v8 }
 0x475   : > { %v4877_v9 = vpop.eup %3588  ;;  %v1433_v10 = vmul.f32 1.442695, %v1427_v7 }
 0x476   : > { %v1440_v11 = vsel %vm1205_vm1, %v4877_v9, 0.0 }
 0x477   : > { %3590 = vpow2.f32 %v1433_v10  ;;  %1441 = vadd.xlane.f32.xlu2 %v1440_v11 }
 0x47a   : > { %v1424_v13 = vpop.xlane.xlu1 %1423 }
 0x47b   : > { %v1428_v14 = vsub.f32 %v1410_v63, %v1424_v13 }
 0x47c   : > { %1519 = vmatpush.bf16.xpose.msrb.mxu3 %v1507_v15 }
 0x47d   : > { %v3591_v16 = vpop.eup %3590  ;;  %v1435_v17 = vmul.f32 1.442695, %v1428_v14 }
 0x47e   : > { %v1443_v19 = vsel %vm1205_vm1, %v3591_v16, 0.0 }
 0x47f   : > { %3592 = vpow2.f32 %v1435_v17  ;;  %1444 = vadd.xlane.f32.xlu0 %v1443_v19 }
 0x480   : > { %3594 = vpow2.f32 %v1429_v25 }
 0x485   : > { %v3593_v20 = vpop.eup %3592 }
 0x486   : > { %v1446_v21 = vsel %vm1205_vm1, %v3593_v20, 0.0  ;;  %v3595_v24 = vpop.eup %3594 }
 0x487   : > { %1447 = vadd.xlane.f32.xlu1 %v1446_v21  ;;  %v1437_v26 = vsel %vm1205_vm1, %v3595_v24, 0.0 }
 0x48f   : > { %1610 = vrot.lane.b32.xlu2 %v4850_v49, %s4258_s1 }
 0x493   : > { %1614 = vrot.lane.b32.xlu0 %v4846_v45, %s4259_s21 }
 0x49b   : > { %1494 = vrot.lane.b32.xlu0 %v4850_v49, %s4260_s29 }
 0x4a0   : > { %1492 = vrot.lane.b32.xlu1 %v4856_v50, %s4260_s29 }
 0x4a3   : > { %1730 = vrot.lane.b32.xlu0 %v4846_v45, %s4261_s18 }
 0x4ab   : > { %1612 = vrot.lane.b32.xlu0 %v4848_v48, %s4259_s21 }
 0x4b3   : > { %1728 = vrot.lane.b32.xlu0 %v4848_v48, %s4261_s18 }
 0x4bb   : > { %1724 = vrot.lane.b32.xlu0 %v4856_v50, %s4262_s23 }
 0x4c3   : > { %1726 = vrot.lane.b32.xlu0 %v4850_v49, %s4262_s23 }
 0x4ca   : > { %1438 = vadd.xlane.f32.xlu1 %v1437_v26 }
 0x4e3   : > { %1608 = vrot.lane.b32.xlu1 %v4856_v50, %s4258_s1 }
 0x4ea   : > { %v1442_v44 = vpop.xlane.xlu2 %1441 }
 0x4f2   : > { %v1445_v27 = vpop.xlane.xlu0 %1444  ;;  %v1611_v55 = vpop.permute.xlu2 %1610 }
 0x4f3   : > { %3596 = vrcp.f32 %v1445_v27 }
 0x4f9   : > { %v3597_v29 = vpop.eup %3596 }
 0x4fa   : > { %v1448_v28 = vpop.xlane.xlu1 %1447  ;;  %v1455_v23 = vmul.f32 %v3597_v29, %v3591_v16 }
 0x4fb   : > { %3598 = vrcp.f32 %v1448_v28 }
 0x4fc   : > { %3600 = vrcp.f32 %v1442_v44 }
 0x501   : > { %v3599_v30 = vpop.eup %3598 }
 0x502   : > { %v1456_v31 = vmul.f32 %v3599_v30, %v3593_v20  ;;  %v3601_v47 = vpop.eup %3600 }
 0x503   : > { %v1454_v52 = vmul.f32 %v3601_v47, %v4877_v9 }
 0x504   : > { %v1458_v32 = vpack.c.bf16 %v1456_v31, %v1455_v23 }
 0x505   : > { %v1615_v35 = vpop.permute.xlu0 %1614 }
 0x506   : > { %3303 = vmatmul.msk.bf16.vlgmr.msra.gmra.mxu3 %vm1205_vm1, %v1458_v32  ;;  %v1626_v33 = vsel %vm1381_vm15, %v1615_v35, 0 }
 0x507   : > { %1634 = vmatpush.bf16.xpose.msrb.mxu2 %v1626_v33 }
 0x50d   : > { %v1495_v36 = vpop.permute.xlu0 %1494 }
 0x512   : > { %v1493_v37 = vpop.permute.xlu1 %1492 }
 0x515   : > { %v1731_v38 = vpop.permute.xlu0 %1730 }
 0x516   : > { %v1742_v39 = vsel %vm1381_vm15, %v1731_v38, 0  ;;  %3304 = vmatmul.msk.bf16.vlgmr.msrb.gmra.mxu3 %vm1381_vm15, %v1493_v37 }
 0x517   : > { %1750 = vmatpush.bf16.xpose.msra.mxu3 %v1742_v39 }
 0x51d   : > { %v1613_v34 = vpop.permute.xlu0 %1612 }
 0x51e   : > { %v1623_v40 = vsel %vm1381_vm15, %v1613_v34, 0 }
 0x51f   : > { %1635 = vmatpush.bf16.xpose.msrb.mxu2 %v1623_v40 }
 0x525   : > { %v1729_v41 = vpop.permute.xlu0 %1728 }
 0x526   : > { %v1739_v42 = vsel %vm1381_vm15, %v1729_v41, 0  ;;  %3305 = vmatmul.msk.bf16.gmra.mxu3 %vm1381_vm15, %v1495_v36 }
 0x527   : > { %1751 = vmatpush.bf16.xpose.msra.mxu3 %v1739_v42 }
 0x52d   : > { %v1725_v43 = vpop.permute.xlu0 %1724 }
 0x535   : > { %v1727_v50 = vpop.permute.xlu0 %1726 }
 0x536   : > { %3312 = vmatmul.msk.bf16.vlgmr.msra.gmra.mxu3 %vm1381_vm15, %v1725_v43 }
 0x53d   : > { %v1439_v46 = vpop.xlane.xlu1 %1438 }
 0x53e   : > { %3602 = vrcp.f32 %v1439_v46 }
 0x544   : > { %v3603_v49 = vpop.eup %3602 }
 0x545   : > { %v1453_v51 = vmul.f32 %v3603_v49, %v3595_v24 }
 0x546   : > { %3313 = vmatmul.msk.bf16.gmra.mxu3 %vm1381_vm15, %v1727_v50 }
 0x547   : > { %v1457_v53 = vpack.c.bf16 %v1454_v52, %v1453_v51 }
 0x549   : > { %3302 = vmatmul.msk.bf16.vlgmr.msra.gmra.mxu2 %vm1205_vm1, %v1457_v53 }
 0x555   : > { %v1609_v54 = vpop.permute.xlu1 %1608 }
 0x559   : > { %3308 = vmatmul.msk.bf16.vlgmr.msrb.gmra.mxu2 %vm1381_vm15, %v1609_v54 }
 0x569   : > { %3309 = vmatmul.msk.bf16.gmra.mxu2 %vm1381_vm15, %v1611_v55 }
 0x589   : > { %v4918_v56 = vpop.f32.mrf.mxu3 }
 0x591   : > { %v4920_v57 = vpop.f32.mrf.mxu3 }
 0x599   : > { %v1521_v58 = vpop.f32.mrf.mxu3 }
 0x59a   : > { %v1531_v59 = vsel %vm1205_vm1, %v1521_v58, -inf }
 0x59b   : > { %1532 = vmax.xlane.f32.xlu0 %v1531_v59 }
 0x5a1   : > { %v1523_v0 = vpop.f32.mrf.mxu3 }
 0x5a2   : > { %v1534_v2 = vsel %vm1205_vm1, %v1523_v0, -inf }
 0x5a9   : > { %v1526_v6 = vpop.f32.mrf.mxu3 }
 0x5aa   : > { %v1537_v8 = vsel %vm1205_vm1, %v1526_v6, -inf }
 0x5b1   : > { %v4943_v10 = vpop.f32.mrf.mxu3 }
 0x5b2   : > { %v1540_v17 = vsel %vm1205_vm1, %v4943_v10, -inf }
 0x5b9   : > { %v4947_v11 = vpop.f32.mrf.mxu3 }
 0x5ba   : > { %v1763_v20 = vsel %vm1205_vm1, %v4947_v11, -inf }
 0x5c1   : > { %v4949_v12 = vpop.f32.mrf.mxu3 }
 0x5c2   : > { %v1766_v13 = vsel %vm1205_vm1, %v4949_v12, -inf }
 0x5c9   : > { %v4953_v14 = vpop.f32.mrf.mxu3 }
 0x5ca   : > { %v1769_v15 = vsel %vm1205_vm1, %v4953_v14, -inf }
 0x5cc   : > { %v4923_v60 = vpop.f32.mrf.mxu2 }
 0x5d1   : > { %v4957_v16 = vpop.f32.mrf.mxu3 }
 0x5d2   : > { %v1772_v19 = vsel %vm1205_vm1, %v4957_v16, -inf }
 0x5d4   : > { %v4925_v61 = vpop.f32.mrf.mxu2 }
 0x5dc   : > { %v1637_v62 = vpop.f32.mrf.mxu2 }
 0x5dd   : > { %v1647_v63 = vsel %vm1205_vm1, %v1637_v62, -inf }
 0x5de   : > { %1648 = vmax.xlane.f32.xlu1 %v1647_v63 }
 0x5e4   : > { %v1639_v1 = vpop.f32.mrf.mxu2 }
 0x5e5   : > { %v1650_v3 = vsel %vm1205_vm1, %v1639_v1, -inf }
 0x5e6   : > { %1535 = vmax.xlane.f32.xlu1 %v1534_v2  ;;  %1651 = vmax.xlane.f32.xlu2 %v1650_v3 }
 0x5ec   : > { %v4930_v4 = vpop.f32.mrf.mxu2 }
 0x5ed   : > { %v1653_v5 = vsel %vm1205_vm1, %v4930_v4, -inf }
 0x5ee   : > { %1654 = vmax.xlane.f32.xlu2 %v1653_v5 }
 0x5f4   : > { %v4934_v7 = vpop.f32.mrf.mxu2 }
 0x5f5   : > { %v1656_v9 = vsel %vm1205_vm1, %v4934_v7, -inf }
 0x5f6   : > { %1538 = vmax.xlane.f32.xlu2 %v1537_v8  ;;  %1657 = vmax.xlane.f32.xlu0 %v1656_v9 }
 0x5ff   : > { %1695 = vrot.lane.b32.xlu1 %v4846_v45, %s4263_s26 }
 0x60a   : > { %1577 = vrot.lane.b32.xlu0 %v4848_v48, %s4264_s2 }
 0x60e   : > { %1579 = vrot.lane.b32.xlu2 %v4846_v45, %s4264_s2  ;;  %v1533_v27 = vpop.xlane.xlu0 %1532 }
 0x60f   : > { %v1543_v32 = vsub.f32 %v1521_v58, %v1533_v27 }
 0x611   : > { %v1547_v33 = vmul.f32 1.442695, %v1543_v32 }
 0x629   : > { %1767 = vmax.xlane.f32.xlu1 %v1766_v13 }
 0x631   : > { %1770 = vmax.xlane.f32.xlu1 %v1769_v15 }
 0x634   : > { %1541 = vmax.xlane.f32.xlu0 %v1540_v17 }
 0x637   : > { %1773 = vmax.xlane.f32.xlu2 %v1772_v19 }
 0x63c   : > { %1764 = vmax.xlane.f32.xlu0 %v1763_v20 }
 0x651   : > { %v1649_v21 = vpop.xlane.xlu1 %1648 }
 0x652   : > { %v1659_v22 = vsub.f32 %v1637_v62, %v1649_v21 }
 0x654   : > { %v1663_v25 = vmul.f32 1.442695, %v1659_v22 }
 0x656   : > { %3604 = vpow2.f32 %v1663_v25 }
 0x659   : > { %v1536_v24 = vpop.xlane.xlu1 %1535  ;;  %v1652_v26 = vpop.xlane.xlu2 %1651 }
 0x65a   : > { %v1544_v28 = vsub.f32 %v1523_v0, %v1536_v24  ;;  %v1660_v29 = vsub.f32 %v1639_v1, %v1652_v26 }
 0x65c   : > { %v4965_v30 = vpop.eup %3604  ;;  %v1549_v23 = vmul.f32 1.442695, %v1544_v28  ;;  %v1665_v31 = vmul.f32 1.442695, %v1660_v29 }
 0x65d   : > { %v1671_v35 = vsel %vm1205_vm1, %v4965_v30, 0.0 }
 0x65e   : > { %3606 = vpow2.f32 %v1549_v23  ;;  %1672 = vadd.xlane.f32.xlu1 %v1671_v35 }
 0x65f   : > { %3608 = vpow2.f32 %v1665_v31 }
 0x660   : > { %3610 = vpow2.f32 %v1547_v33 }
 0x661   : > { %v4969_v36 = vpop.xlane.xlu2 %1654 }
 0x664   : > { %v3607_v37 = vpop.eup %3606 }
 0x665   : > { %v4971_v38 = vpop.eup %3608  ;;  %v1558_v39 = vsel %vm1205_vm1, %v3607_v37, 0.0 }
 0x666   : > { %1559 = vadd.xlane.f32.xlu1 %v1558_v39  ;;  %v1674_v34 = vsel %vm1205_vm1, %v4971_v38, 0.0  ;;  %v3611_v42 = vpop.eup %3610 }
 0x667   : > { %1675 = vadd.xlane.f32.xlu0 %v1674_v34  ;;  %v1555_v44 = vsel %vm1205_vm1, %v3611_v42, 0.0 }
 0x669   : > { %v1539_v40 = vpop.xlane.xlu2 %1538  ;;  %v1658_v50 = vpop.xlane.xlu0 %1657 }
 0x66a   : > { %v1545_v41 = vsub.f32 %v1526_v6, %v1539_v40  ;;  %v1662_v53 = vsub.f32 %v4934_v7, %v1658_v50 }
 0x66c   : > { %v1551_v43 = vmul.f32 1.442695, %v1545_v41  ;;  %v1669_v54 = vmul.f32 1.442695, %v1662_v53 }
 0x66e   : > { %3612 = vpow2.f32 %v1551_v43 }
 0x66f   : > { %1556 = vadd.xlane.f32.xlu0 %v1555_v44  ;;  %3614 = vpow2.f32 %v1669_v54 }
 0x671   : > { %v1696_v46 = vpop.permute.xlu1 %1695  ;;  %v1580_v47 = vpop.permute.xlu2 %1579 }
 0x672   : > { %1595 = vmatpush.bf16.msrb.mxu0 %v1580_v47  ;;  %1711 = vmatpush.bf16.msra.mxu1 %v1696_v46 }
 0x674   : > { %v4977_v49 = vpop.eup %3612 }
 0x675   : > { %v1561_v51 = vsel %vm1205_vm1, %v4977_v49, 0.0  ;;  %v4985_v59 = vpop.eup %3614 }
 0x676   : > { %1562 = vadd.xlane.f32.xlu1 %v1561_v51  ;;  %v1680_v63 = vsel %vm1205_vm1, %v4985_v59, 0.0 }
 0x67c   : > { %v1578_v52 = vpop.permute.xlu0 %1577 }
 0x67d   : > { %1596 = vmatpush.bf16.msrb.mxu0 %v1578_v52 }
 0x683   : > { %1693 = vrot.lane.b32.xlu0 %v4848_v48, %s4263_s26 }
 0x69c   : > { %v1768_v8 = vpop.xlane.xlu1 %1767 }
 0x69d   : > { %v1776_v17 = vsub.f32 %v4949_v12, %v1768_v8 }
 0x69f   : > { %v1781_v21 = vmul.f32 1.442695, %v1776_v17 }
 0x6a4   : > { %v1771_v9 = vpop.xlane.xlu1 %1770 }
 0x6a5   : > { %v1777_v24 = vsub.f32 %v4953_v14, %v1771_v9 }
 0x6a7   : > { %v1542_v55 = vpop.xlane.xlu0 %1541  ;;  %v1783_v26 = vmul.f32 1.442695, %v1777_v24 }
 0x6a8   : > { %v1546_v58 = vsub.f32 %v4943_v10, %v1542_v55 }
 0x6aa   : > { %v1553_v62 = vmul.f32 1.442695, %v1546_v58  ;;  %v1774_v29 = vpop.xlane.xlu2 %1773 }
 0x6ab   : > { %v1778_v14 = vsub.f32 %v4957_v16, %v1774_v29 }
 0x6ac   : > { %3616 = vpow2.f32 %v1553_v62 }
 0x6ad   : > { %1681 = vadd.xlane.f32.xlu0 %v1680_v63 }
 0x6af   : > { %v1765_v0 = vpop.xlane.xlu0 %1764 }
 0x6b0   : > { %v1775_v1 = vsub.f32 %v4947_v11, %v1765_v0 }
 0x6b2   : > { %v4990_v2 = vpop.eup %3616  ;;  %v1779_v3 = vmul.f32 1.442695, %v1775_v1 }
 0x6b3   : > { %v1564_v5 = vsel %vm1205_vm1, %v4990_v2, 0.0 }
 0x6b4   : > { %3618 = vpow2.f32 %v1779_v3  ;;  %1565 = vadd.xlane.f32.xlu1 %v1564_v5 }
 0x6ba   : > { %v4994_v6 = vpop.eup %3618 }
 0x6bb   : > { %v1787_v7 = vsel %vm1205_vm1, %v4994_v6, 0.0 }
 0x6bc   : > { %1788 = vadd.xlane.f32.xlu2 %v1787_v7 }
 0x6cd   : > { %1811 = vrot.lane.b32.xlu1 %v4846_v45, %s4265_s20 }
 0x6d1   : > { %v1673_v10 = vpop.xlane.xlu1 %1672 }
 0x6d4   : > { %1809 = vrot.lane.b32.xlu2 %v4848_v48, %s4265_s20  ;;  %v1661_v48 = vsub.f32 %v4930_v4, %v4969_v36 }
 0x6d6   : > { %v1667_v28 = vmul.f32 1.442695, %v1661_v48 }
 0x6d9   : > { %v1560_v13 = vpop.xlane.xlu1 %1559 }
 0x6da   : > { %v1676_v11 = vpop.xlane.xlu0 %1675  ;;  %3620 = vrcp.f32 %v1560_v13 }
 0x6e0   : > { %v3621_v19 = vpop.eup %3620 }
 0x6e1   : > { %v1572_v22 = vmul.f32 %v3621_v19, %v3607_v37  ;;  %v1785_v37 = vmul.f32 1.442695, %v1778_v14 }
 0x6e2   : > { %v1557_v15 = vpop.xlane.xlu0 %1556 }
 0x6e3   : > { %3622 = vrcp.f32 %v1557_v15 }
 0x6e4   : > { %3624 = vrcp.f32 %v1676_v11 }
 0x6e5   : > { %3626 = vrcp.f32 %v1673_v10 }
 0x6e6   : > { %3628 = vpow2.f32 %v1781_v21 }
 0x6e7   : > { %3630 = vpow2.f32 %v1783_v26 }
 0x6e8   : > { %3632 = vpow2.f32 %v1667_v28 }
 0x6e9   : > { %v3623_v20 = vpop.eup %3622  ;;  %3634 = vpow2.f32 %v1785_v37  ;;  %v1563_v40 = vpop.xlane.xlu1 %1562 }
 0x6ea   : > { %v1571_v25 = vmul.f32 %v3623_v20, %v3611_v42  ;;  %v3625_v27 = vpop.eup %3624  ;;  %3636 = vrcp.f32 %v1563_v40 }
 0x6eb   : > { %v3627_v12 = vpop.eup %3626  ;;  %v1688_v31 = vmul.f32 %v3625_v27, %v4971_v38 }
 0x6ec   : > { %v1575_v45 = vpack.c.bf16 %v1572_v22, %v1571_v25  ;;  %v3629_v23 = vpop.eup %3628  ;;  %v1687_v32 = vmul.f32 %v3627_v12, %v4965_v30 }
 0x6ed   : > { %v1790_v4 = vsel %vm1205_vm1, %v3629_v23, 0.0  ;;  %v3631_v36 = vpop.eup %3630 }
 0x6ee   : > { %3306 = vmatmul.msk.bf16.vlgmr.msrb.gmra.mxu0 %vm1205_vm1, %v1575_v45  ;;  %v1691_v33 = vpack.c.bf16 %v1688_v31, %v1687_v32  ;;  %v3633_v39 = vpop.eup %3632  ;;  %v1793_v34 = vsel %vm1205_vm1, %v3631_v36, 0.0  ;;  %v3404_v32 = vld [vmem:[%s4777_s25 + $0x8] sm:$0xff] }
 0x6ef   : > { %v1677_v38 = vsel %vm1205_vm1, %v3633_v39, 0.0  ;;  %v3635_v16 = vpop.eup %3634  ;;  %1931 = vmatpush.bf16.msra.mxu2 %v3404_v32 }
 0x6f0   : > { %v1796_v30 = vsel %vm1205_vm1, %v3635_v16, 0.0  ;;  %v3637_v42 = vpop.eup %3636 }
 0x6f1   : > { %v1573_v44 = vmul.f32 %v3637_v42, %v4977_v49 }
 0x6f5   : > { %v1694_v35 = vpop.permute.xlu0 %1693 }
 0x6f6   : > { %1712 = vmatpush.bf16.msra.mxu1 %v1694_v35  ;;  %v3403_v35 = vld [vmem:[%s4777_s25] sm:$0xff]  ;;  %s5548_s25 = scalar_lea.vmem [#allocation9], %s4705_s5 }
 0x6f7   : > { %1791 = vadd.xlane.f32.xlu1 %v1790_v4  ;;  %1932 = vmatpush.bf16.msra.mxu2 %v3403_v35 }
 0x6f9   : > { %3310 = vmatmul.msk.bf16.vlgmr.msra.gmra.mxu1 %vm1205_vm1, %v1691_v33 }
 0x6fd   : > { %1794 = vadd.xlane.f32.xlu2 %v1793_v34 }
 0x6ff   : > { %1678 = vadd.xlane.f32.xlu1 %v1677_v38 }
 0x707   : > { %1797 = vadd.xlane.f32.xlu1 %v1796_v30 }
 0x720   : > { %v1682_v55 = vpop.xlane.xlu0 %1681 }
 0x727   : > { %v1566_v41 = vpop.xlane.xlu1 %1565 }
 0x728   : > { %3638 = vrcp.f32 %v1566_v41 }
 0x72e   : > { %v3639_v43 = vpop.eup %3638 }
 0x72f   : > { %v1574_v46 = vmul.f32 %v3639_v43, %v4990_v2  ;;  %v1789_v50 = vpop.xlane.xlu2 %1788 }
 0x730   : > { %3640 = vrcp.f32 %v1789_v50 }
 0x731   : > { %v1576_v47 = vpack.c.bf16 %v1574_v46, %v1573_v44 }
 0x733   : > { %3307 = vmatmul.msk.bf16.gmra.mxu0 %vm1205_vm1, %v1576_v47 }
 0x736   : > { %v3641_v58 = vpop.eup %3640 }
 0x737   : > { %v1810_v52 = vpop.permute.xlu2 %1809  ;;  %v1803_v49 = vmul.f32 %v3641_v58, %v4994_v6 }
 0x73f   : > { %v1812_v51 = vpop.permute.xlu1 %1811 }
 0x740   : > { %1827 = vmatpush.bf16.msra.mxu0 %v1812_v51 }
 0x744   : > { %1828 = vmatpush.bf16.msra.mxu0 %v1810_v52 }
 0x76a   : > { %v1792_v53 = vpop.xlane.xlu1 %1791 }
 0x76b   : > { %3642 = vrcp.f32 %v1792_v53  ;;  %v1598_v54 = vpop.f32.mrf.mxu0 }
 0x76c   : > { %3644 = vrcp.f32 %v1682_v55 }
 0x770   : > { %v1795_v5 = vpop.xlane.xlu2 %1794 }
 0x771   : > { %v3643_v62 = vpop.eup %3642 }
 0x772   : > { %v1804_v63 = vmul.f32 %v3643_v62, %v3629_v23  ;;  %v1679_v0 = vpop.xlane.xlu1 %1678  ;;  %v3645_v8 = vpop.eup %3644 }
 0x773   : > { %3646 = vrcp.f32 %v1679_v0  ;;  %v1600_v1 = vpop.f32.mrf.mxu0  ;;  %v1690_v6 = vmul.f32 %v3645_v8, %v4985_v59  ;;  %v3732_v8 = vld [vmem:[#allocation2] sm:$0xff] }
 0x774   : > { %v1807_v2 = vpack.c.bf16 %v1804_v63, %v1803_v49  ;;  %v3506_v3 = vpack.i.bf16 %v1600_v1, %v1598_v54  ;;  %3648 = vrcp.f32 %v1795_v5  ;;  %v3569_v5 = vld [vmem:[%s5548_s25] ss:$0 sm:$0xff]  ;;  %s5550_s25 = smov %s5549_s7 }
 0x776   : > { %3507 = vrot.lane.b32.xlu1 %v3506_v3, %s4266_s6  ;;  %v1714_v7 = vpop.f32.mrf.mxu1  ;;  %3314 = vmatmul.msk.bf16.vlgmr.msra.gmra.mxu0 %vm1205_vm1, %v1807_v2 }
 0x779   : > { %v3647_v9 = vpop.eup %3646 }
 0x77a   : > { %v1798_v10 = vpop.xlane.xlu1 %1797  ;;  %v1689_v11 = vmul.f32 %v3647_v9, %v3633_v39  ;;  %v3649_v17 = vpop.eup %3648 }
 0x77b   : > { %3650 = vrcp.f32 %v1798_v10  ;;  %v1805_v21 = vmul.f32 %v3649_v17, %v3631_v36 }
 0x77c   : > { %v1692_v13 = vpack.c.bf16 %v1690_v6, %v1689_v11  ;;  %v3733_v6 = vld [vmem:[#allocation2 + $0x8] sm:$0xff] }
 0x77e   : > { %v1716_v15 = vpop.f32.mrf.mxu1  ;;  %3311 = vmatmul.msk.bf16.gmra.mxu1 %vm1205_vm1, %v1692_v13 }
 0x77f   : > { %v3511_v19 = vpack.i.bf16 %v1716_v15, %v1714_v7 }
 0x781   : > { %v3651_v20 = vpop.eup %3650  ;;  %3512 = vrot.lane.b32.xlu0 %v3511_v19, %s4267_s28 }
 0x782   : > { %v1806_v22 = vmul.f32 %v3651_v20, %v3635_v16  ;;  %v3734_v20 = vld [vmem:[#allocation2 + $0x10] sm:$0xff] }
 0x784   : > { %v1808_v25 = vpack.c.bf16 %v1806_v22, %v1805_v21 }
 0x786   : > { %3315 = vmatmul.msk.bf16.gmra.mxu0 %vm1205_vm1, %v1808_v25 }
 0x7b0   : > { %v1603_v24 = vpop.f32.mrf.mxu0 }
 0x7b8   : > { %v1605_v45 = vpop.f32.mrf.mxu0 }
 0x7b9   : > { %v3521_v59 = vpack.i.bf16 %v1605_v45, %v1603_v24  ;;  %v3735_v45 = vld [vmem:[#allocation2 + $0x18] sm:$0xff] }
 0x7bb   : > { %3522 = vrot.lane.b32.xlu1 %v3521_v59, %s4266_s6 }
 0x7e8   : > { %v3508_v4 = vpop.permute.xlu1 %3507 }
 0x7e9   : > { %v3510_v36 = vunpack.i.h.bf16 %v3508_v4  ;;  %v3509_v37 = vunpack.i.l.bf16 %v3508_v4 }
 0x7eb   : > { %v1889_v16 = vsel %vm1381_vm15, %v4925_v61, %v3510_v36  ;;  %v1888_v30 = vsel %vm1381_vm15, %v4923_v60, %v3509_v37 }
 0x7f3   : > { %v1830_v48 = vpop.f32.mrf.mxu0  ;;  %v3513_v33 = vpop.permute.xlu0 %3512 }
 0x7f4   : > { %v3515_v39 = vunpack.i.h.bf16 %v3513_v33  ;;  %v3514_v34 = vunpack.i.l.bf16 %v3513_v33 }
 0x7f6   : > { %v1894_v42 = vsel %vm1892_vm0, %v1889_v16, %v3515_v39  ;;  %v1893_v43 = vsel %vm1892_vm0, %v1888_v30, %v3514_v34 }
 0x7fb   : > { %v1719_v26 = vpop.f32.mrf.mxu1  ;;  %v1832_v27 = vpop.f32.mrf.mxu0 }
 0x7fc   : > { %v3516_v28 = vpack.i.bf16 %v1832_v27, %v1830_v48 }
 0x7fe   : > { %3517 = vrot.lane.b32.xlu2 %v3516_v28, %s4268_s8 }
 0x803   : > { %v1721_v12 = vpop.f32.mrf.mxu1  ;;  %v1835_v29 = vpop.f32.mrf.mxu0 }
 0x804   : > { %v3526_v23 = vpack.i.bf16 %v1721_v12, %v1719_v26 }
 0x806   : > { %3527 = vrot.lane.b32.xlu0 %v3526_v23, %s4267_s28 }
 0x80b   : > { %v1837_v31 = vpop.f32.mrf.mxu0 }
 0x80c   : > { %v3531_v14 = vpack.i.bf16 %v1837_v31, %v1835_v29 }
 0x80e   : > { %3532 = vrot.lane.b32.xlu1 %v3531_v14, %s4268_s8 }
 0x82d   : > { %v3523_v50 = vpop.permute.xlu1 %3522 }
 0x82e   : > { %v3525_v61 = vunpack.i.h.bf16 %v3523_v50  ;;  %v3524_v52 = vunpack.i.l.bf16 %v3523_v50 }
 0x830   : > { %v1891_v55 = vsel %vm1381_vm15, %v4920_v57, %v3525_v61  ;;  %v1890_v58 = vsel %vm1381_vm15, %v4918_v56, %v3524_v52 }
 0x858   : > { %v3518_v38 = vpop.permute.xlu2 %3517 }
 0x859   : > { %v3520_v40 = vunpack.i.h.bf16 %v3518_v38  ;;  %v3519_v41 = vunpack.i.l.bf16 %v3518_v38 }
 0x85b   : > { %v1898_v44 = vsel %vm1897_vm2, %v1893_v43, %v3519_v41  ;;  %v1899_v46 = vsel %vm1897_vm2, %v1894_v42, %v3520_v40  ;;  %v3406_v41 = vld [vmem:[%s5549_s7 + $0x8] sm:$0xff]  ;;  %s5551_s7 = scalar_lea.vmem [#allocation11], %s4705_s5 }
 0x85c   : > { %v1902_v47 = vpack.c.bf16 %v1899_v46, %v1898_v44  ;;  %2091 = vmatpush.bf16.msrb.mxu1 %v3406_v41  ;;  %v3405_v46 = vld [vmem:[%s5550_s25] sm:$0xff]  ;;  %s5552_s25 = scalar_lea.vmem [#allocation12], %s4705_s5 }
 0x85e   : > { %3324 = vmatmul.msk.bf16.vlgmr.msra.gmra.mxu2 %vm1205_vm1, %v1902_v47 }
 0x860   : > { %2092 = vmatpush.bf16.msrb.mxu1 %v3405_v46 }
 0x878   : > { %v3528_v51 = vpop.permute.xlu0 %3527 }
 0x879   : > { %v3530_v53 = vunpack.i.h.bf16 %v3528_v51  ;;  %v3529_v60 = vunpack.i.l.bf16 %v3528_v51 }
 0x87b   : > { %v1896_v63 = vsel %vm1892_vm0, %v1891_v55, %v3530_v53  ;;  %v1895_v0 = vsel %vm1892_vm0, %v1890_v58, %v3529_v60 }
 0x880   : > { %v3533_v54 = vpop.permute.xlu1 %3532 }
 0x881   : > { %v3535_v62 = vunpack.i.h.bf16 %v3533_v54  ;;  %v3534_v49 = vunpack.i.l.bf16 %v3533_v54 }
 0x883   : > { %v1900_v1 = vsel %vm1897_vm2, %v1895_v0, %v3534_v49  ;;  %v1901_v2 = vsel %vm1897_vm2, %v1896_v63, %v3535_v62 }
 0x884   : > { %v1903_v3 = vpack.c.bf16 %v1901_v2, %v1900_v1  ;;  %v3570_v2 = vld [vmem:[%s5551_s7] ss:$0 sm:$0xff]  ;;  %s5553_s7 = scalar_lea.vmem [#allocation15], %s4705_s5 }
 0x886   : > { %3325 = vmatmul.msk.bf16.gmra.mxu2 %vm1205_vm1, %v1903_v3 }
 0x8e1   : > { %v1934_v7 = vpop.f32.mrf.mxu2 }
 0x8e2   : > { %v1935_v57 = vadd.f32 %v3569_v5, %v1934_v7 }
 0x8e4   : > { %v5051_v9 = vadd.f32 %v3732_v8, %v1935_v57  ;;  %v3571_v57 = vld [vmem:[%s5552_s25] ss:$0 sm:$0xff] }
 0x8e6   : > { %v1950_v56 = vsel %vm1205_vm1, %v5051_v9, 0.0 }
 0x8e7   : > { %1951 = vadd.xlane.f32.xlu0 %v1950_v56 }
 0x8e9   : > { %v1936_v10 = vpop.f32.mrf.mxu2 }
 0x8ea   : > { %v1937_v11 = vadd.f32 %v3569_v5, %v1936_v10 }
 0x8ec   : > { %v5055_v13 = vadd.f32 %v3733_v6, %v1937_v11 }
 0x8ee   : > { %v1953_v15 = vsel %vm1205_vm1, %v5055_v13, 0.0 }
 0x8ef   : > { %1954 = vadd.xlane.f32.xlu2 %v1953_v15 }
 0x909   : > { %v1939_v17 = vpop.f32.mrf.mxu2 }
 0x90a   : > { %v1940_v19 = vadd.f32 %v3569_v5, %v1939_v17 }
 0x90c   : > { %v5059_v21 = vadd.f32 %v3734_v20, %v1940_v19 }
 0x90e   : > { %v1956_v22 = vsel %vm1205_vm1, %v5059_v21, 0.0 }
 0x90f   : > { %1957 = vadd.xlane.f32.xlu1 %v1956_v22 }
 0x911   : > { %v1941_v25 = vpop.f32.mrf.mxu2 }
 0x912   : > { %v1942_v24 = vadd.f32 %v3569_v5, %v1941_v25 }
 0x914   : > { %v5063_v59 = vadd.f32 %v3735_v45, %v1942_v24 }
 0x916   : > { %v1959_v48 = vsel %vm1205_vm1, %v5063_v59, 0.0 }
 0x917   : > { %1960 = vadd.xlane.f32.xlu0 %v1959_v48 }
 0x95a   : > { %v1952_v26 = vpop.xlane.xlu0 %1951 }
 0x95b   : > { %v1962_v27 = vmul.f32 %v1952_v26, %v4802_v18 }
 0x95d   : > { %v1966_v28 = vsub.f32 %v5051_v9, %v1962_v27 }
 0x95f   : > { %v1970_v12 = vmul.f32 %v1966_v28, %v1966_v28 }
 0x961   : > { %v1974_v29 = vsel %vm1205_vm1, %v1970_v12, 0.0 }
 0x962   : > { %v1955_v23 = vpop.xlane.xlu2 %1954  ;;  %1975 = vadd.xlane.f32.xlu2 %v1974_v29 }
 0x963   : > { %v1963_v31 = vmul.f32 %v1955_v23, %v4802_v18 }
 0x965   : > { %v1967_v14 = vsub.f32 %v5055_v13, %v1963_v31 }
 0x967   : > { %v1971_v32 = vmul.f32 %v1967_v14, %v1967_v14 }
 0x969   : > { %v1977_v35 = vsel %vm1205_vm1, %v1971_v32, 0.0 }
 0x96a   : > { %1978 = vadd.xlane.f32.xlu1 %v1977_v35 }
 0x982   : > { %v1958_v4 = vpop.xlane.xlu1 %1957 }
 0x983   : > { %v1964_v33 = vmul.f32 %v1958_v4, %v4802_v18 }
 0x985   : > { %v5075_v36 = vsub.f32 %v5059_v21, %v1964_v33 }
 0x987   : > { %v1972_v37 = vmul.f32 %v5075_v36, %v5075_v36 }
 0x989   : > { %v1980_v39 = vsel %vm1205_vm1, %v1972_v37, 0.0 }
 0x98a   : > { %1981 = vadd.xlane.f32.xlu0 %v1980_v39  ;;  %v1961_v34 = vpop.xlane.xlu0 %1960 }
 0x98b   : > { %v1965_v38 = vmul.f32 %v1961_v34, %v4802_v18 }
 0x98d   : > { %v5082_v16 = vsub.f32 %v5063_v59, %v1965_v38 }
 0x98f   : > { %v1973_v30 = vmul.f32 %v5082_v16, %v5082_v16 }
 0x991   : > { %v1983_v40 = vsel %vm1205_vm1, %v1973_v30, 0.0 }
 0x992   : > { %1984 = vadd.xlane.f32.xlu2 %v1983_v40 }
 0x9d5   : > { %v1976_v42 = vpop.xlane.xlu2 %1975 }
 0x9d6   : > { %v1986_v43 = vmul.f32 %v1976_v42, %v4802_v18 }
 0x9d8   : > { %v1990_v44 = vadd.f32 1e-05, %v1986_v43  ;;  %v3572_v43 = vld [vmem:[%s5553_s7] ss:$0 sm:$0xff]  ;;  %s5561_s7 = scalar_lea.vmem [#allocation21], %s4705_s5 }
 0x9da   : > { %3652 = vrsqrt.f32 %v1990_v44  ;;  %vm2000_vm4 = vweird.f32 %v1990_v44 }
 0x9dd   : > { %v1979_v47 = vpop.xlane.xlu1 %1978 }
 0x9de   : > { %v1987_v50 = vmul.f32 %v1979_v47, %v4802_v18 }
 0x9e0   : > { %v3653_v51 = vpop.eup %3652  ;;  %v1991_v61 = vadd.f32 1e-05, %v1987_v50 }
 0x9e1   : > { %v1995_v52 = vmul.f32 %v3653_v51, %v1990_v44  ;;  %vm2001_vm3 = vweird.f32 %v3653_v51 }
 0x9e2   : > { %3654 = vrsqrt.f32 %v1991_v61  ;;  %vm2002_vm5 = vmor %vm2000_vm4, %vm2001_vm3  ;;  %vm2010_vm7 = vweird.f32 %v1991_v61 }
 0x9e3   : > { %v1996_v53 = vmul.f32 %v3653_v51, %v1995_v52 }
 0x9e5   : > { %v1997_v60 = vmul.f32 0.5, %v1996_v53 }
 0x9e7   : > { %v1998_v54 = vsub.f32 1.5, %v1997_v60 }
 0x9e8   : > { %v3655_v55 = vpop.eup %3654 }
 0x9e9   : > { %v1999_v58 = vmul.f32 %v3653_v51, %v1998_v54  ;;  %v2005_v62 = vmul.f32 %v3655_v55, %v1991_v61  ;;  %vm2011_vm6 = vweird.f32 %v3655_v55 }
 0x9ea   : > { %vm2012_vm8 = vmor %vm2010_vm7, %vm2011_vm6 }
 0x9eb   : > { %v2006_v49 = vmul.f32 %v3655_v55, %v2005_v62  ;;  %v2003_v63 = vsel %vm2002_vm5, %v3653_v51, %v1999_v58 }
 0x9ec   : > { %v2034_v3 = vmul.f32 %v2003_v63, %v1966_v28 }
 0x9ed   : > { %v2007_v0 = vmul.f32 0.5, %v2006_v49 }
 0x9ee   : > { %v2041_v8 = vmul.f32 %v3570_v2, %v2034_v3 }
 0x9ef   : > { %v2008_v1 = vsub.f32 1.5, %v2007_v0 }
 0x9f0   : > { %v2048_v11 = vadd.f32 %v3571_v57, %v2041_v8 }
 0x9f1   : > { %v2009_v5 = vmul.f32 %v3655_v55, %v2008_v1 }
 0x9f3   : > { %v2013_v7 = vsel %vm2012_vm8, %v3655_v55, %v2009_v5 }
 0x9f4   : > { %v2035_v56 = vmul.f32 %v2013_v7, %v1967_v14 }
 0x9f6   : > { %v2042_v10 = vmul.f32 %v3570_v2, %v2035_v56 }
 0x9f8   : > { %v2049_v6 = vadd.f32 %v3571_v57, %v2042_v10 }
 0x9fa   : > { %v2062_v15 = vpack.c.bf16 %v2049_v6, %v2048_v11 }
 0x9fc   : > { %3334 = vmatmul.msk.bf16.vlgmr.msrb.gmra.mxu1 %vm1205_vm1, %v2062_v15 }
 0x9fd   : > { %v1982_v17 = vpop.xlane.xlu0 %1981 }
 0x9fe   : > { %v1988_v19 = vmul.f32 %v1982_v17, %v4802_v18 }
 0xa00   : > { %v1992_v20 = vadd.f32 1e-05, %v1988_v19 }
 0xa02   : > { %3656 = vrsqrt.f32 %v1992_v20  ;;  %vm2020_vm10 = vweird.f32 %v1992_v20 }
 0xa05   : > { %v1985_v22 = vpop.xlane.xlu2 %1984 }
 0xa06   : > { %v1989_v25 = vmul.f32 %v1985_v22, %v4802_v18 }
 0xa08   : > { %v3657_v24 = vpop.eup %3656  ;;  %v1993_v45 = vadd.f32 1e-05, %v1989_v25 }
 0xa09   : > { %v2015_v48 = vmul.f32 %v3657_v24, %v1992_v20  ;;  %vm2021_vm9 = vweird.f32 %v3657_v24 }
 0xa0a   : > { %3658 = vrsqrt.f32 %v1993_v45  ;;  %vm2022_vm11 = vmor %vm2020_vm10, %vm2021_vm9  ;;  %vm2030_vm13 = vweird.f32 %v1993_v45 }
 0xa0b   : > { %v2016_v26 = vmul.f32 %v3657_v24, %v2015_v48 }
 0xa0d   : > { %v2017_v27 = vmul.f32 0.5, %v2016_v26 }
 0xa0f   : > { %v2018_v28 = vsub.f32 1.5, %v2017_v27 }
 0xa10   : > { %v3659_v12 = vpop.eup %3658 }
 0xa11   : > { %v2019_v29 = vmul.f32 %v3657_v24, %v2018_v28  ;;  %v2025_v23 = vmul.f32 %v3659_v12, %v1993_v45  ;;  %vm2031_vm12 = vweird.f32 %v3659_v12 }
 0xa12   : > { %vm2032_vm14 = vmor %vm2030_vm13, %vm2031_vm12  ;;  %vm2875_vm12 = vcmask 523264  }
 0xa13   : > { %v2026_v31 = vmul.f32 %v3659_v12, %v2025_v23  ;;  %v2023_v14 = vsel %vm2022_vm11, %v3657_v24, %v2019_v29 }
 0xa14   : > { %v2036_v4 = vmul.f32 %v2023_v14, %v5075_v36 }
 0xa15   : > { %v2027_v32 = vmul.f32 0.5, %v2026_v31 }
 0xa16   : > { %v2043_v34 = vmul.f32 %v3570_v2, %v2036_v4 }
 0xa17   : > { %v2028_v35 = vsub.f32 1.5, %v2027_v32 }
 0xa18   : > { %v2050_v30 = vadd.f32 %v3571_v57, %v2043_v34 }
 0xa19   : > { %v2029_v33 = vmul.f32 %v3659_v12, %v2028_v35 }
 0xa1b   : > { %v2033_v37 = vsel %vm2032_vm14, %v3659_v12, %v2029_v33 }
 0xa1c   : > { %v2037_v39 = vmul.f32 %v2033_v37, %v5082_v16 }
 0xa1e   : > { %v2044_v38 = vmul.f32 %v3570_v2, %v2037_v39 }
 0xa20   : > { %v2051_v40 = vadd.f32 %v3571_v57, %v2044_v38 }
 0xa22   : > { %v2063_v41 = vpack.c.bf16 %v2051_v40, %v2050_v30 }
 0xa24   : > { %3335 = vmatmul.msk.bf16.gmra.mxu1 %vm1205_vm1, %v2063_v41 }
 0xa79   : > { %v2094_v42 = vpop.f32.mrf.mxu1 }
 0xa7a   : > { %v2095_v46 = vadd.f32 %v3572_v43, %v2094_v42 }
 0xa7c   : > { %v2104_v60 = vmul.f32 0.35355338, %v2095_v46 }
 0xa81   : > { %v2096_v44 = vpop.f32.mrf.mxu1 }
 0xa82   : > { %v2097_v47 = vadd.f32 %v3572_v43, %v2096_v44 }
 0xa84   : > { %v5105_v36 = vpack.c.bf16 %v2097_v47, %v2095_v46  ;;  %v2105_v53 = vmul.f32 0.35355338, %v2097_v47 }
 0xa86   : > { %2114 = vrot.lane.b32.xlu2 %v5105_v36, %s4255_s0  ;;  %v2108_v54 = vpack.c.bf16 %v2105_v53, %v2104_v60 }
 0xaa1   : > { %v2099_v50 = vpop.f32.mrf.mxu1 }
 0xaa2   : > { %v2100_v51 = vadd.f32 %v3572_v43, %v2099_v50 }
 0xaa4   : > { %v2106_v58 = vmul.f32 0.35355338, %v2100_v51 }
 0xaa9   : > { %v2101_v16 = vpop.f32.mrf.mxu1 }
 0xaaa   : > { %v2102_v61 = vadd.f32 %v3572_v43, %v2101_v16 }
 0xaac   : > { %v5109_v52 = vpack.c.bf16 %v2102_v61, %v2100_v51  ;;  %v2107_v55 = vmul.f32 0.35355338, %v2102_v61 }
 0xaae   : > { %2350 = vrot.lane.b32.xlu2 %v5109_v52, %s4259_s21  ;;  %2234 = vrot.lane.b32.xlu0 %v5109_v52, %s4257_s30  ;;  %v2109_v62 = vpack.c.bf16 %v2107_v55, %v2106_v58 }
 0xaaf   : > { %2116 = vrot.lane.b32.xlu1 %v5109_v52, %s4255_s0  ;;  %s5562_s0 = scalar_lea.vmem [#allocation24], %s4705_s5 }
 0xab6   : > { %2348 = vrot.lane.b32.xlu2 %v5105_v36, %s4259_s21  ;;  %2232 = vrot.lane.b32.xlu0 %v5105_v36, %s4257_s30  ;;  %s5554_s30 = sld [smem:[#allocation44_spill]] }
 0xab7   : > { %2228 = vrot.lane.b32.xlu1 %v2108_v54, %s4260_s29 }
 0xabc   : > { %v1199_v12 = vld [vmem:[%s5554_s30] sm:$0xff]  ;;  %v1200_v4 = vld [vmem:[%s5554_s30 + $0x8] sm:$0xff]  ;;  %v1201_v40 = vld [vmem:[%s5554_s30 + $0x10] sm:$0xff] }
 0xabd   : > { %v1202_v50 = vld [vmem:[%s5554_s30 + $0x18] sm:$0xff] }
 0xabe   : > { %2460 = vrot.lane.b32.xlu2 %v2108_v54, %s4262_s23  ;;  %2230 = vrot.lane.b32.xlu0 %v2109_v62, %s4260_s29 }
 0xabf   : > { %2466 = vrot.lane.b32.xlu1 %v5109_v52, %s4261_s18 }
 0xac6   : > { %2315 = vrot.lane.b32.xlu2 %v5109_v52, %s4264_s2  ;;  %2464 = vrot.lane.b32.xlu0 %v5105_v36, %s4261_s18 }
 0xac7   : > { %2344 = vrot.lane.b32.xlu1 %v2108_v54, %s4258_s1 }
 0xace   : > { %2313 = vrot.lane.b32.xlu2 %v5105_v36, %s4264_s2  ;;  %2346 = vrot.lane.b32.xlu0 %v2109_v62, %s4258_s1 }
 0xacf   : > { %2462 = vrot.lane.b32.xlu1 %v2109_v62, %s4262_s23 }
 0xad6   : > { %2195 = vrot.lane.b32.xlu0 %v5105_v36, %s4256_s24 }
 0xad7   : > { %2197 = vrot.lane.b32.xlu1 %v5109_v52, %s4256_s24 }
 0xae0   : > { %v2115_v49 = vpop.permute.xlu2 %2114 }
 0xae1   : > { %v2125_v6 = vsel %vm1381_vm15, %v2115_v49, 0 }
 0xb08   : > { %v2351_v63 = vpop.permute.xlu2 %2350 }
 0xb09   : > { %v2362_v15 = vsel %vm1381_vm15, %v2351_v63, 0 }
 0xb10   : > { %v2349_v0 = vpop.permute.xlu2 %2348 }
 0xb11   : > { %v2359_v22 = vsel %vm1381_vm15, %v2349_v0, 0 }
 0xb18   : > { %v2461_v1 = vpop.permute.xlu2 %2460 }
 0xb20   : > { %v2316_v2 = vpop.permute.xlu2 %2315  ;;  %v2235_v3 = vpop.permute.xlu0 %2234 }
 0xb21   : > { %v2246_v5 = vsel %vm1381_vm15, %v2235_v3, 0  ;;  %v2117_v7 = vpop.permute.xlu1 %2116  ;;  %2331 = vmatpush.bf16.msra.mxu1 %v2316_v2 }
 0xb22   : > { %v2128_v57 = vsel %vm1381_vm15, %v2117_v7, 0  ;;  %2254 = vmatpush.bf16.xpose.msrb.mxu2 %v2246_v5 }
 0xb23   : > { %2136 = vmatpush.bf16.xpose.msrb.mxu3 %v2128_v57 }
 0xb28   : > { %v2314_v8 = vpop.permute.xlu2 %2313  ;;  %v2233_v56 = vpop.permute.xlu0 %2232 }
 0xb29   : > { %v2243_v10 = vsel %vm1381_vm15, %v2233_v56, 0  ;;  %v2229_v11 = vpop.permute.xlu1 %2228  ;;  %2332 = vmatpush.bf16.msra.mxu1 %v2314_v8 }
 0xb2a   : > { %2255 = vmatpush.bf16.xpose.msrb.mxu2 %v2243_v10 }
 0xb2b   : > { %2137 = vmatpush.bf16.xpose.msrb.mxu3 %v2125_v6 }
 0xb30   : > { %v2231_v17 = vpop.permute.xlu0 %2230 }
 0xb31   : > { %v2467_v19 = vpop.permute.xlu1 %2466  ;;  %3340 = vmatmul.msk.bf16.vlgmr.msrb.gmra.mxu2 %vm1381_vm15, %v2229_v11 }
 0xb32   : > { %v2478_v20 = vsel %vm1381_vm15, %v2467_v19, 0  ;;  %3336 = vmatmul.msk.bf16.vlgmr.msrb.gmra.mxu3 %vm1381_vm15, %v2108_v54 }
 0xb33   : > { %2370 = vmatpush.bf16.xpose.msra.mxu3 %v2362_v15  ;;  %2486 = vmatpush.bf16.xpose.msra.mxu2 %v2478_v20 }
 0xb38   : > { %v2465_v25 = vpop.permute.xlu0 %2464 }
 0xb39   : > { %v2345_v24 = vpop.permute.xlu1 %2344  ;;  %v2475_v45 = vsel %vm1381_vm15, %v2465_v25, 0 }
 0xb3b   : > { %2371 = vmatpush.bf16.xpose.msra.mxu3 %v2359_v22  ;;  %2487 = vmatpush.bf16.xpose.msra.mxu2 %v2475_v45 }
 0xb40   : > { %v2347_v26 = vpop.permute.xlu0 %2346 }
 0xb41   : > { %v2463_v48 = vpop.permute.xlu1 %2462  ;;  %3341 = vmatmul.msk.bf16.gmra.mxu2 %vm1381_vm15, %v2231_v17 }
 0xb42   : > { %3337 = vmatmul.msk.bf16.gmra.mxu3 %vm1381_vm15, %v2109_v62 }
 0xb48   : > { %v2196_v28 = vpop.permute.xlu0 %2195 }
 0xb49   : > { %v2198_v27 = vpop.permute.xlu1 %2197 }
 0xb4a   : > { %2213 = vmatpush.bf16.msrb.mxu0 %v2198_v27 }
 0xb4e   : > { %2214 = vmatpush.bf16.msrb.mxu0 %v2196_v28 }
 0xb51   : > { %3348 = vmatmul.msk.bf16.vlgmr.msra.gmra.mxu2 %vm1381_vm15, %v2461_v1 }
 0xb52   : > { %3344 = vmatmul.msk.bf16.vlgmr.msra.gmra.mxu3 %vm1381_vm15, %v2345_v24 }
 0xb61   : > { %3349 = vmatmul.msk.bf16.gmra.mxu2 %vm1381_vm15, %v2463_v48 }
 0xb62   : > { %3345 = vmatmul.msk.bf16.gmra.mxu3 %vm1381_vm15, %v2347_v26 }
 0xbb4   : > { %v2257_v29 = vpop.f32.mrf.mxu2 }
 0xbb5   : > { %v2139_v23 = vpop.f32.mrf.mxu3  ;;  %v5158_v31 = vadd.f32 %v2257_v29, %v1199_v12 }
 0xbb6   : > { %v5160_v14 = vadd.f32 %v2139_v23, %v1199_v12 }
 0xbb7   : > { %v2267_v32 = vsel %vm1205_vm1, %v5158_v31, -inf }
 0xbb8   : > { %v2149_v35 = vsel %vm1205_vm1, %v5160_v14, -inf  ;;  %2268 = vmax.xlane.f32.xlu1 %v2267_v32 }
 0xbb9   : > { %2150 = vmax.xlane.f32.xlu2 %v2149_v35 }
 0xbbc   : > { %v2259_v33 = vpop.f32.mrf.mxu2 }
 0xbbd   : > { %v2141_v37 = vpop.f32.mrf.mxu3  ;;  %v5169_v39 = vadd.f32 %v2259_v33, %v1200_v4 }
 0xbbe   : > { %v5171_v34 = vadd.f32 %v2141_v37, %v1200_v4 }
 0xbbf   : > { %v2270_v38 = vsel %vm1205_vm1, %v5169_v39, -inf }
 0xbc0   : > { %v2152_v30 = vsel %vm1205_vm1, %v5171_v34, -inf }
 0xbc1   : > { %2271 = vmax.xlane.f32.xlu2 %v2270_v38  ;;  %2153 = vmax.xlane.f32.xlu0 %v2152_v30 }
 0xbc4   : > { %v2262_v41 = vpop.f32.mrf.mxu2 }
 0xbc5   : > { %v2144_v42 = vpop.f32.mrf.mxu3  ;;  %v5180_v43 = vadd.f32 %v2262_v41, %v1201_v40 }
 0xbc6   : > { %v5182_v44 = vadd.f32 %v2144_v42, %v1201_v40 }
 0xbc7   : > { %v2273_v46 = vsel %vm1205_vm1, %v5180_v43, -inf }
 0xbc8   : > { %v2155_v47 = vsel %vm1205_vm1, %v5182_v44, -inf }
 0xbc9   : > { %2274 = vmax.xlane.f32.xlu2 %v2273_v46  ;;  %2156 = vmax.xlane.f32.xlu0 %v2155_v47 }
 0xbcc   : > { %v2264_v16 = vpop.f32.mrf.mxu2 }
 0xbcd   : > { %v2146_v51 = vpop.f32.mrf.mxu3  ;;  %v5191_v61 = vadd.f32 %v2264_v16, %v1202_v50 }
 0xbce   : > { %v5193_v53 = vadd.f32 %v2146_v51, %v1202_v50 }
 0xbcf   : > { %v2276_v60 = vsel %vm1205_vm1, %v5191_v61, -inf }
 0xbd0   : > { %v2158_v54 = vsel %vm1205_vm1, %v5193_v53, -inf }
 0xbd1   : > { %2159 = vmax.xlane.f32.xlu1 %v2158_v54  ;;  %2277 = vmax.xlane.f32.xlu0 %v2276_v60 }
 0xbd4   : > { %v2489_v55 = vpop.f32.mrf.mxu2 }
 0xbd5   : > { %v2373_v58 = vpop.f32.mrf.mxu3  ;;  %v5199_v62 = vadd.f32 %v2489_v55, %v1199_v12 }
 0xbd6   : > { %v5201_v49 = vadd.f32 %v2373_v58, %v1199_v12 }
 0xbd7   : > { %v2499_v63 = vsel %vm1205_vm1, %v5199_v62, -inf }
 0xbd8   : > { %v2383_v0 = vsel %vm1205_vm1, %v5201_v49, -inf }
 0xbd9   : > { %2384 = vmax.xlane.f32.xlu1 %v2383_v0  ;;  %2500 = vmax.xlane.f32.xlu0 %v2499_v63 }
 0xbdc   : > { %v2491_v1 = vpop.f32.mrf.mxu2 }
 0xbdd   : > { %v2375_v2 = vpop.f32.mrf.mxu3  ;;  %v5207_v3 = vadd.f32 %v2491_v1, %v1200_v4 }
 0xbde   : > { %v5209_v5 = vadd.f32 %v2375_v2, %v1200_v4 }
 0xbdf   : > { %v2502_v7 = vsel %vm1205_vm1, %v5207_v3, -inf }
 0xbe0   : > { %v2386_v57 = vsel %vm1205_vm1, %v5209_v5, -inf }
 0xbe1   : > { %2387 = vmax.xlane.f32.xlu2 %v2386_v57  ;;  %2503 = vmax.xlane.f32.xlu1 %v2502_v7 }
 0xbe4   : > { %v2494_v8 = vpop.f32.mrf.mxu2 }
 0xbe5   : > { %v2378_v56 = vpop.f32.mrf.mxu3  ;;  %v5215_v10 = vadd.f32 %v2494_v8, %v1201_v40 }
 0xbe6   : > { %v5217_v11 = vadd.f32 %v2378_v56, %v1201_v40 }
 0xbe7   : > { %v2505_v6 = vsel %vm1205_vm1, %v5215_v10, -inf }
 0xbe8   : > { %v2389_v15 = vsel %vm1205_vm1, %v5217_v11, -inf }
 0xbe9   : > { %2390 = vmax.xlane.f32.xlu2 %v2389_v15  ;;  %2506 = vmax.xlane.f32.xlu1 %v2505_v6 }
 0xbec   : > { %v2496_v17 = vpop.f32.mrf.mxu2 }
 0xbed   : > { %v2380_v19 = vpop.f32.mrf.mxu3  ;;  %v5223_v20 = vadd.f32 %v2496_v17, %v1202_v50 }
 0xbee   : > { %v5225_v22 = vadd.f32 %v2380_v19, %v1202_v50 }
 0xbef   : > { %v2508_v25 = vsel %vm1205_vm1, %v5223_v20, -inf }
 0xbf0   : > { %v2392_v24 = vsel %vm1205_vm1, %v5225_v22, -inf }
 0xbf1   : > { %2509 = vmax.xlane.f32.xlu2 %v2508_v25  ;;  %2393 = vmax.xlane.f32.xlu0 %v2392_v24 }
 0xc2b   : > { %v2269_v45 = vpop.xlane.xlu1 %2268 }
 0xc2c   : > { %v2151_v48 = vpop.xlane.xlu2 %2150  ;;  %v2279_v26 = vsub.f32 %v5158_v31, %v2269_v45 }
 0xc2d   : > { %v2161_v27 = vsub.f32 %v5160_v14, %v2151_v48 }
 0xc2e   : > { %v2283_v28 = vmul.f32 1.442695, %v2279_v26 }
 0xc2f   : > { %v2165_v12 = vmul.f32 1.442695, %v2161_v27 }
 0xc30   : > { %3660 = vpow2.f32 %v2283_v28 }
 0xc31   : > { %3662 = vpow2.f32 %v2165_v12 }
 0xc34   : > { %v2272_v29 = vpop.xlane.xlu2 %2271  ;;  %v2154_v23 = vpop.xlane.xlu0 %2153 }
 0xc35   : > { %v2280_v32 = vsub.f32 %v5169_v39, %v2272_v29  ;;  %v2162_v35 = vsub.f32 %v5171_v34, %v2154_v23 }
 0xc36   : > { %v5235_v4 = vpop.eup %3660 }
 0xc37   : > { %v5237_v33 = vpop.eup %3662  ;;  %v2285_v37 = vmul.f32 1.442695, %v2280_v32  ;;  %v2167_v38 = vmul.f32 1.442695, %v2162_v35  ;;  %v2291_v31 = vsel %vm1205_vm1, %v5235_v4, 0.0 }
 0xc38   : > { %2292 = vadd.xlane.f32.xlu2 %v2291_v31  ;;  %v2173_v14 = vsel %vm1205_vm1, %v5237_v33, 0.0 }
 0xc39   : > { %3664 = vpow2.f32 %v2285_v37  ;;  %2174 = vadd.xlane.f32.xlu0 %v2173_v14 }
 0xc3a   : > { %3666 = vpow2.f32 %v2167_v38 }
 0xc3c   : > { %v2275_v30 = vpop.xlane.xlu2 %2274  ;;  %v2157_v39 = vpop.xlane.xlu0 %2156 }
 0xc3d   : > { %v2281_v34 = vsub.f32 %v5180_v43, %v2275_v30  ;;  %v2163_v40 = vsub.f32 %v5182_v44, %v2157_v39 }
 0xc3f   : > { %v5245_v41 = vpop.eup %3664  ;;  %v2287_v42 = vmul.f32 1.442695, %v2281_v34  ;;  %v2169_v46 = vmul.f32 1.442695, %v2163_v40 }
 0xc40   : > { %v5247_v47 = vpop.eup %3666  ;;  %v2294_v50 = vsel %vm1205_vm1, %v5245_v41, 0.0 }
 0xc41   : > { %3668 = vpow2.f32 %v2287_v42  ;;  %v2176_v16 = vsel %vm1205_vm1, %v5247_v47, 0.0  ;;  %2295 = vadd.xlane.f32.xlu0 %v2294_v50 }
 0xc42   : > { %3670 = vpow2.f32 %v2169_v46  ;;  %2177 = vadd.xlane.f32.xlu1 %v2176_v16 }
 0xc44   : > { %v2160_v51 = vpop.xlane.xlu1 %2159  ;;  %v2278_v43 = vpop.xlane.xlu0 %2277 }
 0xc45   : > { %v2164_v44 = vsub.f32 %v5193_v53, %v2160_v51  ;;  %v2282_v60 = vsub.f32 %v5191_v61, %v2278_v43 }
 0xc47   : > { %v5255_v54 = vpop.eup %3668  ;;  %v2171_v55 = vmul.f32 1.442695, %v2164_v44  ;;  %v2289_v58 = vmul.f32 1.442695, %v2282_v60 }
 0xc48   : > { %v5257_v63 = vpop.eup %3670  ;;  %v2297_v0 = vsel %vm1205_vm1, %v5255_v54, 0.0 }
 0xc49   : > { %3672 = vpow2.f32 %v2171_v55  ;;  %2298 = vadd.xlane.f32.xlu2 %v2297_v0  ;;  %v2179_v1 = vsel %vm1205_vm1, %v5257_v63, 0.0 }
 0xc4a   : > { %3674 = vpow2.f32 %v2289_v58  ;;  %2180 = vadd.xlane.f32.xlu0 %v2179_v1 }
 0xc4c   : > { %v2385_v2 = vpop.xlane.xlu1 %2384  ;;  %v2501_v53 = vpop.xlane.xlu0 %2500 }
 0xc4d   : > { %v2395_v61 = vsub.f32 %v5201_v49, %v2385_v2  ;;  %v2511_v7 = vsub.f32 %v5199_v62, %v2501_v53 }
 0xc4f   : > { %v5265_v57 = vpop.eup %3672  ;;  %v2399_v8 = vmul.f32 1.442695, %v2395_v61  ;;  %v2515_v56 = vmul.f32 1.442695, %v2511_v7 }
 0xc50   : > { %v5267_v6 = vpop.eup %3674  ;;  %v2182_v15 = vsel %vm1205_vm1, %v5265_v57, 0.0 }
 0xc51   : > { %3676 = vpow2.f32 %v2399_v8  ;;  %2183 = vadd.xlane.f32.xlu1 %v2182_v15  ;;  %v2300_v17 = vsel %vm1205_vm1, %v5267_v6, 0.0 }
 0xc52   : > { %3678 = vpow2.f32 %v2515_v56  ;;  %2301 = vadd.xlane.f32.xlu0 %v2300_v17 }
 0xc54   : > { %v2388_v19 = vpop.xlane.xlu2 %2387  ;;  %v2504_v49 = vpop.xlane.xlu1 %2503 }
 0xc55   : > { %v2396_v62 = vsub.f32 %v5209_v5, %v2388_v19  ;;  %v2512_v25 = vsub.f32 %v5207_v3, %v2504_v49 }
 0xc57   : > { %v5275_v24 = vpop.eup %3676  ;;  %v2401_v45 = vmul.f32 1.442695, %v2396_v62  ;;  %v2517_v48 = vmul.f32 1.442695, %v2512_v25 }
 0xc58   : > { %v5277_v26 = vpop.eup %3678  ;;  %v2407_v27 = vsel %vm1205_vm1, %v5275_v24, 0.0 }
 0xc59   : > { %3680 = vpow2.f32 %v2401_v45  ;;  %2408 = vadd.xlane.f32.xlu1 %v2407_v27  ;;  %v2523_v28 = vsel %vm1205_vm1, %v5277_v26, 0.0 }
 0xc5a   : > { %3682 = vpow2.f32 %v2517_v48  ;;  %2524 = vadd.xlane.f32.xlu0 %v2523_v28 }
 0xc5c   : > { %v2391_v23 = vpop.xlane.xlu2 %2390  ;;  %v2507_v32 = vpop.xlane.xlu1 %2506 }
 0xc5d   : > { %v2513_v35 = vsub.f32 %v5215_v10, %v2507_v32  ;;  %v2397_v37 = vsub.f32 %v5217_v11, %v2391_v23 }
 0xc5f   : > { %v5283_v12 = vpop.eup %3680  ;;  %v2519_v31 = vmul.f32 1.442695, %v2513_v35  ;;  %v2403_v30 = vmul.f32 1.442695, %v2397_v37 }
 0xc60   : > { %v5285_v5 = vpop.eup %3682  ;;  %v2410_v3 = vsel %vm1205_vm1, %v5283_v12, 0.0 }
 0xc61   : > { %2411 = vadd.xlane.f32.xlu2 %v2410_v3  ;;  %v2526_v29 = vsel %vm1205_vm1, %v5285_v5, 0.0  ;;  %3684 = vpow2.f32 %v2519_v31 }
 0xc62   : > { %2527 = vadd.xlane.f32.xlu1 %v2526_v29  ;;  %3686 = vpow2.f32 %v2403_v30 }
 0xc64   : > { %v2394_v38 = vpop.xlane.xlu0 %2393  ;;  %v2510_v39 = vpop.xlane.xlu2 %2509 }
 0xc65   : > { %v2398_v14 = vsub.f32 %v5225_v22, %v2394_v38 }
 0xc67   : > { %v2405_v34 = vmul.f32 1.442695, %v2398_v14  ;;  %v5303_v40 = vpop.eup %3684 }
 0xc68   : > { %v5305_v42 = vpop.eup %3686  ;;  %v2529_v10 = vsel %vm1205_vm1, %v5303_v40, 0.0 }
 0xc69   : > { %3688 = vpow2.f32 %v2405_v34  ;;  %v2413_v22 = vsel %vm1205_vm1, %v5305_v42, 0.0 }
 0xc6e   : > { %2547 = vrot.lane.b32.xlu0 %v5109_v52, %s4265_s20 }
 0xc6f   : > { %v5309_v11 = vpop.eup %3688 }
 0xc76   : > { %2545 = vrot.lane.b32.xlu0 %v5105_v36, %s4265_s20 }
 0xc79   : > { %2431 = vrot.lane.b32.xlu2 %v5109_v52, %s4263_s26  ;;  %v2514_v52 = vsub.f32 %v5223_v20, %v2510_v39  ;;  %v2416_v20 = vsel %vm1205_vm1, %v5309_v11, 0.0 }
 0xc7b   : > { %2429 = vrot.lane.b32.xlu1 %v5105_v36, %s4263_s26  ;;  %v2521_v36 = vmul.f32 1.442695, %v2514_v52  ;;  %s5555_s26 = scalar_lea.vmem [#allocation17], %s4737_s22 }
 0xc7c   : > { %s5556_s20 = smov %s5555_s26 }
 0xc7d   : > { %3690 = vpow2.f32 %v2521_v36 }
 0xc83   : > { %v5315_v46 = vpop.eup %3690 }
 0xc84   : > { %v2532_v50 = vsel %vm1205_vm1, %v5315_v46, 0.0 }
 0xca0   : > { %2530 = vadd.xlane.f32.xlu0 %v2529_v10 }
 0xca2   : > { %2414 = vadd.xlane.f32.xlu2 %v2413_v22 }
 0xca5   : > { %2417 = vadd.xlane.f32.xlu1 %v2416_v20 }
 0xcaa   : > { %2533 = vadd.xlane.f32.xlu2 %v2532_v50 }
 0xcab   : > { %v2293_v51 = vpop.xlane.xlu2 %2292 }
 0xcac   : > { %v2175_v16 = vpop.xlane.xlu0 %2174  ;;  %3692 = vrcp.f32 %v2293_v51 }
 0xcad   : > { %3694 = vrcp.f32 %v2175_v16 }
 0xcb2   : > { %v3693_v60 = vpop.eup %3692 }
 0xcb3   : > { %v3695_v55 = vpop.eup %3694  ;;  %v2307_v1 = vmul.f32 %v3693_v60, %v5235_v4 }
 0xcb4   : > { %v2296_v43 = vpop.xlane.xlu0 %2295  ;;  %v2189_v53 = vmul.f32 %v3695_v55, %v5237_v33 }
 0xcb5   : > { %v2178_v44 = vpop.xlane.xlu1 %2177  ;;  %3696 = vrcp.f32 %v2296_v43 }
 0xcb6   : > { %3698 = vrcp.f32 %v2178_v44 }
 0xcbb   : > { %v3697_v58 = vpop.eup %3696 }
 0xcbc   : > { %v3699_v0 = vpop.eup %3698  ;;  %v2308_v2 = vmul.f32 %v3697_v58, %v5245_v41  ;;  %v2299_v15 = vpop.xlane.xlu2 %2298 }
 0xcbd   : > { %v2190_v61 = vmul.f32 %v3699_v0, %v5247_v47  ;;  %v2181_v7 = vpop.xlane.xlu0 %2180 }
 0xcbe   : > { %v2311_v8 = vpack.c.bf16 %v2308_v2, %v2307_v1  ;;  %3700 = vrcp.f32 %v2181_v7 }
 0xcbf   : > { %v2193_v56 = vpack.c.bf16 %v2190_v61, %v2189_v53  ;;  %3702 = vrcp.f32 %v2299_v15 }
 0xcc0   : > { %3342 = vmatmul.msk.bf16.vlgmr.msra.gmra.mxu1 %vm1205_vm1, %v2311_v8 }
 0xcc1   : > { %3338 = vmatmul.msk.bf16.vlgmr.msrb.gmra.mxu0 %vm1205_vm1, %v2193_v56 }
 0xcc4   : > { %v2184_v17 = vpop.xlane.xlu1 %2183  ;;  %v3701_v4 = vpop.eup %3700 }
 0xcc5   : > { %3704 = vrcp.f32 %v2184_v17  ;;  %v2302_v19 = vpop.xlane.xlu0 %2301  ;;  %v3703_v41 = vpop.eup %3702  ;;  %v2191_v47 = vmul.f32 %v3701_v4, %v5257_v63 }
 0xcc6   : > { %3706 = vrcp.f32 %v2302_v19  ;;  %v2309_v25 = vmul.f32 %v3703_v41, %v5255_v54 }
 0xccb   : > { %v3705_v49 = vpop.eup %3704 }
 0xccc   : > { %v3707_v33 = vpop.eup %3706  ;;  %v2192_v62 = vmul.f32 %v3705_v49, %v5265_v57  ;;  %v2409_v28 = vpop.xlane.xlu1 %2408 }
 0xccd   : > { %v2310_v45 = vmul.f32 %v3707_v33, %v5267_v6  ;;  %v2525_v29 = vpop.xlane.xlu0 %2524 }
 0xcce   : > { %v2194_v48 = vpack.c.bf16 %v2192_v62, %v2191_v47  ;;  %v3408_v62 = vld [vmem:[%s5555_s26 + $0x8] sm:$0xff] }
 0xccf   : > { %v2312_v27 = vpack.c.bf16 %v2310_v45, %v2309_v25  ;;  %2665 = vmatpush.bf16.msrb.mxu3 %v3408_v62  ;;  %v3407_v25 = vld [vmem:[%s5556_s20] sm:$0xff] }
 0xcd1   : > { %3339 = vmatmul.msk.bf16.gmra.mxu0 %vm1205_vm1, %v2194_v48  ;;  %3343 = vmatmul.msk.bf16.gmra.mxu1 %vm1205_vm1, %v2312_v27 }
 0xcd3   : > { %2666 = vmatpush.bf16.msrb.mxu3 %v3407_v25 }
 0xcd4   : > { %v2412_v3 = vpop.xlane.xlu2 %2411 }
 0xcd5   : > { %v2528_v23 = vpop.xlane.xlu1 %2527 }
 0xcd6   : > { %3708 = vrcp.f32 %v2528_v23 }
 0xcd7   : > { %3710 = vrcp.f32 %v2525_v29 }
 0xcd8   : > { %3712 = vrcp.f32 %v2412_v3 }
 0xcd9   : > { %3714 = vrcp.f32 %v2409_v28 }
 0xcdc   : > { %v2432_v32 = vpop.permute.xlu2 %2431  ;;  %v3709_v54 = vpop.eup %3708 }
 0xcdd   : > { %2447 = vmatpush.bf16.msra.mxu0 %v2432_v32  ;;  %v3711_v57 = vpop.eup %3710  ;;  %v2540_v6 = vmul.f32 %v3709_v54, %v5285_v5 }
 0xcde   : > { %v3713_v35 = vpop.eup %3712  ;;  %v2539_v37 = vmul.f32 %v3711_v57, %v5277_v26 }
 0xcdf   : > { %v3715_v31 = vpop.eup %3714  ;;  %v2424_v30 = vmul.f32 %v3713_v35, %v5283_v12 }
 0xce0   : > { %v2548_v63 = vpop.permute.xlu0 %2547  ;;  %v2543_v14 = vpack.c.bf16 %v2540_v6, %v2539_v37  ;;  %v2423_v39 = vmul.f32 %v3715_v31, %v5275_v24 }
 0xce1   : > { %2563 = vmatpush.bf16.msrb.mxu1 %v2548_v63 }
 0xce2   : > { %v2427_v52 = vpack.c.bf16 %v2424_v30, %v2423_v39 }
 0xce8   : > { %v2546_v38 = vpop.permute.xlu0 %2545 }
 0xce9   : > { %2564 = vmatpush.bf16.msrb.mxu1 %v2546_v38 }
 0xcec   : > { %3350 = vmatmul.msk.bf16.vlgmr.msrb.gmra.mxu1 %vm1205_vm1, %v2543_v14 }
 0xced   : > { %v2430_v34 = vpop.permute.xlu1 %2429 }
 0xcee   : > { %2448 = vmatpush.bf16.msra.mxu0 %v2430_v34 }
 0xcf1   : > { %3346 = vmatmul.msk.bf16.vlgmr.msra.gmra.mxu0 %vm1205_vm1, %v2427_v52 }
 0xd13   : > { %v2531_v10 = vpop.xlane.xlu0 %2530 }
 0xd15   : > { %v2415_v36 = vpop.xlane.xlu2 %2414 }
 0xd16   : > { %3716 = vrcp.f32 %v2415_v36 }
 0xd18   : > { %v2418_v5 = vpop.xlane.xlu1 %2417 }
 0xd19   : > { %3718 = vrcp.f32 %v2418_v5 }
 0xd1a   : > { %3720 = vrcp.f32 %v2531_v10 }
 0xd1c   : > { %v3717_v26 = vpop.eup %3716 }
 0xd1d   : > { %v2534_v22 = vpop.xlane.xlu2 %2533  ;;  %v2425_v12 = vmul.f32 %v3717_v26, %v5305_v42 }
 0xd1e   : > { %3722 = vrcp.f32 %v2534_v22 }
 0xd1f   : > { %v3719_v20 = vpop.eup %3718 }
 0xd20   : > { %v2426_v50 = vmul.f32 %v3719_v20, %v5309_v11  ;;  %v3721_v24 = vpop.eup %3720 }
 0xd21   : > { %v2541_v43 = vmul.f32 %v3721_v24, %v5303_v40 }
 0xd22   : > { %v2428_v16 = vpack.c.bf16 %v2426_v50, %v2425_v12 }
 0xd24   : > { %v3723_v51 = vpop.eup %3722  ;;  %3347 = vmatmul.msk.bf16.gmra.mxu0 %vm1205_vm1, %v2428_v16 }
 0xd25   : > { %v2542_v44 = vmul.f32 %v3723_v51, %v5315_v46 }
 0xd27   : > { %v2544_v60 = vpack.c.bf16 %v2542_v44, %v2541_v43 }
 0xd29   : > { %3351 = vmatmul.msk.bf16.gmra.mxu1 %vm1205_vm1, %v2544_v60 }
 0xd3d   : > { %v2334_v55 = vpop.f32.mrf.mxu1 }
 0xd3e   : > { %v2216_v1 = vpop.f32.mrf.mxu0 }
 0xd45   : > { %v2336_v58 = vpop.f32.mrf.mxu1 }
 0xd46   : > { %v3536_v0 = vpack.i.bf16 %v2336_v58, %v2334_v55  ;;  %v2218_v42 = vpop.f32.mrf.mxu0 }
 0xd48   : > { %3537 = vrot.lane.b32.xlu1 %v3536_v0, %s4266_s6 }
 0xd4e   : > { %v2339_v11 = vpop.f32.mrf.mxu1  ;;  %v2221_v2 = vpop.f32.mrf.mxu0 }
 0xd56   : > { %v2341_v53 = vpop.f32.mrf.mxu1  ;;  %v2223_v61 = vpop.f32.mrf.mxu0 }
 0xd57   : > { %v3551_v17 = vpack.i.bf16 %v2341_v53, %v2339_v11 }
 0xd69   : > { %v2566_v7 = vpop.f32.mrf.mxu1 }
 0xd6e   : > { %v2450_v8 = vpop.f32.mrf.mxu0 }
 0xd71   : > { %v2568_v40 = vpop.f32.mrf.mxu1 }
 0xd72   : > { %v3546_v56 = vpack.i.bf16 %v2568_v40, %v2566_v7 }
 0xd74   : > { %3547 = vrot.lane.b32.xlu2 %v3546_v56, %s4268_s8 }
 0xd76   : > { %v2452_v46 = vpop.f32.mrf.mxu0 }
 0xd77   : > { %v3541_v15 = vpack.i.bf16 %v2452_v46, %v2450_v8 }
 0xd79   : > { %3542 = vrot.lane.b32.xlu0 %v3541_v15, %s4267_s28 }
 0xd81   : > { %3552 = vrot.lane.b32.xlu0 %v3551_v17, %s4266_s6 }
 0xda1   : > { %v2455_v19 = vpop.f32.mrf.mxu0 }
 0xda6   : > { %v2571_v4 = vpop.f32.mrf.mxu1 }
 0xda9   : > { %v2457_v41 = vpop.f32.mrf.mxu0 }
 0xdaa   : > { %v3556_v49 = vpack.i.bf16 %v2457_v41, %v2455_v19 }
 0xdac   : > { %3557 = vrot.lane.b32.xlu1 %v3556_v49, %s4267_s28  ;;  %s5557_s28 = scalar_lea.vmem [#allocation18], %s4705_s5 }
 0xdad   : > { %v3573_v43 = vld [vmem:[%s5557_s28] ss:$0 sm:$0xff] }
 0xdae   : > { %v2573_v33 = vpop.f32.mrf.mxu1 }
 0xdaf   : > { %v3561_v47 = vpack.i.bf16 %v2573_v33, %v2571_v4 }
 0xdb1   : > { %3562 = vrot.lane.b32.xlu2 %v3561_v47, %s4268_s8  ;;  %s5558_s8 = scalar_lea.vmem [#allocation23], %s4737_s22  ;;  %s5560_s22 = scalar_lea.vmem [#allocation20], %s4705_s5 }
 0xdb2   : > { %s5559_s25 = smov %s5558_s8  ;;  %s5563_s5 = sld [smem:[#allocation39_spill]] }
 0xdb8   : > { %p3390_p8 = scmp.ne.s32.totalorder %s5563_s5, 1 }
 0xdba   : > { %v3538_v45 = vpop.permute.xlu1 %3537 }
 0xdbb   : > { %v3540_v48 = vunpack.i.h.bf16 %v3538_v45  ;;  %v3539_v27 = vunpack.i.l.bf16 %v3538_v45 }
 0xdbd   : > { %v2625_v32 = vsel %vm1381_vm15, %v2218_v42, %v3540_v48  ;;  %v2624_v63 = vsel %vm1381_vm15, %v2216_v1, %v3539_v27 }
 0xdce   : > { %v3548_v28 = vpop.permute.xlu2 %3547 }
 0xdcf   : > { %v3550_v54 = vunpack.i.h.bf16 %v3548_v28  ;;  %v3549_v57 = vunpack.i.l.bf16 %v3548_v28 }
 0xdeb   : > { %v3543_v3 = vpop.permute.xlu0 %3542 }
 0xdec   : > { %v3545_v29 = vunpack.i.h.bf16 %v3543_v3  ;;  %v3544_v23 = vunpack.i.l.bf16 %v3543_v3 }
 0xdee   : > { %v2629_v6 = vsel %vm1892_vm0, %v2625_v32, %v3545_v29  ;;  %v2628_v35 = vsel %vm1892_vm0, %v2624_v63, %v3544_v23  ;;  %v3410_v23 = vld [vmem:[%s5558_s8 + $0x8] sm:$0xff] }
 0xdef   : > { %v2633_v37 = vsel %vm1897_vm2, %v2629_v6, %v3550_v54  ;;  %v2632_v38 = vsel %vm1897_vm2, %v2628_v35, %v3549_v57  ;;  %2829 = vmatpush.bf16.msrb.mxu0 %v3410_v23  ;;  %v3409_v54 = vld [vmem:[%s5559_s25] sm:$0xff]  ;;  %v3414_v23 = vld [vmem:[%s4782_s27 + $0x18] sm:$0xff] }
 0xdf0   : > { %v2636_v31 = vpack.c.bf16 %v2633_v37, %v2632_v38  ;;  %2886 = vmatpush.bf16.msrb.mxu2 %v3414_v23 }
 0xdf2   : > { %3360 = vmatmul.msk.bf16.vlgmr.msrb.gmra.mxu3 %vm1205_vm1, %v2636_v31 }
 0xdf3   : > { %v3553_v14 = vpop.permute.xlu0 %3552  ;;  %2830 = vmatpush.bf16.msrb.mxu0 %v3409_v54 }
 0xdf4   : > { %v3555_v30 = vunpack.i.h.bf16 %v3553_v14  ;;  %v3554_v39 = vunpack.i.l.bf16 %v3553_v14 }
 0xdf6   : > { %v2627_v10 = vsel %vm1381_vm15, %v2223_v61, %v3555_v30  ;;  %v2626_v26 = vsel %vm1381_vm15, %v2221_v2, %v3554_v39 }
 0xe0b   : > { %v3563_v34 = vpop.permute.xlu2 %3562 }
 0xe0c   : > { %v3565_v22 = vunpack.i.h.bf16 %v3563_v34  ;;  %v3564_v20 = vunpack.i.l.bf16 %v3563_v34 }
 0xe1e   : > { %v3558_v52 = vpop.permute.xlu1 %3557 }
 0xe1f   : > { %v3560_v36 = vunpack.i.h.bf16 %v3558_v52  ;;  %v3559_v5 = vunpack.i.l.bf16 %v3558_v52 }
 0xe21   : > { %v2630_v12 = vsel %vm1892_vm0, %v2626_v26, %v3559_v5  ;;  %v2631_v50 = vsel %vm1892_vm0, %v2627_v10, %v3560_v36 }
 0xe22   : > { %v2634_v24 = vsel %vm1897_vm2, %v2630_v12, %v3564_v20  ;;  %v2635_v16 = vsel %vm1897_vm2, %v2631_v50, %v3565_v22  ;;  %v3574_v20 = vld [vmem:[%s5560_s22] ss:$0 sm:$0xff] }
 0xe23   : > { %v2637_v51 = vpack.c.bf16 %v2635_v16, %v2634_v24  ;;  %v3575_v16 = vld [vmem:[%s5561_s7] ss:$0 sm:$0xff] }
 0xe25   : > { %3361 = vmatmul.msk.bf16.gmra.mxu3 %vm1205_vm1, %v2637_v51 }
 0xe75   : > { %v2668_v44 = vpop.f32.mrf.mxu3 }
 0xe76   : > { %v2669_v60 = vadd.f32 %v3573_v43, %v2668_v44 }
 0xe78   : > { %v5370_v55 = vadd.f32 %v2669_v60, %v5051_v9 }
 0xe7a   : > { %v2684_v58 = vsel %vm1205_vm1, %v5370_v55, 0.0 }
 0xe7b   : > { %2685 = vadd.xlane.f32.xlu0 %v2684_v58 }
 0xe7d   : > { %v2670_v0 = vpop.f32.mrf.mxu3 }
 0xe7e   : > { %v2671_v1 = vadd.f32 %v3573_v43, %v2670_v0 }
 0xe80   : > { %v5375_v42 = vadd.f32 %v2671_v1, %v5055_v13 }
 0xe82   : > { %v2687_v11 = vsel %vm1205_vm1, %v5375_v42, 0.0 }
 0xe83   : > { %2688 = vadd.xlane.f32.xlu1 %v2687_v11 }
 0xea8   : > { %v2673_v2 = vpop.f32.mrf.mxu3 }
 0xea9   : > { %v2674_v53 = vadd.f32 %v3573_v43, %v2673_v2 }
 0xeab   : > { %v5380_v61 = vadd.f32 %v2674_v53, %v5059_v21 }
 0xead   : > { %v2690_v9 = vsel %vm1205_vm1, %v5380_v61, 0.0 }
 0xeae   : > { %2691 = vadd.xlane.f32.xlu2 %v2690_v9 }
 0xeb0   : > { %v2675_v7 = vpop.f32.mrf.mxu3 }
 0xeb1   : > { %v2676_v8 = vadd.f32 %v3573_v43, %v2675_v7 }
 0xeb3   : > { %v5385_v40 = vadd.f32 %v2676_v8, %v5063_v59 }
 0xeb5   : > { %v2693_v13 = vsel %vm1205_vm1, %v5385_v40, 0.0 }
 0xeb6   : > { %2694 = vadd.xlane.f32.xlu0 %v2693_v13 }
 0xeee   : > { %v2686_v56 = vpop.xlane.xlu0 %2685 }
 0xeef   : > { %v2696_v46 = vmul.f32 %v2686_v56, %v4802_v18 }
 0xef1   : > { %v2700_v15 = vsub.f32 %v5370_v55, %v2696_v46 }
 0xef3   : > { %v2704_v21 = vmul.f32 %v2700_v15, %v2700_v15 }
 0xef5   : > { %v2708_v17 = vsel %vm1205_vm1, %v2704_v21, 0.0 }
 0xef6   : > { %v2689_v19 = vpop.xlane.xlu1 %2688  ;;  %2709 = vadd.xlane.f32.xlu1 %v2708_v17 }
 0xef7   : > { %v2697_v4 = vmul.f32 %v2689_v19, %v4802_v18 }
 0xef9   : > { %v2701_v41 = vsub.f32 %v5375_v42, %v2697_v4 }
 0xefb   : > { %v2705_v59 = vmul.f32 %v2701_v41, %v2701_v41 }
 0xefd   : > { %v2711_v49 = vsel %vm1205_vm1, %v2705_v59, 0.0 }
 0xefe   : > { %2712 = vadd.xlane.f32.xlu2 %v2711_v49 }
 0xf21   : > { %v2692_v33 = vpop.xlane.xlu2 %2691 }
 0xf22   : > { %v2698_v47 = vmul.f32 %v2692_v33, %v4802_v18 }
 0xf24   : > { %v5397_v62 = vsub.f32 %v5380_v61, %v2698_v47 }
 0xf26   : > { %v2706_v25 = vmul.f32 %v5397_v62, %v5397_v62 }
 0xf28   : > { %v2714_v45 = vsel %vm1205_vm1, %v2706_v25, 0.0 }
 0xf29   : > { %2715 = vadd.xlane.f32.xlu0 %v2714_v45  ;;  %v2695_v48 = vpop.xlane.xlu0 %2694 }
 0xf2a   : > { %v2699_v27 = vmul.f32 %v2695_v48, %v4802_v18 }
 0xf2c   : > { %v5404_v28 = vsub.f32 %v5385_v40, %v2699_v27 }
 0xf2e   : > { %v2707_v3 = vmul.f32 %v5404_v28, %v5404_v28 }
 0xf30   : > { %v2717_v29 = vsel %vm1205_vm1, %v2707_v3, 0.0 }
 0xf31   : > { %2718 = vadd.xlane.f32.xlu1 %v2717_v29 }
 0xf69   : > { %v2710_v32 = vpop.xlane.xlu1 %2709 }
 0xf6a   : > { %v2720_v63 = vmul.f32 %v2710_v32, %v4802_v18  ;;  %v3413_v32 = vld [vmem:[%s4782_s27 + $0x10] sm:$0xff] }
 0xf6b   : > { %2887 = vmatpush.bf16.msrb.mxu2 %v3413_v32 }
 0xf6c   : > { %v2724_v57 = vadd.f32 1e-05, %v2720_v63  ;;  %v3411_v63 = vld [vmem:[%s4782_s27] sm:$0xff] }
 0xf6e   : > { %3724 = vrsqrt.f32 %v2724_v57  ;;  %vm2734_vm0 = vweird.f32 %v2724_v57 }
 0xf71   : > { %v2713_v6 = vpop.xlane.xlu2 %2712 }
 0xf72   : > { %v2721_v35 = vmul.f32 %v2713_v6, %v4802_v18 }
 0xf74   : > { %v3725_v37 = vpop.eup %3724  ;;  %v2725_v38 = vadd.f32 1e-05, %v2721_v35 }
 0xf75   : > { %v2729_v31 = vmul.f32 %v3725_v37, %v2724_v57  ;;  %vm2735_vm15 = vweird.f32 %v3725_v37  ;;  %v3576_v57 = vld [vmem:[%s5562_s0] ss:$0 sm:$0xff] }
 0xf76   : > { %3726 = vrsqrt.f32 %v2725_v38  ;;  %vm2736_vm2 = vmor %vm2734_vm0, %vm2735_vm15  ;;  %vm2744_vm4 = vweird.f32 %v2725_v38 }
 0xf77   : > { %v2730_v14 = vmul.f32 %v3725_v37, %v2729_v31 }
 0xf79   : > { %v2731_v30 = vmul.f32 0.5, %v2730_v14 }
 0xf7b   : > { %v2732_v39 = vsub.f32 1.5, %v2731_v30 }
 0xf7c   : > { %v3727_v34 = vpop.eup %3726 }
 0xf7d   : > { %v2733_v52 = vmul.f32 %v3725_v37, %v2732_v39  ;;  %v2739_v36 = vmul.f32 %v3727_v34, %v2725_v38  ;;  %vm2745_vm3 = vweird.f32 %v3727_v34 }
 0xf7e   : > { %vm2746_vm5 = vmor %vm2744_vm4, %vm2745_vm3 }
 0xf7f   : > { %v2740_v5 = vmul.f32 %v3727_v34, %v2739_v36  ;;  %v2737_v10 = vsel %vm2736_vm2, %v3725_v37, %v2733_v52 }
 0xf80   : > { %v2768_v12 = vmul.f32 %v2737_v10, %v2700_v15  ;;  %v3577_v10 = vld [vmem:[%s1040_s4] ss:$0 sm:$0xff] }
 0xf81   : > { %v2741_v26 = vmul.f32 0.5, %v2740_v5 }
 0xf82   : > { %v2775_v51 = vmul.f32 %v3574_v20, %v2768_v12 }
 0xf83   : > { %v2742_v22 = vsub.f32 1.5, %v2741_v26 }
 0xf84   : > { %v2782_v60 = vadd.f32 %v3575_v16, %v2775_v51 }
 0xf85   : > { %v2743_v50 = vmul.f32 %v3727_v34, %v2742_v22 }
 0xf87   : > { %v2747_v24 = vsel %vm2746_vm5, %v3727_v34, %v2743_v50 }
 0xf88   : > { %v2769_v43 = vmul.f32 %v2747_v24, %v2701_v41 }
 0xf8a   : > { %v2776_v44 = vmul.f32 %v3574_v20, %v2769_v43 }
 0xf8c   : > { %v2783_v58 = vadd.f32 %v3575_v16, %v2776_v44 }
 0xf8e   : > { %v2800_v0 = vpack.c.bf16 %v2783_v58, %v2782_v60 }
 0xf90   : > { %3370 = vmatmul.msk.bf16.vlgmr.msrb.gmra.mxu0 %vm1205_vm1, %v2800_v0 }
 0xf9c   : > { %v2716_v1 = vpop.xlane.xlu0 %2715 }
 0xf9d   : > { %v2722_v11 = vmul.f32 %v2716_v1, %v4802_v18 }
 0xf9f   : > { %v2726_v2 = vadd.f32 1e-05, %v2722_v11 }
 0xfa1   : > { %3728 = vrsqrt.f32 %v2726_v2  ;;  %vm2754_vm7 = vweird.f32 %v2726_v2 }
 0xfa4   : > { %v2719_v53 = vpop.xlane.xlu1 %2718 }
 0xfa5   : > { %v2723_v9 = vmul.f32 %v2719_v53, %v4802_v18 }
 0xfa7   : > { %v3729_v7 = vpop.eup %3728  ;;  %v2727_v8 = vadd.f32 1e-05, %v2723_v9 }
 0xfa8   : > { %v2749_v13 = vmul.f32 %v3729_v7, %v2726_v2  ;;  %vm2755_vm6 = vweird.f32 %v3729_v7 }
 0xfa9   : > { %3730 = vrsqrt.f32 %v2727_v8  ;;  %vm2756_vm8 = vmor %vm2754_vm7, %vm2755_vm6  ;;  %vm2764_vm10 = vweird.f32 %v2727_v8 }
 0xfaa   : > { %v2750_v56 = vmul.f32 %v3729_v7, %v2749_v13 }
 0xfac   : > { %v2751_v46 = vmul.f32 0.5, %v2750_v56 }
 0xfae   : > { %v2752_v15 = vsub.f32 1.5, %v2751_v46 }
 0xfaf   : > { %v3731_v21 = vpop.eup %3730 }
 0xfb0   : > { %v2753_v17 = vmul.f32 %v3729_v7, %v2752_v15  ;;  %v2759_v19 = vmul.f32 %v3731_v21, %v2727_v8  ;;  %vm2765_vm9 = vweird.f32 %v3731_v21 }
 0xfb1   : > { %vm2766_vm11 = vmor %vm2764_vm10, %vm2765_vm9 }
 0xfb2   : > { %v2760_v4 = vmul.f32 %v3731_v21, %v2759_v19  ;;  %v2757_v41 = vsel %vm2756_vm8, %v3729_v7, %v2753_v17 }
 0xfb3   : > { %v2770_v18 = vmul.f32 %v2757_v41, %v5397_v62  ;;  %v3412_v62 = vld [vmem:[%s4782_s27 + $0x8] sm:$0xff] }
 0xfb4   : > { %v2761_v59 = vmul.f32 0.5, %v2760_v4  ;;  %2888 = vmatpush.bf16.msrb.mxu2 %v3412_v62 }
 0xfb5   : > { %v2777_v45 = vmul.f32 %v3574_v20, %v2770_v18 }
 0xfb6   : > { %v2762_v49 = vsub.f32 1.5, %v2761_v59 }
 0xfb7   : > { %v2784_v27 = vadd.f32 %v3575_v16, %v2777_v45 }
 0xfb8   : > { %v2763_v33 = vmul.f32 %v3731_v21, %v2762_v49  ;;  %2889 = vmatpush.bf16.msrb.mxu2 %v3411_v63 }
 0xfba   : > { %v2767_v47 = vsel %vm2766_vm11, %v3731_v21, %v2763_v33 }
 0xfbb   : > { %v2771_v25 = vmul.f32 %v2767_v47, %v5404_v28 }
 0xfbd   : > { %v2778_v48 = vmul.f32 %v3574_v20, %v2771_v25 }
 0xfbf   : > { %v2785_v3 = vadd.f32 %v3575_v16, %v2778_v48 }
 0xfc1   : > { %v2801_v29 = vpack.c.bf16 %v2785_v3, %v2784_v27 }
 0xfc3   : > { %3371 = vmatmul.msk.bf16.gmra.mxu0 %vm1205_vm1, %v2801_v29 }
0x100d   : > { %v2832_v54 = vpop.f32.mrf.mxu0 }
0x100e   : > { %v2833_v28 = vadd.f32 %v3576_v57, %v2832_v54 }
0x1010   : > { %v2842_v37 = vmax.f32 %v2833_v28, 0.0 }
0x1015   : > { %v2834_v6 = vpop.f32.mrf.mxu0 }
0x1016   : > { %v2835_v35 = vadd.f32 %v3576_v57, %v2834_v6 }
0x1018   : > { %v2843_v38 = vmax.f32 %v2835_v35, 0.0 }
0x101a   : > { %v2846_v31 = vpack.c.bf16 %v2843_v38, %v2842_v37 }
0x101c   : > { %3388 = vmatmul.msk.bf16.vlgmr.msrb.gmra.mxu2 %vm2875_vm12, %v2846_v31 }
0x1040   : > { %v2837_v14 = vpop.f32.mrf.mxu0 }
0x1041   : > { %v2838_v30 = vadd.f32 %v3576_v57, %v2837_v14 }
0x1043   : > { %v2844_v52 = vmax.f32 %v2838_v30, 0.0 }
0x1048   : > { %v2839_v39 = vpop.f32.mrf.mxu0 }
0x1049   : > { %v2840_v34 = vadd.f32 %v3576_v57, %v2839_v39 }
0x104b   : > { %v2845_v36 = vmax.f32 %v2840_v34, 0.0 }
0x104d   : > { %v2847_v5 = vpack.c.bf16 %v2845_v36, %v2844_v52 }
0x104f   : > { %3389 = vmatmul.msk.bf16.gmra.mxu2 %vm2875_vm12, %v2847_v5 }
0x109f   : > { %v2891_v26 = vpop.f32.mrf.mxu2 }
0x10a0   : > { %v2892_v22 = vadd.f32 %v3577_v10, %v2891_v26 }
0x10a2   : > { %v2901_v20 = vadd.f32 %v2892_v22, %v5370_v55 }
0x10a4   : > { %2905 = vst.msk [vmem:[#allocation2] sm:$0xff] %vm1205_vm1, %v2901_v20 }
0x10a7   : > { %v2893_v12 = vpop.f32.mrf.mxu2 }
0x10a8   : > { %v2894_v50 = vadd.f32 %v3577_v10, %v2893_v12 }
0x10aa   : > { %v2902_v24 = vadd.f32 %v2894_v50, %v5375_v42 }
0x10ac   : > { %2906 = vst.msk [vmem:[#allocation2 + $0x8] sm:$0xff] %vm1205_vm1, %v2902_v24 }
0x10d2   : > { %v2896_v16 = vpop.f32.mrf.mxu2 }
0x10d3   : > { %v2897_v51 = vadd.f32 %v3577_v10, %v2896_v16 }
0x10d5   : > { %v2903_v43 = vadd.f32 %v2897_v51, %v5380_v61 }
0x10d7   : > { %2907 = vst.msk [vmem:[#allocation2 + $0x10] sm:$0xff] %vm1205_vm1, %v2903_v43 }
0x10da   : > { %v2898_v44 = vpop.f32.mrf.mxu2 }
0x10db   : > { %v2899_v60 = vadd.f32 %v3577_v10, %v2898_v44  ;;  %2912 = sbr.rel (%p3390_p8) target bundleno = 4324 (0x10e4), region = 168 }
0x10dd   : > { %v2904_v58 = vadd.f32 %v2899_v60, %v5385_v40 }
0x10df   : > { %2908 = vst.msk [vmem:[#allocation2 + $0x18] sm:$0xff] %vm1205_vm1, %v2904_v58 }
0x10e0   : > { %2913 = vst.msk [vmem:[#allocation27] sm:$0xff] %vm1205_vm1, %v2901_v20 }
0x10e1   : > { %2914 = vst.msk [vmem:[#allocation27 + $0x8] sm:$0xff] %vm1205_vm1, %v2902_v24 }
0x10e2   : > { %2915 = vst.msk [vmem:[#allocation27 + $0x10] sm:$0xff] %vm1205_vm1, %v2903_v43 }
0x10e3   : > { %2916 = vst.msk [vmem:[#allocation27 + $0x18] sm:$0xff] %vm1205_vm1, %v2904_v58 }
0x10e4 PF: > { %s5564_s4 = sld [smem:[#allocation39_spill]]  ;;  %s4269_s27 = smov [#allocation27]  }
0x10e5   : > { %s2922_s24 = sshll.u32 %s4269_s27, 4  ;;  %s5565_s29 = sld [smem:[#allocation53_spill]]  ;;  %s2923_s24 = int_to_ptr.vmem [resolvable:$true] %s2922_s24 }
0x10e6   : > { %s4270_s23 = smov 128  }
0x10ea   : > { %p3453_p9 = scmp.eq.s32.totalorder %s5564_s4, 1 }
0x10eb   : > { %s2924_s18 = sshll.u32 %s5565_s29, 4  ;;  %s2925_s18 = int_to_ptr.hbm [resolvable:$true] %s2924_s18 }
0x10ec   : > { %3450 = dma.vmem_to_hbm [thread:$0]  (%p3453_p9), %s2923_s24, 512, %s2925_s18, [#allocation5], %s4270_s23, %s4270_s23, %s4266_s6  }
0x10ed   : > { %4233 = dma.done.wait (%p3453_p9), [#allocation5], 512  }
0x10ee   : > { %4235 = vsyncadd (%p3453_p9), [#allocation5], 4294966784 }
0x10ef PF: > { %s5566_s24 = sld [smem:[#allocation40_spill]] }
0x10f0   : > { %s5567_s1 = sld [smem:[#allocation37_spill]] }
0x10f1   : > { %s5568_s22 = sld [smem:[#allocation38_spill]] }
0x10f2   : > { %s5569_s23 = sld [smem:[#allocation41_spill]] }
0x10f5   : > { %p52_p10 = scmp.ge.s32.totalorder %s5566_s24, 4  }
0x10f7   :  { %54 = sbr.rel (!%p52_p10) target bundleno = 30 (0x1e), region = 322 }
0x10fc   :  { %2941 = vsyncpa [#allocation4], 1 }
0x10fd   :  { %2943 = vsyncpa [#allocation4 + $0x1], 1 }
0x10fe   :  { %2944 = vsyncpa [#allocation7], 1 }
0x10ff   :  { %2946 = vsyncpa [#allocation7 + $0x1], 1 }
0x1100   :  { %2947 = vsyncpa [#allocation10], 1 }
0x1101   :  { %2949 = vsyncpa [#allocation10 + $0x1], 1 }
0x1102   :  { %2950 = vsyncpa [#allocation13], 1 }
0x1103   :  { %2952 = vsyncpa [#allocation13 + $0x1], 1 }
0x1104   :  { %2953 = vsyncpa [#allocation16], 1 }
0x1105   :  { %2955 = vsyncpa [#allocation16 + $0x1], 1 }
0x1106   :  { %2956 = vsyncpa [#allocation19], 1 }
0x1107   :  { %2958 = vsyncpa [#allocation19 + $0x1], 1 }
0x1108   :  { %2959 = vsyncpa [#allocation22], 1 }
0x1109   :  { %2961 = vsyncpa [#allocation22 + $0x1], 1 }
0x110a   :  { %2962 = vsyncpa [#allocation25], 1 }
0x110b   :  { %2964 = vsyncpa [#allocation25 + $0x1], 1 }
0x110c   :  { %2965 = vsyncpa [#allocation5], 1 }
0x110d   :  { %2967 = vsyncpa [#allocation5 + $0x1], 1 }

</bundles_post_ra>
